<compile_context>
chip_gen: v7x
topology: tpu7x:2x2x1
jax: 0.10.0
libtpu: 0.0.40
codegen_flags: <defaults>
</compile_context>

<pallas_src>
import jax
import jax.numpy as jnp
from jax.experimental import pallas as pl
from jax.experimental.pallas import tpu as pltpu

EPS = 1e-5
NEG_SLOPE = 0.01

K_IN = 784      # raw input features
K_PAD = 896     # 7 * 128, lane-aligned K for the first matmul
H1 = 512
H2 = 256
OUT = 10        # real logits
OUT_PAD = 128   # lane-dense output width


def _round_up(n, m):
    return ((n + m - 1) // m) * m


def _silu(x):
    return x * jax.nn.sigmoid(x)


def mlp_kernel(x_ref, w1_ref, b1_ref, w2_ref, b2_ref, w3_ref, b3_ref, out_ref):
    # x tile is bf16 (halves the input DMA); matmuls run bf16 x bf16 -> f32 acc.
    x = x_ref[...]                                                     # (tb, 896) bf16

    # --- Linear(896 -> 512) with BN1 folded in, then LeakyReLU (dropout = id) ---
    h1 = jnp.dot(x, w1_ref[...], preferred_element_type=jnp.float32) + b1_ref[...]
    h1 = jnp.where(h1 >= 0, h1, NEG_SLOPE * h1)                        # leaky_relu, f32

    # --- Linear(512 -> 256) with BN2 folded in, then SiLU (dropout = id) ---
    h2 = jnp.dot(h1.astype(jnp.bfloat16), w2_ref[...],
                 preferred_element_type=jnp.float32) + b2_ref[...]
    h2 = _silu(h2)                                                     # f32

    # --- Linear(256 -> 128 padded) + SiLU (padded lanes are exactly 0) ---
    h3 = jnp.dot(h2.astype(jnp.bfloat16), w3_ref[...],
                 preferred_element_type=jnp.float32) + b3_ref[...]
    out_ref[...] = _silu(h3)


def fold_and_pack_params(p):
    """Host-side prep: fold eval-mode BN into the Linears, pad to lane-aligned
    shapes, and cast weights to bf16 for the MXU. Biases stay f32."""

    def bn_fold(w, b, gamma, beta, mean, var):
        scale = gamma * jax.lax.rsqrt(var + EPS)         # (1, N)
        return w * scale, (b - mean) * scale + beta      # exact in eval mode

    w1f, b1f = bn_fold(p["w1"], p["b1"], p["g1"], p["be1"], p["m1"], p["v1"])
    w2f, b2f = bn_fold(p["w2"], p["b2"], p["g2"], p["be2"], p["m2"], p["v2"])

    w1f = jnp.pad(w1f, ((0, K_PAD - K_IN), (0, 0)))           # (896, 512)
    w3p = jnp.pad(p["w3"], ((0, 0), (0, OUT_PAD - OUT)))      # (256, 128)
    b3p = jnp.pad(p["b3"], ((0, 0), (0, OUT_PAD - OUT)))      # (1, 128)

    return dict(
        w1=w1f.astype(jnp.bfloat16), b1=b1f.astype(jnp.float32),
        w2=w2f.astype(jnp.bfloat16), b2=b2f.astype(jnp.float32),
        w3=w3p.astype(jnp.bfloat16), b3=b3p.astype(jnp.float32),
    )


def classification_forward(x, folded, *, tb=None):
    """x: (B, 784) float32. folded: output of fold_and_pack_params."""
    B, D = x.shape
    assert D == K_IN

    if tb is None:
        tb = 256                      # good for v6e/v7x; also fine on v5e
    b8 = _round_up(B, 8)
    tb = min(tb, b8)                  # multiple of 8 by construction
    b_pad = _round_up(b8, tb)

    # Pad batch + feature dims, cast to bf16 (MXU operand / half the DMA bytes).
    x_p = jnp.pad(x, ((0, b_pad - B), (0, K_PAD - K_IN))).astype(jnp.bfloat16)

    def resident(shape):
        # whole array, constant block index -> stays resident across the batch grid
        return pl.BlockSpec(shape, lambda i: (0,) * len(shape))

    w1, b1 = folded["w1"], folded["b1"]
    w2, b2 = folded["w2"], folded["b2"]
    w3, b3 = folded["w3"], folded["b3"]

    grid = (b_pad // tb,)
    out = pl.pallas_call(
        mlp_kernel,
        out_shape=jax.ShapeDtypeStruct((b_pad, OUT_PAD), jnp.float32),
        grid_spec=pltpu.PrefetchScalarGridSpec(
            num_scalar_prefetch=0,
            grid=grid,
            in_specs=[
                pl.BlockSpec((tb, K_PAD), lambda i: (i, 0)),   # x, tiled over batch
                resident(w1.shape), resident(b1.shape),
                resident(w2.shape), resident(b2.shape),
                resident(w3.shape), resident(b3.shape),
            ],
            out_specs=pl.BlockSpec((tb, OUT_PAD), lambda i: (i, 0)),
        ),
        compiler_params=pltpu.CompilerParams(
            dimension_semantics=("parallel",),   # shards batch tiles across TCs (v7x)
        ),
    )(x_p, w1, b1, w2, b2, w3, b3)

    return out[:B, :OUT]


def init_params(key):
    """Deterministic parameter init matching the nn.Module shapes.
    Linear weights stored transposed ([in, out]) for x @ W."""
    ks = jax.random.split(key, 10)

    def linear(kw, kb, fan_in, fan_out):
        bound = 1.0 / jnp.sqrt(fan_in)
        w = jax.random.uniform(kw, (fan_in, fan_out), jnp.float32, -bound, bound)
        b = jax.random.uniform(kb, (1, fan_out), jnp.float32, -bound, bound)
        return w, b

    w1, b1 = linear(ks[0], ks[1], K_IN, H1)
    w2, b2 = linear(ks[2], ks[3], H1, H2)
    w3, b3 = linear(ks[4], ks[5], H2, OUT)

    def bn(kg, n):
        k1, k2, k3 = jax.random.split(kg, 3)
        gamma = 1.0 + 0.1 * jax.random.normal(k1, (1, n), jnp.float32)
        beta = 0.1 * jax.random.normal(k2, (1, n), jnp.float32)
        mean = 0.05 * jax.random.normal(k3, (1, n), jnp.float32)
        var = jnp.ones((1, n), jnp.float32) * 0.9
        return gamma, beta, mean, var

    g1, be1, m1, v1 = bn(ks[6], H1)
    g2, be2, m2, v2 = bn(ks[7], H2)

    return dict(
        w1=w1, b1=b1, g1=g1, be1=be1, m1=m1, v1=v1,
        w2=w2, b2=b2, g2=g2, be2=be2, m2=m2, v2=v2,
        w3=w3, b3=b3,
    )


def _reference_forward_f32(x, p):
    """Plain-JAX f32 reference of the original (unfolded) module, eval mode."""
    h = x @ p["w1"] + p["b1"]
    h = (h - p["m1"]) / jnp.sqrt(p["v1"] + EPS) * p["g1"] + p["be1"]
    h = jnp.where(h >= 0, h, NEG_SLOPE * h)
    h = h @ p["w2"] + p["b2"]
    h = (h - p["m2"]) / jnp.sqrt(p["v2"] + EPS) * p["g2"] + p["be2"]
    h = h * jax.nn.sigmoid(h)
    h = h @ p["w3"] + p["b3"]
    return h * jax.nn.sigmoid(h)


def _reference_forward_folded(x, fp):
    """Plain-JAX reference mirroring the kernel's folded/bf16 math exactly."""
    xp = jnp.pad(x, ((0, 0), (0, K_PAD - K_IN))).astype(jnp.bfloat16)
    h = jnp.dot(xp, fp["w1"], preferred_element_type=jnp.float32) + fp["b1"]
    h = jnp.where(h >= 0, h, NEG_SLOPE * h)
    h = jnp.dot(h.astype(jnp.bfloat16), fp["w2"],
                preferred_element_type=jnp.float32) + fp["b2"]
    h = h * jax.nn.sigmoid(h)
    h = jnp.dot(h.astype(jnp.bfloat16), fp["w3"],
                preferred_element_type=jnp.float32) + fp["b3"]
    h = h * jax.nn.sigmoid(h)
    return h[:, :OUT]


if __name__ == "__main__":
    key = jax.random.PRNGKey(0)
    kx, kp = jax.random.split(key)

    B = 400  # not a multiple of the tile -> exercises batch padding; grid = 2 tiles
    x = jax.random.uniform(kx, (B, K_IN), jnp.float32)  # mimics /255.0-scaled pixels
    params = init_params(kp)
    folded = fold_and_pack_params(params)

    out = classification_forward(x, folded, tb=256)
    out = jax.block_until_ready(out)
    assert out.shape == (B, OUT)

    # Exact-math check (same folded / bf16-operand computation).
    ref_exact = _reference_forward_folded(x, folded)
    assert jnp.allclose(out, ref_exact, atol=1e-3, rtol=1e-3), "mismatch vs folded ref"

    # Sanity check vs. the original f32 eval-mode module (bf16-relaxed tolerance).
    ref_f32 = _reference_forward_f32(x, params)
    assert jnp.allclose(out, ref_f32, atol=5e-2, rtol=5e-2), "mismatch vs f32 ref"

    print("KERNEL_OK")
</pallas_src>

<mosaic_0001>
module attributes {stable_mosaic.version = 11 : i64} {
  func.func @mlp_kernel(%arg0: i32, %arg1: memref<256x896xbf16, #tpu.memory_space<vmem>>, %arg2: memref<896x512xbf16, #tpu.memory_space<vmem>>, %arg3: memref<1x512xf32, #tpu.memory_space<vmem>>, %arg4: memref<512x256xbf16, #tpu.memory_space<vmem>>, %arg5: memref<1x256xf32, #tpu.memory_space<vmem>>, %arg6: memref<256x128xbf16, #tpu.memory_space<vmem>>, %arg7: memref<1x128xf32, #tpu.memory_space<vmem>>, %arg8: memref<256x128xf32, #tpu.memory_space<vmem>>) attributes {dimension_semantics = [#tpu.dimension_semantics<parallel>], iteration_bounds = array<i64: 2>, scalar_prefetch = 0 : i64, scratch_operands = 0 : i64, tpu.core_type = #tpu.core_type<tc>, window_params = [{transform_indices = @transform_0, window_bounds = array<i64: 256, 896>}, {pipeline_mode = #tpu.pipeline_mode<synchronous>, transform_indices = @transform_1, window_bounds = array<i64: 896, 512>}, {pipeline_mode = #tpu.pipeline_mode<synchronous>, transform_indices = @transform_2, window_bounds = array<i64: 1, 512>}, {pipeline_mode = #tpu.pipeline_mode<synchronous>, transform_indices = @transform_3, window_bounds = array<i64: 512, 256>}, {pipeline_mode = #tpu.pipeline_mode<synchronous>, transform_indices = @transform_4, window_bounds = array<i64: 1, 256>}, {pipeline_mode = #tpu.pipeline_mode<synchronous>, transform_indices = @transform_5, window_bounds = array<i64: 256, 128>}, {pipeline_mode = #tpu.pipeline_mode<synchronous>, transform_indices = @transform_6, window_bounds = array<i64: 1, 128>}, {transform_indices = @transform_7, window_bounds = array<i64: 256, 128>}]} {
    %c0 = arith.constant 0 : index
    %c0_0 = arith.constant 0 : index
    %0 = vector.load %arg1[%c0, %c0_0] : memref<256x896xbf16, #tpu.memory_space<vmem>>, vector<256x896xbf16>
    %c0_1 = arith.constant 0 : index
    %c0_2 = arith.constant 0 : index
    %1 = vector.load %arg2[%c0_1, %c0_2] : memref<896x512xbf16, #tpu.memory_space<vmem>>, vector<896x512xbf16>
    %cst = arith.constant dense<0.000000e+00> : vector<256x512xf32>
    %2 = tpu.matmul %0, %1, %cst {dimension_numbers = #tpu.dot_dimension_numbers<[1], [0], [0], [1], [0, 0, 1, 1], [], []>} : vector<256x896xbf16>, vector<896x512xbf16>, vector<256x512xf32> -> vector<256x512xf32>
    %c0_3 = arith.constant 0 : index
    %c0_4 = arith.constant 0 : index
    %3 = vector.load %arg3[%c0_3, %c0_4] : memref<1x512xf32, #tpu.memory_space<vmem>>, vector<1x512xf32>
    %4 = vector.broadcast %3 : vector<1x512xf32> to vector<256x512xf32>
    %5 = arith.addf %2, %4 : vector<256x512xf32>
    %cst_5 = arith.constant 0.000000e+00 : f32
    %6 = vector.broadcast %cst_5 : f32 to vector<256x512xf32>
    %7 = arith.cmpf oge, %5, %6 : vector<256x512xf32>
    %cst_6 = arith.constant 0.00999999977 : f32
    %8 = vector.broadcast %cst_6 : f32 to vector<256x512xf32>
    %9 = arith.mulf %8, %5 : vector<256x512xf32>
    %10 = arith.select %7, %5, %9 : vector<256x512xi1>, vector<256x512xf32>
    %11 = arith.truncf %10 : vector<256x512xf32> to vector<256x512xbf16>
    %c0_7 = arith.constant 0 : index
    %c0_8 = arith.constant 0 : index
    %12 = vector.load %arg4[%c0_7, %c0_8] : memref<512x256xbf16, #tpu.memory_space<vmem>>, vector<512x256xbf16>
    %cst_9 = arith.constant dense<0.000000e+00> : vector<256x256xf32>
    %13 = tpu.matmul %11, %12, %cst_9 {dimension_numbers = #tpu.dot_dimension_numbers<[1], [0], [0], [1], [0, 0, 1, 1], [], []>} : vector<256x512xbf16>, vector<512x256xbf16>, vector<256x256xf32> -> vector<256x256xf32>
    %c0_10 = arith.constant 0 : index
    %c0_11 = arith.constant 0 : index
    %14 = vector.load %arg5[%c0_10, %c0_11] : memref<1x256xf32, #tpu.memory_space<vmem>>, vector<1x256xf32>
    %15 = vector.broadcast %14 : vector<1x256xf32> to vector<256x256xf32>
    %16 = arith.addf %13, %15 : vector<256x256xf32>
    %17 = arith.negf %16 : vector<256x256xf32>
    %18 = math.exp %17 : vector<256x256xf32>
    %cst_12 = arith.constant 1.000000e+00 : f32
    %19 = vector.broadcast %cst_12 : f32 to vector<256x256xf32>
    %20 = arith.addf %19, %18 : vector<256x256xf32>
    %21 = arith.divf %19, %20 : vector<256x256xf32>
    %22 = arith.mulf %16, %21 : vector<256x256xf32>
    %23 = arith.truncf %22 : vector<256x256xf32> to vector<256x256xbf16>
    %c0_13 = arith.constant 0 : index
    %c0_14 = arith.constant 0 : index
    %24 = vector.load %arg6[%c0_13, %c0_14] : memref<256x128xbf16, #tpu.memory_space<vmem>>, vector<256x128xbf16>
    %cst_15 = arith.constant dense<0.000000e+00> : vector<256x128xf32>
    %25 = tpu.matmul %23, %24, %cst_15 {dimension_numbers = #tpu.dot_dimension_numbers<[1], [0], [0], [1], [0, 0, 1, 1], [], []>} : vector<256x256xbf16>, vector<256x128xbf16>, vector<256x128xf32> -> vector<256x128xf32>
    %c0_16 = arith.constant 0 : index
    %c0_17 = arith.constant 0 : index
    %26 = vector.load %arg7[%c0_16, %c0_17] : memref<1x128xf32, #tpu.memory_space<vmem>>, vector<1x128xf32>
    %27 = vector.broadcast %26 : vector<1x128xf32> to vector<256x128xf32>
    %28 = arith.addf %25, %27 : vector<256x128xf32>
    %29 = arith.negf %28 : vector<256x128xf32>
    %30 = math.exp %29 : vector<256x128xf32>
    %cst_18 = arith.constant 1.000000e+00 : f32
    %31 = vector.broadcast %cst_18 : f32 to vector<256x128xf32>
    %32 = arith.addf %31, %30 : vector<256x128xf32>
    %33 = arith.divf %31, %32 : vector<256x128xf32>
    %34 = arith.mulf %28, %33 : vector<256x128xf32>
    %c0_19 = arith.constant 0 : index
    %c0_20 = arith.constant 0 : index
    %35 = vector.load %arg8[%c0_19, %c0_20] : memref<256x128xf32, #tpu.memory_space<vmem>>, vector<256x128xf32>
    tpu.vector_store %arg8[%c0_19, %c0_20], %34 {strides = array<i32>} : memref<256x128xf32, #tpu.memory_space<vmem>>, vector<256x128xf32>,
    return
  }
  func.func @transform_0(%arg0: i32) -> (i32, i32) {
    %c0_i32 = arith.constant 0 : i32
    %c0_i32_0 = arith.constant 0 : i32
    return %arg0, %c0_i32 : i32, i32
  }
  func.func @transform_1(%arg0: i32) -> (i32, i32) {
    %c0_i32 = arith.constant 0 : i32
    %c0_i32_0 = arith.constant 0 : i32
    %c0_i32_1 = arith.constant 0 : i32
    return %c0_i32, %c0_i32_0 : i32, i32
  }
  func.func @transform_2(%arg0: i32) -> (i32, i32) {
    %c0_i32 = arith.constant 0 : i32
    %c0_i32_0 = arith.constant 0 : i32
    %c0_i32_1 = arith.constant 0 : i32
    return %c0_i32, %c0_i32_0 : i32, i32
  }
  func.func @transform_3(%arg0: i32) -> (i32, i32) {
    %c0_i32 = arith.constant 0 : i32
    %c0_i32_0 = arith.constant 0 : i32
    %c0_i32_1 = arith.constant 0 : i32
    return %c0_i32, %c0_i32_0 : i32, i32
  }
  func.func @transform_4(%arg0: i32) -> (i32, i32) {
    %c0_i32 = arith.constant 0 : i32
    %c0_i32_0 = arith.constant 0 : i32
    %c0_i32_1 = arith.constant 0 : i32
    return %c0_i32, %c0_i32_0 : i32, i32
  }
  func.func @transform_5(%arg0: i32) -> (i32, i32) {
    %c0_i32 = arith.constant 0 : i32
    %c0_i32_0 = arith.constant 0 : i32
    %c0_i32_1 = arith.constant 0 : i32
    return %c0_i32, %c0_i32_0 : i32, i32
  }
  func.func @transform_6(%arg0: i32) -> (i32, i32) {
    %c0_i32 = arith.constant 0 : i32
    %c0_i32_0 = arith.constant 0 : i32
    %c0_i32_1 = arith.constant 0 : i32
    return %c0_i32, %c0_i32_0 : i32, i32
  }
  func.func @transform_7(%arg0: i32) -> (i32, i32) {
    %c0_i32 = arith.constant 0 : i32
    %c0_i32_0 = arith.constant 0 : i32
    return %arg0, %c0_i32 : i32, i32
  }
}

</mosaic_0001>

<bundles_post_ra>
// kernel: tpu_custom_call.1
= control target key start
LH: loop header
LB: loop body
LE: loop exit
PB: predicated region body
PF: predicated region fallthrough
CT: control target
= control target key end

     0   :  { %s10556_s0 = inlined_call_operand.hbm [shape: bf16[512,896], index: 0, kind: input, shape index: {}]   ;;  %s10557_s1 = inlined_call_operand.hbm [shape: bf16[896,512], index: 1, kind: input, shape index: {}]   ;;  %s10558_s2 = inlined_call_operand.vmem [shape: f32[1,512], index: 2, kind: input, shape index: {}]   ;;  %s10559_s3 = inlined_call_operand.hbm [shape: bf16[512,256], index: 3, kind: input, shape index: {}]   ;;  %s10560_s4 = inlined_call_operand.vmem [shape: f32[1,256], index: 4, kind: input, shape index: {}]   ;;  %s10561_s5 = inlined_call_operand.hbm [shape: bf16[256,128], index: 5, kind: input, shape index: {}]   ;;  %s10562_s6 = inlined_call_operand.vmem [shape: f32[1,128], index: 6, kind: input, shape index: {}]   ;;  %s10563_s7 = inlined_call_operand.hbm [shape: f32[512,128], index: 7, kind: output, shape index: {}]  }
   0x1   :  { %10569 = sst [smem:[#allocation26_spill]] %s10557_s1 }
   0x2   :  { %12 = vsyncpa [#allocation3], 0 }
   0x3   :  { %14 = vsyncpa [#allocation3 + $0x1], 0 }
   0x4   :  { %15 = vsyncpa [#allocation6], 0 }
   0x5   :  { %16 = vsyncpa [#allocation9], 0 }
   0x6   :  { %17 = vsyncpa [#allocation4], 0 }
   0x7   :  { %19 = vsyncpa [#allocation4 + $0x1], 0  ;;  %s8999_s24 = smov 0   ;;  %s9001_s25 = smov 0  }
   0x8   :  { %s9003_s26 = smov 0   ;;  %s9005_s27 = smov 0  }
   0x9 LB: > { %s9020_s28 = sadd.s32 4294967295, %s8941_s27   ;;  %s6337_s29 = sadd.s32 4294967294, %s8941_s27   ;;  %s8941_s27 = sphi %s9005_s27, %s10613_s27   ;;  %s8937_s26 = sphi %s9003_s26, %s10612_s26   ;;  %s8933_s25 = sphi %s9001_s25, %s10611_s25   ;;  %s8929_s24 = sphi %s8999_s24, %s10610_s24  }
   0xa   : > { %p45_p0 = scmp.ne.s32.totalorder %s8933_s25, %s8929_s24  ;;  %p10564_p1 = scmp.eq.s32.totalorder %s9020_s28, 0 }
   0xb   : > { %p201_p3 = scmp.eq.s32.totalorder %s6337_s29, 1  ;;  %p6338_p5 = scmp.ge.s32.totalorder %s8941_s27, 1 }
   0xc   : > { %p9029_p4 = por %p10564_p1, %p45_p0  ;;  %p208_p7 = scmp.lt.s32.totalorder %s8941_s27, 3 }
   0xd   : > { %p9034_p6 = por %p201_p3, %p45_p0  ;;  %s8943_s10 = smov [#allocation5]  }
   0xe   : > { %s10570_s30 = scalar_select %p9029_p4, 1, 0 }
   0xf   : > { %s10571_s8 = scalar_select %p9034_p6, 1, 0 }
  0x10   : > { %p9039_p8 = pnand %p6338_p5, %p208_p7  ;;  %s220_s11 = sshll.u32 %s8943_s10, 4  ;;  %s9043_s11 = int_to_ptr.vmem [resolvable:$true] %s220_s11 }
  0x11   : > { %s8944_s13 = smov [#allocation7]   ;;  %s10574_s1 = sld [smem:[#allocation26_spill]] }
  0x12   : > { %s10572_s9 = scalar_select %p9039_p8, 1, 0 }
  0x13   : > { %p7673_p9 = pneg %p9039_p8  ;;  %s236_s14 = sshll.u32 %s8944_s13, 4  ;;  %s9054_s14 = int_to_ptr.vmem [resolvable:$true] %s236_s14 }
  0x15   : > { %p9050_p11 = pnand %p7673_p9, %p10564_p1 }
  0x17   : > { %s8753_s17 = scalar_lea.hbm %s10574_s1, 28672  ;;  %p9064_p13 = pneg %p9050_p11 }
  0x18   : > { %p8754_p12 = scmp.ne.s32.totalorder %s10574_s1, %s8753_s17  ;;  %p8760_p5 = scmp.lt.u32.totalorder %s8753_s17, %s10574_s1 }
  0x1a   : > { %p8756_p0 = pnand %p9064_p13, %p8754_p12 }
  0x1c   : > { %p8757_p3 = pneg %p8756_p0 }
  0x1e   : > { %p8762_p7 = pnand %p8760_p5, %p8757_p3 }
  0x20   : > { %8765 = shalt.err (!%p8762_p7)
}
  0x21   : > { %s8766_s23 = scalar_lea.vmem %s9043_s11, 28672  ;;  %p8774_p2 = scmp.lt.s32.totalorder %s9043_s11, %s9043_s11 }
  0x22   : > { %p8767_p9 = scmp.ne.s32.totalorder %s9043_s11, %s8766_s23  ;;  %p8775_p6 = scmp.lt.s32.totalorder %s8766_s23, %s8766_s23 }
  0x24   : > { %p8769_p10 = pnand %p8767_p9, %p9064_p13  ;;  %p8776_p12 = por %p8775_p6, %p8774_p2 }
  0x26   : > { %p8770_p1 = pneg %p8769_p10 }
  0x28   : > { %p8777_p0 = pnand %p8776_p12, %p8770_p1 }
  0x2a   : > { %8780 = shalt.err (!%p8777_p0)
}
  0x2b   : > { %s8945_s29 = smov 256   ;;  %s8946_s10 = smov 16  }
  0x2c   : > { %7676 = dma.hbm_to_vmem [thread:$0]  (!%p9050_p11), %s10574_s1, 28672, %s9043_s11, [#allocation6], %s8945_s29, %s8945_s29, %s8946_s10  }
  0x2d   : > { %s8781_s18 = scalar_lea.hbm %s10559_s3, 8192 }
  0x2e   : > { %p8782_p2 = scmp.ne.s32.totalorder %s10559_s3, %s8781_s18  ;;  %p8788_p10 = scmp.lt.u32.totalorder %s8781_s18, %s10559_s3 }
  0x30   : > { %p8784_p1 = pnand %p8782_p2, %p9064_p13 }
  0x32   : > { %p8785_p6 = pneg %p8784_p1 }
  0x34   : > { %p8790_p3 = pnand %p8788_p10, %p8785_p6 }
  0x36   : > { %8793 = shalt.err (!%p8790_p3)
}
  0x37   : > { %s8794_s11 = scalar_lea.vmem %s9054_s14, 8192  ;;  %p8802_p12 = scmp.lt.s32.totalorder %s9054_s14, %s9054_s14 }
  0x38   : > { %p8795_p5 = scmp.ne.s32.totalorder %s9054_s14, %s8794_s11  ;;  %p8803_p0 = scmp.lt.s32.totalorder %s8794_s11, %s8794_s11 }
  0x3a   : > { %p8797_p7 = pnand %p8795_p5, %p9064_p13  ;;  %p8804_p2 = por %p8803_p0, %p8802_p12 }
  0x3c   : > { %p8798_p9 = pneg %p8797_p7 }
  0x3e   : > { %p8805_p1 = pnand %p8804_p2, %p8798_p9 }
  0x40   : > { %8808 = shalt.err (!%p8805_p1)
}
  0x41   : > { %s8947_s29 = smov 128   ;;  %s8948_s10 = smov 8  }
  0x42   : > { %7679 = dma.hbm_to_vmem [thread:$0]  (!%p9050_p11), %s10559_s3, 8192, %s9054_s14, [#allocation6], %s8947_s29, %s8947_s29, %s8948_s10  }
  0x43   : > { %s8949_s16 = smov [#allocation8]   ;;  %s8809_s21 = scalar_lea.hbm %s10561_s5, 2048 }
  0x44   : > { %s252_s17 = sshll.u32 %s8949_s16, 4  ;;  %p8810_p6 = scmp.ne.s32.totalorder %s10561_s5, %s8809_s21  ;;  %s253_s17 = int_to_ptr.vmem [resolvable:$true] %s252_s17 }
  0x45   : > { %p8816_p5 = scmp.lt.u32.totalorder %s8809_s21, %s10561_s5 }
  0x46   : > { %p8812_p10 = pnand %p8810_p6, %p9064_p13 }
  0x48   : > { %p8813_p3 = pneg %p8812_p10 }
  0x4a   : > { %p8818_p7 = pnand %p8816_p5, %p8813_p3 }
  0x4c   : > { %8821 = shalt.err (!%p8818_p7)
}
  0x4d   : > { %s8822_s14 = scalar_lea.vmem %s253_s17, 2048  ;;  %p8830_p2 = scmp.lt.s32.totalorder %s253_s17, %s253_s17 }
  0x4e   : > { %p8823_p9 = scmp.ne.s32.totalorder %s253_s17, %s8822_s14  ;;  %p8831_p1 = scmp.lt.s32.totalorder %s8822_s14, %s8822_s14 }
  0x50   : > { %p8825_p12 = pnand %p8823_p9, %p9064_p13  ;;  %p8832_p4 = por %p8831_p1, %p8830_p2 }
  0x52   : > { %p8826_p0 = pneg %p8825_p12 }
  0x54   : > { %p8833_p8 = pnand %p8832_p4, %p8826_p0 }
  0x56   : > { %8836 = shalt.err (!%p8833_p8)
}
  0x57   : > { %s8950_s29 = smov 64   ;;  %s8951_s1 = smov 4  }
  0x58   : > { %7682 = dma.hbm_to_vmem [thread:$0]  (!%p9050_p11), %s10561_s5, 2048, %s253_s17, [#allocation9], %s8950_s29, %s8950_s29, %s8951_s1  }
  0x59   : > { %s9127_s13 = sadd.s32 1, %s8941_s27   ;;  %s32_s16 = sadd.s32 1, %s8937_s26 }
  0x5a   : > { %s29_s15 = ssub.s32 %s8941_s27, %s9127_s13  ;;  %p39_p8 = scmp.ne.s32.totalorder %s8937_s26, %s8933_s25 }
  0x5b   : > { %p30_p4 = scmp.eq.s32.totalorder %s29_s15, 0  ;;  %p40_p13 = scmp.eq.s32.totalorder %s8941_s27, 0 }
  0x5c   : > { %p7694_p6 = scmp.lt.s32.totalorder %s8941_s27, 2  ;;  %p10576_p3 = scmp.eq.s32.totalorder %s9020_s28, 1 }
  0x5d   : > { %s9137_s18 = scalar_select %p30_p4, %s8937_s26, %s32_s16  }
  0x5e   : > { %p41_p10 = por %p40_p13, %p39_p8  ;;  %p9141_p5 = por %p10576_p3, %p39_p8 }
  0x5f   : > { %s269_s12 = sand.u32 1, %s8937_s26   ;;  %s7655_s21 = smul.u32 14336, %s8941_s27 }
  0x60   : > { %s7654_s17 = smul.u32 896, %s269_s12  ;;  %p9152_p11 = pnand %p7694_p6, %p41_p10 }
  0x61   : > { %s9150_s11 = scalar_lea.hbm %s10556_s0, %s7655_s21  ;;  %s9158_s20 = scalar_lea.sflag [#allocation3], %s269_s12 }
  0x62   : > { %s273_s29 = scalar_lea.vmem [#allocation2], %s7654_s17  ;;  %s8837_s10 = scalar_lea.hbm %s9150_s11, 14336 }
  0x63   : > { %s281_s1 = sshll.u32 %s273_s29, 4  ;;  %p8838_p7 = scmp.ne.s32.totalorder %s9150_s11, %s8837_s10  ;;  %s9156_s1 = int_to_ptr.vmem [resolvable:$true] %s281_s1 }
  0x64   : > { %p8839_p9 = pneg %p9152_p11  ;;  %s8842_s21 = scalar_lea.hbm %s10556_s0, 28672 }
  0x65   : > { %p8843_p2 = scmp.lt.u32.totalorder %s9150_s11, %s10556_s0  ;;  %p8844_p1 = scmp.lt.u32.totalorder %s8842_s21, %s8837_s10 }
  0x66   : > { %p8840_p12 = pnand %p8839_p9, %p8838_p7  ;;  %p8846_p8 = scmp.lt.u32.totalorder %s8837_s10, %s9150_s11 }
  0x67   : > { %p8845_p4 = por %p8844_p1, %p8843_p2 }
  0x68   : > { %p8841_p0 = pneg %p8840_p12 }
  0x69   : > { %p8847_p13 = por %p8846_p8, %p8845_p4 }
  0x6b   : > { %p8848_p6 = pnand %p8847_p13, %p8841_p0 }
  0x6d   : > { %8851 = shalt.err (!%p8848_p6)
}
  0x6e   : > { %s8852_s12 = scalar_lea.vmem %s9156_s1, 14336  ;;  %s8952_s17 = smov [#allocation2]  }
  0x6f   : > { %p8853_p10 = scmp.ne.s32.totalorder %s9156_s1, %s8852_s12  ;;  %s8857_s29 = sshll.u32 %s8952_s17, 4  ;;  %s8858_s29 = int_to_ptr.vmem [resolvable:$false] %s8857_s29 }
  0x70   : > { %s8859_s15 = scalar_lea.vmem %s8858_s29, 28672  ;;  %p8860_p12 = scmp.lt.s32.totalorder %s9156_s1, %s8858_s29 }
  0x71   : > { %p8855_p3 = pnand %p8853_p10, %p8839_p9  ;;  %p8861_p2 = scmp.lt.s32.totalorder %s8859_s15, %s8852_s12 }
  0x73   : > { %p8856_p7 = pneg %p8855_p3  ;;  %p8862_p1 = por %p8861_p2, %p8860_p12 }
  0x75   : > { %p8863_p4 = pnand %p8862_p1, %p8856_p7 }
  0x77   : > { %8866 = shalt.err (!%p8863_p4)
}
  0x78   : > { %s8953_s10 = smov 448   ;;  %s8954_s16 = smov 28  }
  0x79   : > { %7686 = dma.hbm_to_vmem [thread:$0]  (!%p9152_p11), %s9150_s11, 14336, %s9156_s1, %s9158_s20, %s8953_s10, %s8953_s10, %s8954_s16  }
  0x7a   : > { %p10579_p9 = scmp.ne.s32.totalorder %s10572_s9, 0 }
  0x7c   : > { %293 = sbr.rel (%p10579_p9) target bundleno = 1515 (0x5eb), region = 48 }
  0x83   : > { %s9189_s21 = sand.u32 1, %s8933_s25   ;;  %p10580_p0 = scmp.ne.s32.totalorder %s10570_s30, 0 }
  0x84   : > { %s7656_s22 = smul.u32 896, %s9189_s21  ;;  %s296_s23 = scalar_lea.sflag [#allocation3], %s9189_s21 }
  0x86   : > { %s9193_s12 = scalar_lea.vmem [#allocation2], %s7656_s22 }
  0x87   : > { %8912 = dma.done.wait (%p10580_p0), %s296_s23, 14336  }
  0x88   : > { %8914 = vsyncadd (%p10580_p0), %s296_s23, 4294952960  ;;  %p10581_p11 = scmp.eq.s32.totalorder %s9020_s28, 0 }
  0x8a   : > { %8916 = dma.done.wait (%p10581_p11), [#allocation6], 36864   ;;  %p10582_p8 = pmov %p10581_p11 }
  0x8c   : > { %8918 = vsyncadd (%p10582_p8), [#allocation6], 4294930432  ;;  %p10583_p13 = pmov %p10582_p8 }
  0x8d   : > { %p10584_p6 = pmov %p10582_p8 }
  0x8e   : > { %8920 = dma.done.wait (%p10583_p13), [#allocation9], 2048  }
  0x8f   : > { %8922 = vsyncadd (%p10584_p6), [#allocation9], 4294965248  ;;  %v7745_v0 = vld [vmem:[#allocation5 + $0x4] ss:$16 sps:$4 sm:$0xff]   ;;  %v7747_v1 = vld [vmem:[#allocation5] ss:$16 sps:$4 sm:$0xff]  }
  0x90   : > { %2415 = vmatprep.subr.bf16.mxu0 %v7745_v0  ;;  %6982 = vmatprep.subr.bf16.mxu1 %v7745_v0  ;;  %v7748_v2 = vld [vmem:[#allocation5 + $0x24] ss:$16 sps:$4 sm:$0xff]   ;;  %v7750_v3 = vld [vmem:[#allocation5 + $0x20] ss:$16 sps:$4 sm:$0xff]   ;;  %v7804_v36 = vld [vmem:[#allocation5 + $0xc] ss:$16 sps:$4 sm:$0xff]  }
  0x91   : > { %2416 = vmatpush1.bf16.msra.mxu0 %v7747_v1  ;;  %6998 = vmatpush1.bf16.msra.mxu1 %v7747_v1  ;;  %v7751_v4 = vld [vmem:[#allocation5 + $0x44] ss:$16 sps:$4 sm:$0xff]   ;;  %v7753_v5 = vld [vmem:[#allocation5 + $0x40] ss:$16 sps:$4 sm:$0xff]   ;;  %v7802_v39 = vld [vmem:[#allocation5 + $0x8] ss:$16 sps:$4 sm:$0xff]  }
  0x92   : > { %2417 = vmatprep.subr.bf16.mxu0 %v7748_v2  ;;  %6983 = vmatprep.subr.bf16.mxu1 %v7748_v2  ;;  %v7754_v6 = vld [vmem:[#allocation5 + $0x64] ss:$16 sps:$4 sm:$0xff]   ;;  %v7756_v7 = vld [vmem:[#allocation5 + $0x60] ss:$16 sps:$4 sm:$0xff]   ;;  %v7810_v41 = vld [vmem:[#allocation5 + $0x2c] ss:$16 sps:$4 sm:$0xff]  }
  0x93   : > { %v7757_v8 = vld [vmem:[#allocation5 + $0x84] ss:$16 sps:$4 sm:$0xff]   ;;  %v7759_v9 = vld [vmem:[#allocation5 + $0x80] ss:$16 sps:$4 sm:$0xff]   ;;  %v9217_v42 = vld [vmem:[%s9193_s12 + $0x3c] ss:$28 sps:$4 sm:$0xff]  }
  0x94   : > { %v7760_v10 = vld [vmem:[#allocation5 + $0xa4] ss:$16 sps:$4 sm:$0xff]   ;;  %v7762_v11 = vld [vmem:[#allocation5 + $0xa0] ss:$16 sps:$4 sm:$0xff]   ;;  %v7813_v43 = vld [vmem:[%s9193_s12 + $0x1fc] ss:$28 sps:$4 sm:$0xff]  }
  0x95   : > { %2418 = vmatpush1.bf16.msra.mxu0 %v7750_v3  ;;  %6999 = vmatpush1.bf16.msra.mxu1 %v7750_v3  ;;  %v7763_v12 = vld [vmem:[#allocation5 + $0xc4] ss:$16 sps:$4 sm:$0xff]   ;;  %v7765_v14 = vld [vmem:[#allocation5 + $0xc0] ss:$16 sps:$4 sm:$0xff]   ;;  %v7808_v45 = vld [vmem:[#allocation5 + $0x28] ss:$16 sps:$4 sm:$0xff]  }
  0x96   : > { %2419 = vmatprep.subr.bf16.mxu0 %v7751_v4  ;;  %6984 = vmatprep.subr.bf16.mxu1 %v7751_v4  ;;  %v9208_v13 = vld [vmem:[%s9193_s12 + $0x4] ss:$28 sps:$4 sm:$0xff]   ;;  %v9222_v47 = vld [vmem:[%s9193_s12 + $0x38] ss:$28 sps:$4 sm:$0xff]   ;;  %v7822_v48 = vld [vmem:[#allocation5 + $0x4c] ss:$16 sps:$4 sm:$0xff]  }
  0x97   : > { %v7798_v15 = vld [vmem:[%s9193_s12 + $0x1c4] ss:$28 sps:$4 sm:$0xff]   ;;  %2447 = vmatprep.mubr.bf16.mxu0 %v9208_v13  ;;  %v7816_v49 = vld [vmem:[%s9193_s12 + $0x1f8] ss:$28 sps:$4 sm:$0xff]   ;;  %v7828_v53 = vld [vmem:[#allocation5 + $0x6c] ss:$16 sps:$4 sm:$0xff]  }
  0x98   : > { %v7766_v16 = vld [vmem:[#allocation5 + $0xe4] ss:$16 sps:$4 sm:$0xff]   ;;  %2527 = vmatprep.mubr.bf16.mxu1 %v7798_v15  ;;  %v7768_v17 = vld [vmem:[#allocation5 + $0xe0] ss:$16 sps:$4 sm:$0xff]   ;;  %v7820_v51 = vld [vmem:[#allocation5 + $0x48] ss:$16 sps:$4 sm:$0xff]  }
  0x99   : > { %2420 = vmatpush1.bf16.msra.mxu0 %v7753_v5  ;;  %7000 = vmatpush1.bf16.msra.mxu1 %v7753_v5  ;;  %v7769_v18 = vld [vmem:[#allocation5 + $0x104] ss:$16 sps:$4 sm:$0xff]   ;;  %v7771_v19 = vld [vmem:[#allocation5 + $0x100] ss:$16 sps:$4 sm:$0xff]   ;;  %v7826_v57 = vld [vmem:[#allocation5 + $0x68] ss:$16 sps:$4 sm:$0xff]  }
  0x9a   : > { %2421 = vmatprep.subr.bf16.mxu0 %v7754_v6  ;;  %6985 = vmatprep.subr.bf16.mxu1 %v7754_v6  ;;  %v7772_v20 = vld [vmem:[#allocation5 + $0x124] ss:$16 sps:$4 sm:$0xff]   ;;  %v7774_v21 = vld [vmem:[#allocation5 + $0x120] ss:$16 sps:$4 sm:$0xff]   ;;  %v7840_v60 = vld [vmem:[#allocation5 + $0x8c] ss:$16 sps:$4 sm:$0xff]  }
  0x9b   : > { %v7775_v22 = vld [vmem:[#allocation5 + $0x144] ss:$16 sps:$4 sm:$0xff]   ;;  %v7777_v23 = vld [vmem:[#allocation5 + $0x140] ss:$16 sps:$4 sm:$0xff]   ;;  %v7838_v63 = vld [vmem:[#allocation5 + $0x88] ss:$16 sps:$4 sm:$0xff]  }
  0x9c   : > { %v7778_v24 = vld [vmem:[#allocation5 + $0x164] ss:$16 sps:$4 sm:$0xff]   ;;  %v7780_v25 = vld [vmem:[#allocation5 + $0x160] ss:$16 sps:$4 sm:$0xff]   ;;  %v7846_v1 = vld [vmem:[#allocation5 + $0xac] ss:$16 sps:$4 sm:$0xff]  }
  0x9d   : > { %2422 = vmatpush1.bf16.msra.mxu0 %v7756_v7  ;;  %7001 = vmatpush1.bf16.msra.mxu1 %v7756_v7  ;;  %v7781_v26 = vld [vmem:[#allocation5 + $0x184] ss:$16 sps:$4 sm:$0xff]   ;;  %v7783_v27 = vld [vmem:[#allocation5 + $0x180] ss:$16 sps:$4 sm:$0xff]   ;;  %v9237_v2 = vld [vmem:[%s9193_s12 + $0xac] ss:$28 sps:$4 sm:$0xff]  }
  0x9e   : > { %2423 = vmatprep.subr.bf16.mxu0 %v7757_v8  ;;  %6986 = vmatprep.subr.bf16.mxu1 %v7757_v8  ;;  %v7784_v28 = vld [vmem:[#allocation5 + $0x1a4] ss:$16 sps:$4 sm:$0xff]   ;;  %v7786_v29 = vld [vmem:[#allocation5 + $0x1a0] ss:$16 sps:$4 sm:$0xff]   ;;  %v7849_v3 = vld [vmem:[%s9193_s12 + $0x26c] ss:$28 sps:$4 sm:$0xff]  }
  0x9f   : > { %v7787_v30 = vld [vmem:[#allocation5 + $0x1c4] ss:$16 sps:$4 sm:$0xff]   ;;  %v7789_v31 = vld [vmem:[#allocation5 + $0x1c0] ss:$16 sps:$4 sm:$0xff]   ;;  %v7844_v5 = vld [vmem:[#allocation5 + $0xa8] ss:$16 sps:$4 sm:$0xff]  }
  0xa0   : > { %v7790_v32 = vld [vmem:[#allocation5 + $0x1e4] ss:$16 sps:$4 sm:$0xff]   ;;  %v7792_v33 = vld [vmem:[#allocation5 + $0x1e0] ss:$16 sps:$4 sm:$0xff]   ;;  %v7858_v8 = vld [vmem:[#allocation5 + $0xcc] ss:$16 sps:$4 sm:$0xff]  }
  0xa1   : > { %2424 = vmatpush1.bf16.msra.mxu0 %v7759_v9  ;;  %7002 = vmatpush1.bf16.msra.mxu1 %v7759_v9  ;;  %v7801_v34 = vld [vmem:[#allocation5 + $0x204] ss:$16 sps:$4 sm:$0xff]   ;;  %v9213_v35 = vld [vmem:[%s9193_s12] ss:$28 sps:$4 sm:$0xff]   ;;  %v9232_v59 = vld [vmem:[%s9193_s12 + $0x70] ss:$28 sps:$4 sm:$0xff]  }
  0xa2   : > { %2425 = vmatprep.subr.bf16.mxu0 %v7760_v10  ;;  %6987 = vmatprep.subr.bf16.mxu1 %v7760_v10  ;;  %v7796_v37 = vld [vmem:[%s9193_s12 + $0x1c0] ss:$28 sps:$4 sm:$0xff]   ;;  %v7807_v40 = vld [vmem:[#allocation5 + $0x224] ss:$16 sps:$4 sm:$0xff]   ;;  %v7834_v61 = vld [vmem:[%s9193_s12 + $0x230] ss:$28 sps:$4 sm:$0xff]  }
  0xa3   : > { %v7799_v38 = vld [vmem:[#allocation5 + $0x200] ss:$16 sps:$4 sm:$0xff]   ;;  %v7819_v46 = vld [vmem:[#allocation5 + $0x244] ss:$16 sps:$4 sm:$0xff]   ;;  %s6350_s17 = sshll.u32 %s9189_s21, 8  ;;  %s6869_s15 = sshll.u32 %s9020_s28, 12 }
  0xa4   : > { %v7805_v44 = vld [vmem:[#allocation5 + $0x220] ss:$16 sps:$4 sm:$0xff]   ;;  %v7825_v52 = vld [vmem:[#allocation5 + $0x264] ss:$16 sps:$4 sm:$0xff]   ;;  %s10360_s29 = scalar_lea.vmem [#allocation10], %s6350_s17  ;;  %s10508_s23 = scalar_lea.hbm %s10563_s7, %s6869_s15 }
  0xa5   : > { %2426 = vmatpush1.bf16.msra.mxu0 %v7762_v11  ;;  %7003 = vmatpush1.bf16.msra.mxu1 %v7762_v11  ;;  %v7817_v50 = vld [vmem:[#allocation5 + $0x240] ss:$16 sps:$4 sm:$0xff]   ;;  %v7837_v58 = vld [vmem:[#allocation5 + $0x284] ss:$16 sps:$4 sm:$0xff]   ;;  %v7856_v11 = vld [vmem:[#allocation5 + $0xc8] ss:$16 sps:$4 sm:$0xff]  }
  0xa6   : > { %2427 = vmatprep.subr.bf16.mxu0 %v7763_v12  ;;  %6988 = vmatprep.subr.bf16.mxu1 %v7763_v12  ;;  %v9227_v54 = vld [vmem:[%s9193_s12 + $0x74] ss:$28 sps:$4 sm:$0xff]   ;;  %v9242_v7 = vld [vmem:[%s9193_s12 + $0xa8] ss:$28 sps:$4 sm:$0xff]   ;;  %s6235_s10 = sshll.u32 %s10360_s29, 4  ;;  %s8956_s28 = smov [#allocation10]   ;;  %s10510_s10 = int_to_ptr.vmem [resolvable:$true] %s6235_s10 }
  0xa7   : > { %v7831_v55 = vld [vmem:[%s9193_s12 + $0x234] ss:$28 sps:$4 sm:$0xff]   ;;  %v7852_v9 = vld [vmem:[%s9193_s12 + $0x268] ss:$28 sps:$4 sm:$0xff]   ;;  %s8867_s30 = scalar_lea.vmem %s10510_s10, 4096  ;;  %s8871_s9 = sshll.u32 %s8956_s28, 4  ;;  %s8872_s9 = int_to_ptr.vmem [resolvable:$false] %s8871_s9 }
  0xa8   : > { %v7823_v56 = vld [vmem:[#allocation5 + $0x260] ss:$16 sps:$4 sm:$0xff]   ;;  %v7843_v0 = vld [vmem:[#allocation5 + $0x2a4] ss:$16 sps:$4 sm:$0xff]   ;;  %p8868_p10 = scmp.ne.s32.totalorder %s10510_s10, %s8867_s30  ;;  %s8873_s11 = scalar_lea.vmem %s8872_s9, 8192 }
  0xa9   : > { %2428 = vmatpush1.bf16.msra.mxu0 %v7765_v14  ;;  %7004 = vmatpush1.bf16.msra.mxu1 %v7765_v14  ;;  %v7835_v62 = vld [vmem:[#allocation5 + $0x280] ss:$16 sps:$4 sm:$0xff]   ;;  %v7855_v6 = vld [vmem:[#allocation5 + $0x2c4] ss:$16 sps:$4 sm:$0xff]   ;;  %v7864_v14 = vld [vmem:[#allocation5 + $0xec] ss:$16 sps:$4 sm:$0xff]   ;;  %p8874_p12 = scmp.lt.s32.totalorder %s10510_s10, %s8872_s9  ;;  %p8875_p2 = scmp.lt.s32.totalorder %s8873_s11, %s8867_s30 }
  0xaa   : > { %2429 = vmatprep.subr.bf16.mxu0 %v7766_v16  ;;  %6989 = vmatprep.subr.bf16.mxu1 %v7766_v16  ;;  %v7841_v4 = vld [vmem:[#allocation5 + $0x2a0] ss:$16 sps:$4 sm:$0xff]   ;;  %v7861_v12 = vld [vmem:[#allocation5 + $0x2e4] ss:$16 sps:$4 sm:$0xff]   ;;  %p8869_p3 = pnand %p8868_p10, %p9141_p5 }
  0xab   : > { %v7853_v10 = vld [vmem:[#allocation5 + $0x2c0] ss:$16 sps:$4 sm:$0xff]   ;;  %p8876_p1 = por %p8875_p2, %p8874_p12 }
  0xac   : > { %v9247_v15 = vld [vmem:[%s9193_s12 + $0xe4] ss:$28 sps:$4 sm:$0xff]   ;;  %p8870_p7 = pneg %p8869_p3 }
  0xad   : > { %2430 = vmatpush1.bf16.msra.mxu0 %v7768_v17  ;;  %7005 = vmatpush1.bf16.msra.mxu1 %v7768_v17  ;;  %v7867_v16 = vld [vmem:[%s9193_s12 + $0x2a4] ss:$28 sps:$4 sm:$0xff]  }
  0xae   : > { %2431 = vmatprep.subr.bf16.mxu0 %v7769_v18  ;;  %6990 = vmatprep.subr.bf16.mxu1 %v7769_v18  ;;  %v7859_v17 = vld [vmem:[#allocation5 + $0x2e0] ss:$16 sps:$4 sm:$0xff]   ;;  %v7862_v18 = vld [vmem:[#allocation5 + $0xe8] ss:$16 sps:$4 sm:$0xff]   ;;  %p8877_p4 = pnand %p8876_p1, %p8870_p7 }
  0xb1   : > { %2432 = vmatpush1.bf16.msra.mxu0 %v7771_v19  ;;  %7006 = vmatpush1.bf16.msra.mxu1 %v7771_v19  ;;  %v7873_v19 = vld [vmem:[#allocation5 + $0x304] ss:$16 sps:$4 sm:$0xff]  }
  0xb2   : > { %2433 = vmatprep.subr.bf16.mxu0 %v7772_v20  ;;  %6991 = vmatprep.subr.bf16.mxu1 %v7772_v20  ;;  %v9252_v20 = vld [vmem:[%s9193_s12 + $0xe0] ss:$28 sps:$4 sm:$0xff]  }
  0xb5   : > { %2434 = vmatpush1.bf16.msra.mxu0 %v7774_v21  ;;  %7007 = vmatpush1.bf16.msra.mxu1 %v7774_v21  ;;  %v7876_v21 = vld [vmem:[#allocation5 + $0x10c] ss:$16 sps:$4 sm:$0xff]  }
  0xb6   : > { %2435 = vmatprep.subr.bf16.mxu0 %v7775_v22  ;;  %6992 = vmatprep.subr.bf16.mxu1 %v7775_v22  ;;  %v7870_v22 = vld [vmem:[%s9193_s12 + $0x2a0] ss:$28 sps:$4 sm:$0xff]  }
  0xb9   : > { %2436 = vmatpush1.bf16.msra.mxu0 %v7777_v23  ;;  %7008 = vmatpush1.bf16.msra.mxu1 %v7777_v23  ;;  %v7871_v23 = vld [vmem:[#allocation5 + $0x300] ss:$16 sps:$4 sm:$0xff]  }
  0xba   : > { %2437 = vmatprep.subr.bf16.mxu0 %v7778_v24  ;;  %6993 = vmatprep.subr.bf16.mxu1 %v7778_v24  ;;  %v7874_v24 = vld [vmem:[#allocation5 + $0x108] ss:$16 sps:$4 sm:$0xff]  }
  0xbd   : > { %2438 = vmatpush1.bf16.msra.mxu0 %v7780_v25  ;;  %7009 = vmatpush1.bf16.msra.mxu1 %v7780_v25  ;;  %v7879_v25 = vld [vmem:[#allocation5 + $0x324] ss:$16 sps:$4 sm:$0xff]  }
  0xbe   : > { %2439 = vmatprep.subr.bf16.mxu0 %v7781_v26  ;;  %6994 = vmatprep.subr.bf16.mxu1 %v7781_v26  ;;  %v7882_v26 = vld [vmem:[#allocation5 + $0x12c] ss:$16 sps:$4 sm:$0xff]  }
  0xc1   : > { %2440 = vmatpush1.bf16.msra.mxu0 %v7783_v27  ;;  %7010 = vmatpush1.bf16.msra.mxu1 %v7783_v27  ;;  %v9257_v27 = vld [vmem:[%s9193_s12 + $0x11c] ss:$28 sps:$4 sm:$0xff]  }
  0xc2   : > { %2441 = vmatprep.subr.bf16.mxu0 %v7784_v28  ;;  %6995 = vmatprep.subr.bf16.mxu1 %v7784_v28  ;;  %v7885_v28 = vld [vmem:[%s9193_s12 + $0x2dc] ss:$28 sps:$4 sm:$0xff]  }
  0xc5   : > { %2442 = vmatpush1.bf16.msra.mxu0 %v7786_v29  ;;  %7011 = vmatpush1.bf16.msra.mxu1 %v7786_v29  ;;  %v7877_v29 = vld [vmem:[#allocation5 + $0x320] ss:$16 sps:$4 sm:$0xff]  }
  0xc6   : > { %2443 = vmatprep.subr.bf16.mxu0 %v7787_v30  ;;  %6996 = vmatprep.subr.bf16.mxu1 %v7787_v30  ;;  %v7880_v30 = vld [vmem:[#allocation5 + $0x128] ss:$16 sps:$4 sm:$0xff]  }
  0xc9   : > { %2444 = vmatpush1.bf16.msra.mxu0 %v7789_v31  ;;  %7012 = vmatpush1.bf16.msra.mxu1 %v7789_v31  ;;  %v7891_v31 = vld [vmem:[#allocation5 + $0x344] ss:$16 sps:$4 sm:$0xff]  }
  0xca   : > { %2445 = vmatprep.subr.bf16.mxu0 %v7790_v32  ;;  %6997 = vmatprep.subr.bf16.mxu1 %v7790_v32  ;;  %v9262_v32 = vld [vmem:[%s9193_s12 + $0x118] ss:$28 sps:$4 sm:$0xff]  }
  0xcd   : > { %2446 = vmatpush1.bf16.msra.mxu0 %v7792_v33  ;;  %7013 = vmatpush1.bf16.msra.mxu1 %v7792_v33  ;;  %v7894_v33 = vld [vmem:[#allocation5 + $0x14c] ss:$16 sps:$4 sm:$0xff]  }
  0xce   : > { %2608 = vmatprep.subr.bf16.mxu0 %v7801_v34  ;;  %3187 = vmatprep.subr.bf16.mxu1 %v7804_v36  ;;  %v7888_v34 = vld [vmem:[%s9193_s12 + $0x2d8] ss:$28 sps:$4 sm:$0xff]   ;;  %v7889_v36 = vld [vmem:[#allocation5 + $0x340] ss:$16 sps:$4 sm:$0xff]  }
  0xd0   : > { %2448 = vmatmul.mubr.bf16.vlgmr.msra.gmra.mrb[0].mxu0 %v9213_v35  ;;  %2528 = vmatmul.mubr.bf16.vlgmr.msra.gmra.mrb[0].mxu1 %v7796_v37  ;;  %v7892_v37 = vld [vmem:[#allocation5 + $0x148] ss:$16 sps:$4 sm:$0xff]  }
  0xd1   : > { %2609 = vmatpush1.bf16.msra.mxu0 %v7799_v38  ;;  %3188 = vmatpush1.bf16.msra.mxu1 %v7802_v39  ;;  %v7897_v38 = vld [vmem:[#allocation5 + $0x364] ss:$16 sps:$4 sm:$0xff]   ;;  %v7900_v39 = vld [vmem:[#allocation5 + $0x16c] ss:$16 sps:$4 sm:$0xff]  }
  0xd2   : > { %2610 = vmatprep.subr.bf16.mxu0 %v7807_v40  ;;  %3189 = vmatprep.subr.bf16.mxu1 %v7810_v41  ;;  %v9267_v40 = vld [vmem:[%s9193_s12 + $0x154] ss:$28 sps:$4 sm:$0xff]  }
  0xd3   : > { %2457 = vmatprep.mubr.bf16.mxu0 %v9217_v42  ;;  %2537 = vmatprep.mubr.bf16.mxu1 %v7813_v43  ;;  %v7903_v41 = vld [vmem:[%s9193_s12 + $0x314] ss:$28 sps:$4 sm:$0xff]  }
  0xd4   : > { %v7895_v43 = vld [vmem:[#allocation5 + $0x360] ss:$16 sps:$4 sm:$0xff]  }
  0xd5   : > { %2611 = vmatpush1.bf16.msra.mxu0 %v7805_v44  ;;  %3190 = vmatpush1.bf16.msra.mxu1 %v7808_v45  ;;  %v7898_v44 = vld [vmem:[#allocation5 + $0x168] ss:$16 sps:$4 sm:$0xff]   ;;  %v7909_v45 = vld [vmem:[#allocation5 + $0x384] ss:$16 sps:$4 sm:$0xff]  }
  0xd6   : > { %2612 = vmatprep.subr.bf16.mxu0 %v7819_v46  ;;  %3191 = vmatprep.subr.bf16.mxu1 %v7822_v48  ;;  %v9272_v46 = vld [vmem:[%s9193_s12 + $0x150] ss:$28 sps:$4 sm:$0xff]  }
  0xd7   : > { %v7912_v48 = vld [vmem:[#allocation5 + $0x18c] ss:$16 sps:$4 sm:$0xff]  }
  0xd8   : > { %2458 = vmatmul.mubr.bf16.gmra.mrb[4].mxu0 %v9222_v47  ;;  %2538 = vmatmul.mubr.bf16.gmra.mrb[4].mxu1 %v7816_v49  ;;  %v7906_v49 = vld [vmem:[%s9193_s12 + $0x310] ss:$28 sps:$4 sm:$0xff]  }
  0xd9   : > { %2613 = vmatpush1.bf16.msra.mxu0 %v7817_v50  ;;  %3192 = vmatpush1.bf16.msra.mxu1 %v7820_v51  ;;  %v7907_v50 = vld [vmem:[#allocation5 + $0x380] ss:$16 sps:$4 sm:$0xff]   ;;  %v7910_v51 = vld [vmem:[#allocation5 + $0x188] ss:$16 sps:$4 sm:$0xff]  }
  0xda   : > { %2614 = vmatprep.subr.bf16.mxu0 %v7825_v52  ;;  %3193 = vmatprep.subr.bf16.mxu1 %v7828_v53  ;;  %v7915_v52 = vld [vmem:[#allocation5 + $0x3a4] ss:$16 sps:$4 sm:$0xff]   ;;  %v7918_v53 = vld [vmem:[#allocation5 + $0x1ac] ss:$16 sps:$4 sm:$0xff]  }
  0xdb   : > { %2467 = vmatprep.mubr.bf16.mxu0 %v9227_v54  ;;  %2547 = vmatprep.mubr.bf16.mxu1 %v7831_v55  ;;  %v9277_v55 = vld [vmem:[%s9193_s12 + $0x18c] ss:$28 sps:$4 sm:$0xff]  }
  0xdd   : > { %2615 = vmatpush1.bf16.msra.mxu0 %v7823_v56  ;;  %3194 = vmatpush1.bf16.msra.mxu1 %v7826_v57  ;;  %v7921_v56 = vld [vmem:[%s9193_s12 + $0x34c] ss:$28 sps:$4 sm:$0xff]   ;;  %v7913_v57 = vld [vmem:[#allocation5 + $0x3a0] ss:$16 sps:$4 sm:$0xff]  }
  0xde   : > { %2616 = vmatprep.subr.bf16.mxu0 %v7837_v58  ;;  %3195 = vmatprep.subr.bf16.mxu1 %v7840_v60  ;;  %v7916_v58 = vld [vmem:[#allocation5 + $0x1a8] ss:$16 sps:$4 sm:$0xff]   ;;  %v7927_v60 = vld [vmem:[#allocation5 + $0x3c4] ss:$16 sps:$4 sm:$0xff]  }
  0xe0   : > { %2468 = vmatmul.mubr.bf16.gmra.mrb[8].mxu0 %v9232_v59  ;;  %2548 = vmatmul.mubr.bf16.gmra.mrb[8].mxu1 %v7834_v61  ;;  %v7930_v61 = vld [vmem:[#allocation5 + $0x1cc] ss:$16 sps:$4 sm:$0xff]  }
  0xe1   : > { %2617 = vmatpush1.bf16.msra.mxu0 %v7835_v62  ;;  %3196 = vmatpush1.bf16.msra.mxu1 %v7838_v63  ;;  %v9283_v62 = vld [vmem:[%s9193_s12 + $0x188] ss:$28 sps:$4 sm:$0xff]  }
  0xe2   : > { %2618 = vmatprep.subr.bf16.mxu0 %v7843_v0  ;;  %3197 = vmatprep.subr.bf16.mxu1 %v7846_v1  ;;  %v7924_v63 = vld [vmem:[%s9193_s12 + $0x348] ss:$28 sps:$4 sm:$0xff]   ;;  %v7925_v0 = vld [vmem:[#allocation5 + $0x3c0] ss:$16 sps:$4 sm:$0xff]  }
  0xe3   : > { %2477 = vmatprep.mubr.bf16.mxu0 %v9237_v2  ;;  %2557 = vmatprep.mubr.bf16.mxu1 %v7849_v3  ;;  %v7928_v1 = vld [vmem:[#allocation5 + $0x1c8] ss:$16 sps:$4 sm:$0xff]   ;;  %v7933_v3 = vld [vmem:[#allocation5 + $0x3e4] ss:$16 sps:$4 sm:$0xff]  }
  0xe5   : > { %2619 = vmatpush1.bf16.msra.mxu0 %v7841_v4  ;;  %3198 = vmatpush1.bf16.msra.mxu1 %v7844_v5  ;;  %v7936_v4 = vld [vmem:[#allocation5 + $0x1ec] ss:$16 sps:$4 sm:$0xff]  }
  0xe6   : > { %2620 = vmatprep.subr.bf16.mxu0 %v7855_v6  ;;  %3199 = vmatprep.subr.bf16.mxu1 %v7858_v8  ;;  %v9287_v5 = vld [vmem:[%s9193_s12 + $0xc] ss:$28 sps:$4 sm:$0xff]   ;;  %v7931_v6 = vld [vmem:[#allocation5 + $0x3e0] ss:$16 sps:$4 sm:$0xff]  }
  0xe7   : > { %v7934_v8 = vld [vmem:[#allocation5 + $0x1e8] ss:$16 sps:$4 sm:$0xff]  }
  0xe8   : > { %2478 = vmatmul.mubr.bf16.gmra.mrb[12].mxu0 %v9242_v7  ;;  %2558 = vmatmul.mubr.bf16.gmra.mrb[12].mxu1 %v7852_v9  ;;  %v7942_v9 = vld [vmem:[#allocation5 + $0x404] ss:$16 sps:$4 sm:$0xff]  }
  0xe9   : > { %2621 = vmatpush1.bf16.msra.mxu0 %v7853_v10  ;;  %3200 = vmatpush1.bf16.msra.mxu1 %v7856_v11  ;;  %v7945_v10 = vld [vmem:[#allocation5 + $0x20c] ss:$16 sps:$4 sm:$0xff]   ;;  %v9293_v11 = vld [vmem:[%s9193_s12 + $0x8] ss:$28 sps:$4 sm:$0xff]  }
  0xea   : > { %2622 = vmatprep.subr.bf16.mxu0 %v7861_v12  ;;  %3201 = vmatprep.subr.bf16.mxu1 %v7864_v14  ;;  %v7940_v12 = vld [vmem:[#allocation5 + $0x400] ss:$16 sps:$4 sm:$0xff]   ;;  %v7943_v14 = vld [vmem:[#allocation5 + $0x208] ss:$16 sps:$4 sm:$0xff]  }
  0xeb   : > { %2487 = vmatprep.mubr.bf16.mxu0 %v9247_v15  ;;  %2567 = vmatprep.mubr.bf16.mxu1 %v7867_v16  ;;  %v9296_v16 = vld [vmem:[%s9193_s12 + $0x44] ss:$28 sps:$4 sm:$0xff]  }
  0xed   : > { %2623 = vmatpush1.bf16.msra.mxu0 %v7859_v17  ;;  %3202 = vmatpush1.bf16.msra.mxu1 %v7862_v18  ;;  %v7951_v17 = vld [vmem:[#allocation5 + $0x424] ss:$16 sps:$4 sm:$0xff]   ;;  %v7954_v18 = vld [vmem:[#allocation5 + $0x22c] ss:$16 sps:$4 sm:$0xff]  }
  0xee   : > { %2624 = vmatprep.subr.bf16.mxu0 %v7873_v19  ;;  %3203 = vmatprep.subr.bf16.mxu1 %v7876_v21  ;;  %v7949_v19 = vld [vmem:[#allocation5 + $0x420] ss:$16 sps:$4 sm:$0xff]   ;;  %v7960_v21 = vld [vmem:[#allocation5 + $0x444] ss:$16 sps:$4 sm:$0xff]  }
  0xf0   : > { %2488 = vmatmul.mubr.bf16.gmra.mrb[16].mxu0 %v9252_v20  ;;  %2568 = vmatmul.mubr.bf16.gmra.mrb[16].mxu1 %v7870_v22  ;;  %v7963_v22 = vld [vmem:[#allocation5 + $0x24c] ss:$16 sps:$4 sm:$0xff]  }
  0xf1   : > { %2625 = vmatpush1.bf16.msra.mxu0 %v7871_v23  ;;  %3204 = vmatpush1.bf16.msra.mxu1 %v7874_v24  ;;  %v9303_v23 = vld [vmem:[%s9193_s12 + $0x40] ss:$28 sps:$4 sm:$0xff]  }
  0xf2   : > { %2626 = vmatprep.subr.bf16.mxu0 %v7879_v25  ;;  %3205 = vmatprep.subr.bf16.mxu1 %v7882_v26  ;;  %v9306_v24 = vld [vmem:[%s9193_s12 + $0x7c] ss:$28 sps:$4 sm:$0xff]   ;;  %v7958_v25 = vld [vmem:[#allocation5 + $0x440] ss:$16 sps:$4 sm:$0xff]   ;;  %v7969_v26 = vld [vmem:[#allocation5 + $0x464] ss:$16 sps:$4 sm:$0xff]  }
  0xf3   : > { %2497 = vmatprep.mubr.bf16.mxu0 %v9257_v27  ;;  %2577 = vmatprep.mubr.bf16.mxu1 %v7885_v28  ;;  %v7972_v28 = vld [vmem:[#allocation5 + $0x26c] ss:$16 sps:$4 sm:$0xff]  }
  0xf5   : > { %2627 = vmatpush1.bf16.msra.mxu0 %v7877_v29  ;;  %3206 = vmatpush1.bf16.msra.mxu1 %v7880_v30  ;;  %v7970_v29 = vld [vmem:[#allocation5 + $0x268] ss:$16 sps:$4 sm:$0xff]   ;;  %v7978_v30 = vld [vmem:[#allocation5 + $0x484] ss:$16 sps:$4 sm:$0xff]  }
  0xf6   : > { %2628 = vmatprep.subr.bf16.mxu0 %v7891_v31  ;;  %3207 = vmatprep.subr.bf16.mxu1 %v7894_v33  ;;  %v7981_v31 = vld [vmem:[#allocation5 + $0x28c] ss:$16 sps:$4 sm:$0xff]   ;;  %v9313_v33 = vld [vmem:[%s9193_s12 + $0x78] ss:$28 sps:$4 sm:$0xff]  }
  0xf8   : > { %2498 = vmatmul.mubr.bf16.gmra.mrb[20].mxu0 %v9262_v32  ;;  %2578 = vmatmul.mubr.bf16.gmra.mrb[20].mxu1 %v7888_v34  ;;  %v9316_v34 = vld [vmem:[%s9193_s12 + $0xb4] ss:$28 sps:$4 sm:$0xff]  }
  0xf9   : > { %2629 = vmatpush1.bf16.msra.mxu0 %v7889_v36  ;;  %3208 = vmatpush1.bf16.msra.mxu1 %v7892_v37  ;;  %v7976_v36 = vld [vmem:[#allocation5 + $0x480] ss:$16 sps:$4 sm:$0xff]   ;;  %v7979_v37 = vld [vmem:[#allocation5 + $0x288] ss:$16 sps:$4 sm:$0xff]  }
  0xfa   : > { %2630 = vmatprep.subr.bf16.mxu0 %v7897_v38  ;;  %3209 = vmatprep.subr.bf16.mxu1 %v7900_v39  ;;  %v7985_v38 = vld [vmem:[#allocation5 + $0x4a0] ss:$16 sps:$4 sm:$0xff]   ;;  %v7988_v39 = vld [vmem:[#allocation5 + $0x2a8] ss:$16 sps:$4 sm:$0xff]  }
  0xfb   : > { %2507 = vmatprep.mubr.bf16.mxu0 %v9267_v40  ;;  %2587 = vmatprep.mubr.bf16.mxu1 %v7903_v41  ;;  %v7996_v41 = vld [vmem:[#allocation5 + $0x4c4] ss:$16 sps:$4 sm:$0xff]  }
  0xfd   : > { %2631 = vmatpush1.bf16.msra.mxu0 %v7895_v43  ;;  %3210 = vmatpush1.bf16.msra.mxu1 %v7898_v44  ;;  %v7999_v43 = vld [vmem:[#allocation5 + $0x2cc] ss:$16 sps:$4 sm:$0xff]  }
  0xfe   : > { %2632 = vmatprep.subr.bf16.mxu0 %v7909_v45  ;;  %3211 = vmatprep.subr.bf16.mxu1 %v7912_v48  ;;  %v9323_v44 = vld [vmem:[%s9193_s12 + $0xb0] ss:$28 sps:$4 sm:$0xff]  }
  0xff   : > { %v9326_v45 = vld [vmem:[%s9193_s12 + $0xec] ss:$28 sps:$4 sm:$0xff]   ;;  %v7994_v48 = vld [vmem:[#allocation5 + $0x4c0] ss:$16 sps:$4 sm:$0xff]  }
 0x100   : > { %2508 = vmatmul.mubr.bf16.gmra.mrb[24].mxu0 %v9272_v46  ;;  %2588 = vmatmul.mubr.bf16.gmra.mrb[24].mxu1 %v7906_v49  ;;  %v7997_v49 = vld [vmem:[#allocation5 + $0x2c8] ss:$16 sps:$4 sm:$0xff]  }
 0x101   : > { %2633 = vmatpush1.bf16.msra.mxu0 %v7907_v50  ;;  %3212 = vmatpush1.bf16.msra.mxu1 %v7910_v51  ;;  %v8003_v50 = vld [vmem:[#allocation5 + $0x4e0] ss:$16 sps:$4 sm:$0xff]   ;;  %v8006_v51 = vld [vmem:[#allocation5 + $0x2e8] ss:$16 sps:$4 sm:$0xff]  }
 0x102   : > { %2634 = vmatprep.subr.bf16.mxu0 %v7915_v52  ;;  %3213 = vmatprep.subr.bf16.mxu1 %v7918_v53  ;;  %v8014_v52 = vld [vmem:[#allocation5 + $0x504] ss:$16 sps:$4 sm:$0xff]   ;;  %v8017_v53 = vld [vmem:[#allocation5 + $0x30c] ss:$16 sps:$4 sm:$0xff]  }
 0x103   : > { %2517 = vmatprep.mubr.bf16.mxu0 %v9277_v55  ;;  %2597 = vmatprep.mubr.bf16.mxu1 %v7921_v56  ;;  %v9333_v56 = vld [vmem:[%s9193_s12 + $0xe8] ss:$28 sps:$4 sm:$0xff]  }
 0x105   : > { %2635 = vmatpush1.bf16.msra.mxu0 %v7913_v57  ;;  %3214 = vmatpush1.bf16.msra.mxu1 %v7916_v58  ;;  %v9336_v57 = vld [vmem:[%s9193_s12 + $0x124] ss:$28 sps:$4 sm:$0xff]  }
 0x106   : > { %2636 = vmatprep.subr.bf16.mxu0 %v7927_v60  ;;  %3215 = vmatprep.subr.bf16.mxu1 %v7930_v61  ;;  %v8012_v58 = vld [vmem:[#allocation5 + $0x500] ss:$16 sps:$4 sm:$0xff]   ;;  %v8026_v60 = vld [vmem:[#allocation5 + $0x32c] ss:$16 sps:$4 sm:$0xff]  }
 0x107   : > { %v8021_v61 = vld [vmem:[#allocation5 + $0x520] ss:$16 sps:$4 sm:$0xff]  }
 0x108   : > { %2518 = vmatmul.mubr.bf16.gmra.mrb[28].mxu0 %v9283_v62  ;;  %2598 = vmatmul.mubr.bf16.gmra.mrb[28].mxu1 %v7924_v63  ;;  %v9343_v63 = vld [vmem:[%s9193_s12 + $0x120] ss:$28 sps:$4 sm:$0xff]  }
 0x109   : > { %2637 = vmatpush1.bf16.msra.mxu0 %v7925_v0  ;;  %3216 = vmatpush1.bf16.msra.mxu1 %v7928_v1  ;;  %v8024_v0 = vld [vmem:[#allocation5 + $0x328] ss:$16 sps:$4 sm:$0xff]  }
 0x10a   : > { %2638 = vmatprep.subr.bf16.mxu0 %v7933_v3  ;;  %3217 = vmatprep.subr.bf16.mxu1 %v7936_v4  ;;  %v9346_v1 = vld [vmem:[%s9193_s12 + $0x15c] ss:$28 sps:$4 sm:$0xff]   ;;  %v8032_v3 = vld [vmem:[#allocation5 + $0x544] ss:$16 sps:$4 sm:$0xff]  }
 0x10b   : > { %2640 = vmatprep.mubr.bf16.mxu0 %v9287_v5  ;;  %3219 = vmatprep.mubr.bf16.mxu1 %v9208_v13  ;;  %v7952_v13 = vld [vmem:[#allocation5 + $0x228] ss:$16 sps:$4 sm:$0xff]   ;;  %v8035_v4 = vld [vmem:[#allocation5 + $0x34c] ss:$16 sps:$4 sm:$0xff]  }
 0x10d   : > { %2639 = vmatpush1.bf16.msra.mxu0 %v7931_v6  ;;  %3218 = vmatpush1.bf16.msra.mxu1 %v7934_v8  ;;  %v8030_v6 = vld [vmem:[#allocation5 + $0x540] ss:$16 sps:$4 sm:$0xff]   ;;  %v8033_v8 = vld [vmem:[#allocation5 + $0x348] ss:$16 sps:$4 sm:$0xff]  }
 0x10e   : > { %2801 = vmatprep.subr.bf16.mxu0 %v7942_v9  ;;  %3380 = vmatprep.subr.bf16.mxu1 %v7945_v10  ;;  %v8039_v9 = vld [vmem:[#allocation5 + $0x560] ss:$16 sps:$4 sm:$0xff]   ;;  %v8042_v10 = vld [vmem:[#allocation5 + $0x368] ss:$16 sps:$4 sm:$0xff]  }
 0x110   : > { %2641 = vmatmul.mubr.bf16.vlgmr.msra.gmra.mrb[0].mxu0 %v9293_v11  ;;  %3220 = vmatmul.mubr.bf16.vlgmr.msra.gmra.mrb[32].mxu1 %v9213_v35  ;;  %v7961_v35 = vld [vmem:[#allocation5 + $0x248] ss:$16 sps:$4 sm:$0xff]  }
 0x111   : > { %2802 = vmatpush1.bf16.msra.mxu0 %v7940_v12  ;;  %3381 = vmatpush1.bf16.msra.mxu1 %v7943_v14  ;;  %v8050_v12 = vld [vmem:[#allocation5 + $0x584] ss:$16 sps:$4 sm:$0xff]   ;;  %v8053_v14 = vld [vmem:[#allocation5 + $0x38c] ss:$16 sps:$4 sm:$0xff]  }
 0x112   : > { %2650 = vmatprep.mubr.bf16.mxu0 %v9296_v16  ;;  %3229 = vmatprep.mubr.bf16.mxu1 %v9217_v42  ;;  %v7967_v42 = vld [vmem:[#allocation5 + $0x460] ss:$16 sps:$4 sm:$0xff]  }
 0x113   : > { %2803 = vmatprep.subr.bf16.mxu0 %v7951_v17  ;;  %3382 = vmatprep.subr.bf16.mxu1 %v7954_v18  ;;  %v9353_v17 = vld [vmem:[%s9193_s12 + $0x158] ss:$28 sps:$4 sm:$0xff]  }
 0x114   : > { %v9356_v18 = vld [vmem:[%s9193_s12 + $0x194] ss:$28 sps:$4 sm:$0xff]  }
 0x115   : > { %2804 = vmatpush1.bf16.msra.mxu0 %v7949_v19  ;;  %3383 = vmatpush1.bf16.msra.mxu1 %v7952_v13  ;;  %v8048_v19 = vld [vmem:[#allocation5 + $0x580] ss:$16 sps:$4 sm:$0xff]   ;;  %v8051_v13 = vld [vmem:[#allocation5 + $0x388] ss:$16 sps:$4 sm:$0xff]  }
 0x116   : > { %2805 = vmatprep.subr.bf16.mxu0 %v7960_v21  ;;  %3384 = vmatprep.subr.bf16.mxu1 %v7963_v22  ;;  %v8062_v21 = vld [vmem:[#allocation5 + $0x3ac] ss:$16 sps:$4 sm:$0xff]   ;;  %v8060_v22 = vld [vmem:[#allocation5 + $0x3a8] ss:$16 sps:$4 sm:$0xff]  }
 0x118   : > { %2651 = vmatmul.mubr.bf16.gmra.mrb[4].mxu0 %v9303_v23  ;;  %3230 = vmatmul.mubr.bf16.gmra.mrb[36].mxu1 %v9222_v47  ;;  %v7987_v47 = vld [vmem:[#allocation5 + $0x4a4] ss:$16 sps:$4 sm:$0xff]  }
 0x119   : > { %2660 = vmatprep.mubr.bf16.mxu0 %v9306_v24  ;;  %3239 = vmatprep.mubr.bf16.mxu1 %v9227_v54  ;;  %v7990_v54 = vld [vmem:[#allocation5 + $0x2ac] ss:$16 sps:$4 sm:$0xff]  }
 0x11a   : > { %2806 = vmatpush1.bf16.msra.mxu0 %v7958_v25  ;;  %3385 = vmatpush1.bf16.msra.mxu1 %v7961_v35  ;;  %v8068_v25 = vld [vmem:[#allocation5 + $0x5c4] ss:$16 sps:$4 sm:$0xff]   ;;  %v8071_v35 = vld [vmem:[#allocation5 + $0x3cc] ss:$16 sps:$4 sm:$0xff]  }
 0x11b   : > { %2807 = vmatprep.subr.bf16.mxu0 %v7969_v26  ;;  %3386 = vmatprep.subr.bf16.mxu1 %v7972_v28  ;;  %v9363_v26 = vld [vmem:[%s9193_s12 + $0x190] ss:$28 sps:$4 sm:$0xff]  }
 0x11c   : > { %v9366_v28 = vld [vmem:[%s9193_s12 + $0x1cc] ss:$28 sps:$4 sm:$0xff]  }
 0x11e   : > { %2808 = vmatpush1.bf16.msra.mxu0 %v7967_v42  ;;  %3387 = vmatpush1.bf16.msra.mxu1 %v7970_v29  ;;  %v8066_v42 = vld [vmem:[#allocation5 + $0x5c0] ss:$16 sps:$4 sm:$0xff]   ;;  %v8069_v29 = vld [vmem:[#allocation5 + $0x3c8] ss:$16 sps:$4 sm:$0xff]  }
 0x11f   : > { %2809 = vmatprep.subr.bf16.mxu0 %v7978_v30  ;;  %3388 = vmatprep.subr.bf16.mxu1 %v7981_v31  ;;  %v8080_v30 = vld [vmem:[#allocation5 + $0x3ec] ss:$16 sps:$4 sm:$0xff]   ;;  %v8078_v31 = vld [vmem:[#allocation5 + $0x3e8] ss:$16 sps:$4 sm:$0xff]  }
 0x120   : > { %2661 = vmatmul.mubr.bf16.gmra.mrb[8].mxu0 %v9313_v33  ;;  %3240 = vmatmul.mubr.bf16.gmra.mrb[40].mxu1 %v9232_v59  ;;  %v8005_v59 = vld [vmem:[#allocation5 + $0x4e4] ss:$16 sps:$4 sm:$0xff]  }
 0x121   : > { %2670 = vmatprep.mubr.bf16.mxu0 %v9316_v34  ;;  %3249 = vmatprep.mubr.bf16.mxu1 %v9237_v2  ;;  %v8008_v2 = vld [vmem:[#allocation5 + $0x2ec] ss:$16 sps:$4 sm:$0xff]  }
 0x122   : > { %2810 = vmatpush1.bf16.msra.mxu0 %v7976_v36  ;;  %3389 = vmatpush1.bf16.msra.mxu1 %v7979_v37  ;;  %v8737_v36 = vld [vmem:[%s9193_s12 + $0x1c4] ss:$28 sps:$4 sm:$0xff]  }
 0x123   : > { %2811 = vmatprep.subr.bf16.mxu0 %v7987_v47  ;;  %3390 = vmatprep.subr.bf16.mxu1 %v7990_v54  ;;  %v8086_v37 = vld [vmem:[#allocation5 + $0x604] ss:$16 sps:$4 sm:$0xff]   ;;  %v8089_v47 = vld [vmem:[#allocation5 + $0x40c] ss:$16 sps:$4 sm:$0xff]  }
 0x124   : > { %v9373_v54 = vld [vmem:[%s9193_s12 + $0x1c8] ss:$28 sps:$4 sm:$0xff]  }
 0x126   : > { %2812 = vmatpush1.bf16.msra.mxu0 %v7985_v38  ;;  %3391 = vmatpush1.bf16.msra.mxu1 %v7988_v39  ;;  %v8738_v38 = vld [vmem:[%s9193_s12 + $0x1c0] ss:$28 sps:$4 sm:$0xff]  }
 0x127   : > { %2813 = vmatprep.subr.bf16.mxu0 %v7996_v41  ;;  %3392 = vmatprep.subr.bf16.mxu1 %v7999_v43  ;;  %v8739_v39 = vld [vmem:[%s9193_s12 + $0x1fc] ss:$28 sps:$4 sm:$0xff]  }
 0x128   : > { %2671 = vmatmul.mubr.bf16.gmra.mrb[12].mxu0 %v9323_v44  ;;  %3250 = vmatmul.mubr.bf16.gmra.mrb[44].mxu1 %v9242_v7  ;;  %v8015_v7 = vld [vmem:[#allocation5 + $0x308] ss:$16 sps:$4 sm:$0xff]   ;;  %v9383_v41 = vld [vmem:[%s9193_s12 + $0x200] ss:$28 sps:$4 sm:$0xff]  }
 0x129   : > { %2680 = vmatprep.mubr.bf16.mxu0 %v9326_v45  ;;  %3259 = vmatprep.mubr.bf16.mxu1 %v9247_v15  ;;  %v8023_v15 = vld [vmem:[#allocation5 + $0x524] ss:$16 sps:$4 sm:$0xff]   ;;  %v9386_v43 = vld [vmem:[%s9193_s12 + $0x23c] ss:$28 sps:$4 sm:$0xff]  }
 0x12a   : > { %2814 = vmatpush1.bf16.msra.mxu0 %v7994_v48  ;;  %3393 = vmatpush1.bf16.msra.mxu1 %v7997_v49  ;;  %v8740_v48 = vld [vmem:[%s9193_s12 + $0x1f8] ss:$28 sps:$4 sm:$0xff]  }
 0x12b   : > { %2815 = vmatprep.subr.bf16.mxu0 %v8005_v59  ;;  %3394 = vmatprep.subr.bf16.mxu1 %v8008_v2  ;;  %v8741_v49 = vld [vmem:[%s9193_s12 + $0x234] ss:$28 sps:$4 sm:$0xff]  }
 0x12c   : > { %v9393_v59 = vld [vmem:[%s9193_s12 + $0x238] ss:$28 sps:$4 sm:$0xff]  }
 0x12d   : > { %v9396_v2 = vld [vmem:[%s9193_s12 + $0x274] ss:$28 sps:$4 sm:$0xff]  }
 0x12e   : > { %2816 = vmatpush1.bf16.msra.mxu0 %v8003_v50  ;;  %3395 = vmatpush1.bf16.msra.mxu1 %v8006_v51  ;;  %v8742_v50 = vld [vmem:[%s9193_s12 + $0x230] ss:$28 sps:$4 sm:$0xff]  }
 0x12f   : > { %2817 = vmatprep.subr.bf16.mxu0 %v8014_v52  ;;  %3396 = vmatprep.subr.bf16.mxu1 %v8017_v53  ;;  %v8743_v51 = vld [vmem:[%s9193_s12 + $0x26c] ss:$28 sps:$4 sm:$0xff]  }
 0x130   : > { %2681 = vmatmul.mubr.bf16.gmra.mrb[16].mxu0 %v9333_v56  ;;  %3260 = vmatmul.mubr.bf16.gmra.mrb[48].mxu1 %v9252_v20  ;;  %v8041_v20 = vld [vmem:[#allocation5 + $0x564] ss:$16 sps:$4 sm:$0xff]   ;;  %v9403_v52 = vld [vmem:[%s9193_s12 + $0x270] ss:$28 sps:$4 sm:$0xff]  }
 0x131   : > { %2690 = vmatprep.mubr.bf16.mxu0 %v9336_v57  ;;  %3269 = vmatprep.mubr.bf16.mxu1 %v9257_v27  ;;  %v8044_v27 = vld [vmem:[#allocation5 + $0x36c] ss:$16 sps:$4 sm:$0xff]  }
 0x132   : > { %2818 = vmatpush1.bf16.msra.mxu0 %v8012_v58  ;;  %3397 = vmatpush1.bf16.msra.mxu1 %v8015_v7  ;;  %v9406_v53 = vld [vmem:[%s9193_s12 + $0x2ac] ss:$28 sps:$4 sm:$0xff]   ;;  %v8745_v7 = vld [vmem:[%s9193_s12 + $0x2a4] ss:$28 sps:$4 sm:$0xff]  }
 0x133   : > { %2819 = vmatprep.subr.bf16.mxu0 %v8023_v15  ;;  %3398 = vmatprep.subr.bf16.mxu1 %v8026_v60  ;;  %v8744_v58 = vld [vmem:[%s9193_s12 + $0x268] ss:$28 sps:$4 sm:$0xff]  }
 0x134   : > { %v9413_v15 = vld [vmem:[%s9193_s12 + $0x2a8] ss:$28 sps:$4 sm:$0xff]  }
 0x135   : > { %v9416_v60 = vld [vmem:[%s9193_s12 + $0x2e4] ss:$28 sps:$4 sm:$0xff]  }
 0x136   : > { %2820 = vmatpush1.bf16.msra.mxu0 %v8021_v61  ;;  %3399 = vmatpush1.bf16.msra.mxu1 %v8024_v0  ;;  %v8746_v61 = vld [vmem:[%s9193_s12 + $0x2a0] ss:$28 sps:$4 sm:$0xff]  }
 0x137   : > { %2821 = vmatprep.subr.bf16.mxu0 %v8032_v3  ;;  %3400 = vmatprep.subr.bf16.mxu1 %v8035_v4  ;;  %v8747_v0 = vld [vmem:[%s9193_s12 + $0x2dc] ss:$28 sps:$4 sm:$0xff]  }
 0x138   : > { %2691 = vmatmul.mubr.bf16.gmra.mrb[20].mxu0 %v9343_v63  ;;  %3270 = vmatmul.mubr.bf16.gmra.mrb[52].mxu1 %v9262_v32  ;;  %v8059_v32 = vld [vmem:[#allocation5 + $0x5a4] ss:$16 sps:$4 sm:$0xff]   ;;  %v9423_v3 = vld [vmem:[%s9193_s12 + $0x2e0] ss:$28 sps:$4 sm:$0xff]  }
 0x139   : > { %2700 = vmatprep.mubr.bf16.mxu0 %v9346_v1  ;;  %3279 = vmatprep.mubr.bf16.mxu1 %v9267_v40  ;;  %v8057_v40 = vld [vmem:[#allocation5 + $0x5a0] ss:$16 sps:$4 sm:$0xff]   ;;  %v9426_v4 = vld [vmem:[%s9193_s12 + $0x31c] ss:$28 sps:$4 sm:$0xff]  }
 0x13a   : > { %2822 = vmatpush1.bf16.msra.mxu0 %v8030_v6  ;;  %3401 = vmatpush1.bf16.msra.mxu1 %v8033_v8  ;;  %v8748_v6 = vld [vmem:[%s9193_s12 + $0x2d8] ss:$28 sps:$4 sm:$0xff]  }
 0x13b   : > { %2823 = vmatprep.subr.bf16.mxu0 %v8041_v20  ;;  %3402 = vmatprep.subr.bf16.mxu1 %v8044_v27  ;;  %v8749_v8 = vld [vmem:[%s9193_s12 + $0x314] ss:$28 sps:$4 sm:$0xff]  }
 0x13c   : > { %v9433_v20 = vld [vmem:[%s9193_s12 + $0x318] ss:$28 sps:$4 sm:$0xff]  }
 0x13d   : > { %v9436_v27 = vld [vmem:[%s9193_s12 + $0x354] ss:$28 sps:$4 sm:$0xff]  }
 0x13e   : > { %2824 = vmatpush1.bf16.msra.mxu0 %v8039_v9  ;;  %3403 = vmatpush1.bf16.msra.mxu1 %v8042_v10  ;;  %v8750_v9 = vld [vmem:[%s9193_s12 + $0x310] ss:$28 sps:$4 sm:$0xff]  }
 0x13f   : > { %2825 = vmatprep.subr.bf16.mxu0 %v8050_v12  ;;  %3404 = vmatprep.subr.bf16.mxu1 %v8053_v14  ;;  %v8751_v10 = vld [vmem:[%s9193_s12 + $0x34c] ss:$28 sps:$4 sm:$0xff]   ;;  %v9446_v14 = vld [vmem:[%s9193_s12 + $0x14] ss:$28 sps:$4 sm:$0xff]  }
 0x140   : > { %2701 = vmatmul.mubr.bf16.gmra.mrb[24].mxu0 %v9353_v17  ;;  %3280 = vmatmul.mubr.bf16.gmra.mrb[56].mxu1 %v9272_v46  ;;  %v8077_v46 = vld [vmem:[#allocation5 + $0x5e4] ss:$16 sps:$4 sm:$0xff]   ;;  %v9443_v12 = vld [vmem:[%s9193_s12 + $0x350] ss:$28 sps:$4 sm:$0xff]  }
 0x141   : > { %2710 = vmatprep.mubr.bf16.mxu0 %v9356_v18  ;;  %3289 = vmatprep.mubr.bf16.mxu1 %v9277_v55  ;;  %v8075_v55 = vld [vmem:[#allocation5 + $0x5e0] ss:$16 sps:$4 sm:$0xff]  }
 0x142   : > { %2826 = vmatpush1.bf16.msra.mxu0 %v8048_v19  ;;  %3405 = vmatpush1.bf16.msra.mxu1 %v8051_v13  ;;  %v8752_v19 = vld [vmem:[%s9193_s12 + $0x348] ss:$28 sps:$4 sm:$0xff]   ;;  %v9453_v13 = vld [vmem:[%s9193_s12 + $0x10] ss:$28 sps:$4 sm:$0xff]  }
 0x143   : > { %2827 = vmatprep.subr.bf16.mxu0 %v8059_v32  ;;  %3406 = vmatprep.subr.bf16.mxu1 %v8062_v21  ;;  %v8084_v32 = vld [vmem:[#allocation5 + $0x600] ss:$16 sps:$4 sm:$0xff]   ;;  %v8087_v21 = vld [vmem:[#allocation5 + $0x408] ss:$16 sps:$4 sm:$0xff]  }
 0x146   : > { %2828 = vmatpush1.bf16.msra.mxu0 %v8057_v40  ;;  %3407 = vmatpush1.bf16.msra.mxu1 %v8060_v22  ;;  %v9456_v40 = vld [vmem:[%s9193_s12 + $0x4c] ss:$28 sps:$4 sm:$0xff]  }
 0x147   : > { %2829 = vmatprep.subr.bf16.mxu0 %v8068_v25  ;;  %3408 = vmatprep.subr.bf16.mxu1 %v8071_v35  ;;  %v8095_v22 = vld [vmem:[#allocation5 + $0x42c] ss:$16 sps:$4 sm:$0xff]   ;;  %v8101_v25 = vld [vmem:[#allocation5 + $0x624] ss:$16 sps:$4 sm:$0xff]   ;;  %v8093_v35 = vld [vmem:[#allocation5 + $0x428] ss:$16 sps:$4 sm:$0xff]  }
 0x148   : > { %2711 = vmatmul.mubr.bf16.gmra.mrb[28].mxu0 %v9363_v26  ;;  %3290 = vmatmul.mubr.bf16.gmra.mrb[60].mxu1 %v9283_v62  ;;  %v9376_v62 = vld [vmem:[%s9193_s12 + $0x204] ss:$28 sps:$4 sm:$0xff]  }
 0x149   : > { %2720 = vmatprep.mubr.bf16.mxu0 %v9366_v28  ;;  %3299 = vmatprep.mubr.bf16.mxu1 %v8737_v36  ;;  %v8131_v36 = vld [vmem:[#allocation5 + $0x664] ss:$16 sps:$4 sm:$0xff]  }
 0x14a   : > { %2830 = vmatpush1.bf16.msra.mxu0 %v8066_v42  ;;  %3409 = vmatpush1.bf16.msra.mxu1 %v8069_v29  ;;  %v8099_v42 = vld [vmem:[#allocation5 + $0x620] ss:$16 sps:$4 sm:$0xff]   ;;  %v8116_v29 = vld [vmem:[#allocation5 + $0x644] ss:$16 sps:$4 sm:$0xff]  }
 0x14b   : > { %2831 = vmatprep.subr.bf16.mxu0 %v8077_v46  ;;  %3410 = vmatprep.subr.bf16.mxu1 %v8080_v30  ;;  %v9463_v46 = vld [vmem:[%s9193_s12 + $0x48] ss:$28 sps:$4 sm:$0xff]  }
 0x14c   : > { %v9466_v30 = vld [vmem:[%s9193_s12 + $0x84] ss:$28 sps:$4 sm:$0xff]  }
 0x14e   : > { %2832 = vmatpush1.bf16.msra.mxu0 %v8075_v55  ;;  %3411 = vmatpush1.bf16.msra.mxu1 %v8078_v31  ;;  %v8102_v55 = vld [vmem:[#allocation5 + $0x448] ss:$16 sps:$4 sm:$0xff]   ;;  %v8110_v31 = vld [vmem:[#allocation5 + $0x46c] ss:$16 sps:$4 sm:$0xff]  }
 0x14f   : > { %2994 = vmatprep.subr.bf16.mxu0 %v8086_v37  ;;  %3573 = vmatprep.subr.bf16.mxu1 %v8089_v47  ;;  %v8129_v37 = vld [vmem:[#allocation5 + $0x660] ss:$16 sps:$4 sm:$0xff]   ;;  %v8119_v47 = vld [vmem:[#allocation5 + $0x48c] ss:$16 sps:$4 sm:$0xff]  }
 0x150   : > { %2721 = vmatmul.mubr.bf16.gmra.mrb[32].mxu0 %v9373_v54  ;;  %3300 = vmatmul.mubr.bf16.gmra.mrb[64].mxu1 %v8738_v38  ;;  %v8146_v38 = vld [vmem:[#allocation5 + $0x684] ss:$16 sps:$4 sm:$0xff]  }
 0x151   : > { %2730 = vmatprep.mubr.bf16.mxu0 %v9376_v62  ;;  %3309 = vmatprep.mubr.bf16.mxu1 %v8739_v39  ;;  %v9473_v39 = vld [vmem:[%s9193_s12 + $0x80] ss:$28 sps:$4 sm:$0xff]  }
 0x158   : > { %2731 = vmatmul.mubr.bf16.gmra.mrb[36].mxu0 %v9383_v41  ;;  %3310 = vmatmul.mubr.bf16.gmra.mrb[68].mxu1 %v8740_v48  ;;  %v9476_v48 = vld [vmem:[%s9193_s12 + $0xbc] ss:$28 sps:$4 sm:$0xff]  }
 0x159   : > { %2740 = vmatprep.mubr.bf16.mxu0 %v9386_v43  ;;  %3319 = vmatprep.mubr.bf16.mxu1 %v8741_v49  ;;  %v8117_v49 = vld [vmem:[#allocation5 + $0x488] ss:$16 sps:$4 sm:$0xff]  }
 0x160   : > { %2741 = vmatmul.mubr.bf16.gmra.mrb[40].mxu0 %v9393_v59  ;;  %3320 = vmatmul.mubr.bf16.gmra.mrb[72].mxu1 %v8742_v50  ;;  %v8125_v50 = vld [vmem:[#allocation5 + $0x4ac] ss:$16 sps:$4 sm:$0xff]  }
 0x161   : > { %2750 = vmatprep.mubr.bf16.mxu0 %v9396_v2  ;;  %3329 = vmatprep.mubr.bf16.mxu1 %v8743_v51  ;;  %v8123_v51 = vld [vmem:[#allocation5 + $0x4a8] ss:$16 sps:$4 sm:$0xff]  }
 0x168   : > { %2751 = vmatmul.mubr.bf16.gmra.mrb[44].mxu0 %v9403_v52  ;;  %3330 = vmatmul.mubr.bf16.gmra.mrb[76].mxu1 %v8744_v58  ;;  %v8159_v58 = vld [vmem:[#allocation5 + $0x6a0] ss:$16 sps:$4 sm:$0xff]  }
 0x169   : > { %2760 = vmatprep.mubr.bf16.mxu0 %v9406_v53  ;;  %3339 = vmatprep.mubr.bf16.mxu1 %v8745_v7 }
 0x170   : > { %2761 = vmatmul.mubr.bf16.gmra.mrb[48].mxu0 %v9413_v15  ;;  %3340 = vmatmul.mubr.bf16.gmra.mrb[80].mxu1 %v8746_v61  ;;  %v8134_v61 = vld [vmem:[#allocation5 + $0x4cc] ss:$16 sps:$4 sm:$0xff]  }
 0x171   : > { %2770 = vmatprep.mubr.bf16.mxu0 %v9416_v60  ;;  %3349 = vmatprep.mubr.bf16.mxu1 %v8747_v0  ;;  %v8176_v0 = vld [vmem:[#allocation5 + $0x6c4] ss:$16 sps:$4 sm:$0xff]  }
 0x178   : > { %2771 = vmatmul.mubr.bf16.gmra.mrb[52].mxu0 %v9423_v3  ;;  %3350 = vmatmul.mubr.bf16.gmra.mrb[84].mxu1 %v8748_v6 }
 0x179   : > { %2780 = vmatprep.mubr.bf16.mxu0 %v9426_v4  ;;  %3359 = vmatprep.mubr.bf16.mxu1 %v8749_v8  ;;  %v9487_v8 = vld [vmem:[%s9193_s12 + $0xb8] ss:$28 sps:$4 sm:$0xff]  }
 0x180   : > { %2781 = vmatmul.mubr.bf16.gmra.mrb[56].mxu0 %v9433_v20  ;;  %3360 = vmatmul.mubr.bf16.gmra.mrb[88].mxu1 %v8750_v9 }
 0x181   : > { %2790 = vmatprep.mubr.bf16.mxu0 %v9436_v27  ;;  %3369 = vmatprep.mubr.bf16.mxu1 %v8751_v10 }
 0x188   : > { %2791 = vmatmul.mubr.bf16.gmra.mrb[60].mxu0 %v9443_v12  ;;  %3370 = vmatmul.mubr.bf16.gmra.mrb[92].mxu1 %v8752_v19  ;;  %v8174_v19 = vld [vmem:[#allocation5 + $0x6c0] ss:$16 sps:$4 sm:$0xff]  }
 0x189   : > { %2833 = vmatprep.mubr.bf16.mxu0 %v9446_v14  ;;  %3412 = vmatprep.mubr.bf16.mxu1 %v9287_v5  ;;  %v8104_v5 = vld [vmem:[#allocation5 + $0x44c] ss:$16 sps:$4 sm:$0xff]  }
 0x190   : > { %2834 = vmatmul.mubr.bf16.vlgmr.msra.gmra.mrb[0].mxu0 %v9453_v13  ;;  %3413 = vmatmul.mubr.bf16.vlgmr.msra.gmra.mrb[32].mxu1 %v9293_v11  ;;  %v8114_v11 = vld [vmem:[#allocation5 + $0x640] ss:$16 sps:$4 sm:$0xff]  }
 0x191   : > { %2995 = vmatpush1.bf16.msra.mxu0 %v8084_v32  ;;  %3574 = vmatpush1.bf16.msra.mxu1 %v8087_v21  ;;  %v8140_v32 = vld [vmem:[#allocation5 + $0x4ec] ss:$16 sps:$4 sm:$0xff]   ;;  %v8191_v21 = vld [vmem:[#allocation5 + $0x6e4] ss:$16 sps:$4 sm:$0xff]  }
 0x192   : > { %2843 = vmatprep.mubr.bf16.mxu0 %v9456_v40  ;;  %3422 = vmatprep.mubr.bf16.mxu1 %v9296_v16  ;;  %v8108_v16 = vld [vmem:[#allocation5 + $0x468] ss:$16 sps:$4 sm:$0xff]  }
 0x193   : > { %3575 = vmatprep.subr.bf16.mxu1 %v8095_v22  ;;  %2996 = vmatprep.subr.bf16.mxu0 %v8101_v25  ;;  %v8138_v22 = vld [vmem:[#allocation5 + $0x4e8] ss:$16 sps:$4 sm:$0xff]   ;;  %v8189_v25 = vld [vmem:[#allocation5 + $0x6e0] ss:$16 sps:$4 sm:$0xff]  }
 0x195   : > { %3576 = vmatpush1.bf16.msra.mxu1 %v8093_v35  ;;  %2997 = vmatpush1.bf16.msra.mxu0 %v8099_v42  ;;  %v8149_v42 = vld [vmem:[#allocation5 + $0x50c] ss:$16 sps:$4 sm:$0xff]  }
 0x196   : > { %3577 = vmatprep.subr.bf16.mxu1 %v8104_v5  ;;  %2998 = vmatprep.subr.bf16.mxu0 %v8116_v29  ;;  %v9505_v29 = vld [vmem:[%s9193_s12 + $0xf0] ss:$28 sps:$4 sm:$0xff]  }
 0x198   : > { %2844 = vmatmul.mubr.bf16.gmra.mrb[4].mxu0 %v9463_v46  ;;  %3423 = vmatmul.mubr.bf16.gmra.mrb[36].mxu1 %v9303_v23  ;;  %v8144_v23 = vld [vmem:[#allocation5 + $0x680] ss:$16 sps:$4 sm:$0xff]  }
 0x199   : > { %2853 = vmatprep.mubr.bf16.mxu0 %v9466_v30  ;;  %3432 = vmatprep.mubr.bf16.mxu1 %v9306_v24  ;;  %v8161_v24 = vld [vmem:[#allocation5 + $0x6a4] ss:$16 sps:$4 sm:$0xff]  }
 0x19a   : > { %3578 = vmatpush1.bf16.msra.mxu1 %v8102_v55  ;;  %2999 = vmatpush1.bf16.msra.mxu0 %v8114_v11 }
 0x19b   : > { %3579 = vmatprep.subr.bf16.mxu1 %v8110_v31  ;;  %3000 = vmatprep.subr.bf16.mxu0 %v8131_v36  ;;  %v8155_v31 = vld [vmem:[#allocation5 + $0x52c] ss:$16 sps:$4 sm:$0xff]   ;;  %v8153_v36 = vld [vmem:[#allocation5 + $0x528] ss:$16 sps:$4 sm:$0xff]  }
 0x19e   : > { %3580 = vmatpush1.bf16.msra.mxu1 %v8108_v16  ;;  %3001 = vmatpush1.bf16.msra.mxu0 %v8129_v37  ;;  %v8164_v37 = vld [vmem:[#allocation5 + $0x54c] ss:$16 sps:$4 sm:$0xff]  }
 0x19f   : > { %3581 = vmatprep.subr.bf16.mxu1 %v8119_v47  ;;  %3002 = vmatprep.subr.bf16.mxu0 %v8146_v38  ;;  %v9523_v38 = vld [vmem:[%s9193_s12 + $0x128] ss:$28 sps:$4 sm:$0xff]  }
 0x1a0   : > { %2854 = vmatmul.mubr.bf16.gmra.mrb[8].mxu0 %v9473_v39  ;;  %3433 = vmatmul.mubr.bf16.gmra.mrb[40].mxu1 %v9313_v33  ;;  %v9492_v33 = vld [vmem:[%s9193_s12 + $0xf4] ss:$28 sps:$4 sm:$0xff]  }
 0x1a1   : > { %2863 = vmatprep.mubr.bf16.mxu0 %v9476_v48  ;;  %3442 = vmatprep.mubr.bf16.mxu1 %v9316_v34  ;;  %v8132_v34 = vld [vmem:[#allocation5 + $0x4c8] ss:$16 sps:$4 sm:$0xff]  }
 0x1a2   : > { %3582 = vmatpush1.bf16.msra.mxu1 %v8117_v49  ;;  %3003 = vmatpush1.bf16.msra.mxu0 %v8144_v23  ;;  %v9528_v23 = vld [vmem:[%s9193_s12 + $0x164] ss:$28 sps:$4 sm:$0xff]  }
 0x1a3   : > { %v9482_v7 = vpop.f32.mrb[0].mxu1  ;;  %3583 = vmatprep.subr.bf16.mxu1 %v8125_v50  ;;  %3004 = vmatprep.subr.bf16.mxu0 %v8161_v24  ;;  %v8170_v50 = vld [vmem:[#allocation5 + $0x56c] ss:$16 sps:$4 sm:$0xff]   ;;  %v8168_v24 = vld [vmem:[#allocation5 + $0x568] ss:$16 sps:$4 sm:$0xff]  }
 0x1a4   : > { %v9484_v6 = vpop.f32.mrb[1].mxu1 }
 0x1a5   : > { %v9489_v9 = vpop.f32.mrb[2].mxu1 }
 0x1a6   : > { %v9494_v10 = vpop.f32.mrb[3].mxu1  ;;  %3584 = vmatpush1.bf16.msra.mxu1 %v8123_v51  ;;  %3005 = vmatpush1.bf16.msra.mxu0 %v8159_v58  ;;  %v8179_v58 = vld [vmem:[#allocation5 + $0x58c] ss:$16 sps:$4 sm:$0xff]  }
 0x1a7   : > { %3585 = vmatprep.subr.bf16.mxu1 %v8134_v61  ;;  %3006 = vmatprep.subr.bf16.mxu0 %v8176_v0  ;;  %v9541_v0 = vld [vmem:[%s9193_s12 + $0x160] ss:$28 sps:$4 sm:$0xff]  }
 0x1a8   : > { %2864 = vmatmul.mubr.bf16.gmra.mrb[12].mxu0 %v9487_v8  ;;  %3443 = vmatmul.mubr.bf16.gmra.mrb[44].mxu1 %v9323_v44  ;;  %v9510_v44 = vld [vmem:[%s9193_s12 + $0x12c] ss:$28 sps:$4 sm:$0xff]  }
 0x1a9   : > { %2873 = vmatprep.mubr.bf16.mxu0 %v9492_v33  ;;  %3452 = vmatprep.mubr.bf16.mxu1 %v9326_v45  ;;  %v8147_v45 = vld [vmem:[#allocation5 + $0x508] ss:$16 sps:$4 sm:$0xff]  }
 0x1aa   : > { %3586 = vmatpush1.bf16.msra.mxu1 %v8132_v34  ;;  %3007 = vmatpush1.bf16.msra.mxu0 %v8174_v19  ;;  %v9546_v19 = vld [vmem:[%s9193_s12 + $0x19c] ss:$28 sps:$4 sm:$0xff]  }
 0x1ab   : > { %v9500_v35 = vpop.f32.mrb[4].mxu1  ;;  %3587 = vmatprep.subr.bf16.mxu1 %v8140_v32  ;;  %3008 = vmatprep.subr.bf16.mxu0 %v8191_v21  ;;  %v8185_v32 = vld [vmem:[#allocation5 + $0x5ac] ss:$16 sps:$4 sm:$0xff]   ;;  %v8183_v21 = vld [vmem:[#allocation5 + $0x5a8] ss:$16 sps:$4 sm:$0xff]  }
 0x1ac   : > { %v9502_v5 = vpop.f32.mrb[5].mxu1 }
 0x1ad   : > { %v9507_v55 = vpop.f32.mrb[6].mxu1 }
 0x1ae   : > { %v9512_v11 = vpop.f32.mrb[7].mxu1  ;;  %3588 = vmatpush1.bf16.msra.mxu1 %v8138_v22  ;;  %3009 = vmatpush1.bf16.msra.mxu0 %v8189_v25  ;;  %v8194_v25 = vld [vmem:[#allocation5 + $0x5cc] ss:$16 sps:$4 sm:$0xff]  }
 0x1af   : > { %3589 = vmatprep.subr.bf16.mxu1 %v8149_v42 }
 0x1b0   : > { %2874 = vmatmul.mubr.bf16.gmra.mrb[16].mxu0 %v9505_v29  ;;  %3453 = vmatmul.mubr.bf16.gmra.mrb[48].mxu1 %v9333_v56 }
 0x1b1   : > { %2883 = vmatprep.mubr.bf16.mxu0 %v9510_v44  ;;  %3462 = vmatprep.mubr.bf16.mxu1 %v9336_v57  ;;  %v8162_v57 = vld [vmem:[#allocation5 + $0x548] ss:$16 sps:$4 sm:$0xff]  }
 0x1b2   : > { %3590 = vmatpush1.bf16.msra.mxu1 %v8147_v45  ;;  %v9559_v45 = vld [vmem:[%s9193_s12 + $0x198] ss:$28 sps:$4 sm:$0xff]  }
 0x1b3   : > { %v9518_v16 = vpop.f32.mrb[8].mxu1  ;;  %3591 = vmatprep.subr.bf16.mxu1 %v8155_v31 }
 0x1b4   : > { %v9520_v47 = vpop.f32.mrb[9].mxu1 }
 0x1b5   : > { %v9525_v49 = vpop.f32.mrb[10].mxu1 }
 0x1b6   : > { %v9530_v56 = vpop.f32.mrb[11].mxu1  ;;  %3592 = vmatpush1.bf16.msra.mxu1 %v8153_v36  ;;  %v9564_v36 = vld [vmem:[%s9193_s12 + $0x1d4] ss:$28 sps:$4 sm:$0xff]  }
 0x1b7   : > { %3593 = vmatprep.subr.bf16.mxu1 %v8164_v37  ;;  %v8200_v37 = vld [vmem:[#allocation5 + $0x5ec] ss:$16 sps:$4 sm:$0xff]  }
 0x1b8   : > { %2884 = vmatmul.mubr.bf16.gmra.mrb[20].mxu0 %v9523_v38  ;;  %3463 = vmatmul.mubr.bf16.gmra.mrb[52].mxu1 %v9343_v63 }
 0x1b9   : > { %2893 = vmatprep.mubr.bf16.mxu0 %v9528_v23  ;;  %3472 = vmatprep.mubr.bf16.mxu1 %v9346_v1  ;;  %v8177_v1 = vld [vmem:[#allocation5 + $0x588] ss:$16 sps:$4 sm:$0xff]  }
 0x1ba   : > { %3594 = vmatpush1.bf16.msra.mxu1 %v8162_v57  ;;  %v8198_v57 = vld [vmem:[#allocation5 + $0x5e8] ss:$16 sps:$4 sm:$0xff]  }
 0x1bb   : > { %v9536_v51 = vpop.f32.mrb[12].mxu1  ;;  %3595 = vmatprep.subr.bf16.mxu1 %v8170_v50 }
 0x1bc   : > { %v9538_v61 = vpop.f32.mrb[13].mxu1 }
 0x1bd   : > { %v9543_v34 = vpop.f32.mrb[14].mxu1 }
 0x1be   : > { %v9548_v63 = vpop.f32.mrb[15].mxu1  ;;  %3596 = vmatpush1.bf16.msra.mxu1 %v8168_v24  ;;  %v8204_v24 = vld [vmem:[#allocation5 + $0x60c] ss:$16 sps:$4 sm:$0xff]  }
 0x1bf   : > { %3597 = vmatprep.subr.bf16.mxu1 %v8179_v58 }
 0x1c0   : > { %2894 = vmatmul.mubr.bf16.gmra.mrb[24].mxu0 %v9541_v0  ;;  %3473 = vmatmul.mubr.bf16.gmra.mrb[56].mxu1 %v9353_v17 }
 0x1c1   : > { %2903 = vmatprep.mubr.bf16.mxu0 %v9546_v19  ;;  %3482 = vmatprep.mubr.bf16.mxu1 %v9356_v18  ;;  %v8192_v18 = vld [vmem:[#allocation5 + $0x5c8] ss:$16 sps:$4 sm:$0xff]  }
 0x1c2   : > { %3598 = vmatpush1.bf16.msra.mxu1 %v8177_v1  ;;  %v9577_v1 = vld [vmem:[%s9193_s12 + $0x1d0] ss:$28 sps:$4 sm:$0xff]  }
 0x1c3   : > { %v9554_v22 = vpop.f32.mrb[16].mxu1  ;;  %3599 = vmatprep.subr.bf16.mxu1 %v8185_v32 }
 0x1c4   : > { %v9556_v42 = vpop.f32.mrb[17].mxu1 }
 0x1c5   : > { %v9561_v31 = vpop.f32.mrb[18].mxu1 }
 0x1c6   : > { %v9566_v17 = vpop.f32.mrb[19].mxu1  ;;  %3600 = vmatpush1.bf16.msra.mxu1 %v8183_v21  ;;  %v9582_v21 = vld [vmem:[%s9193_s12 + $0x20c] ss:$28 sps:$4 sm:$0xff]  }
 0x1c7   : > { %3601 = vmatprep.subr.bf16.mxu1 %v8194_v25 }
 0x1c8   : > { %2904 = vmatmul.mubr.bf16.gmra.mrb[28].mxu0 %v9559_v45  ;;  %3483 = vmatmul.mubr.bf16.gmra.mrb[60].mxu1 %v9363_v26 }
 0x1c9   : > { %2913 = vmatprep.mubr.bf16.mxu0 %v9564_v36  ;;  %3492 = vmatprep.mubr.bf16.mxu1 %v9366_v28 }
 0x1ca   : > { %3602 = vmatpush1.bf16.msra.mxu1 %v8192_v18  ;;  %v9595_v18 = vld [vmem:[%s9193_s12 + $0x208] ss:$28 sps:$4 sm:$0xff]  }
 0x1cb   : > { %v9572_v50 = vpop.f32.mrb[20].mxu1  ;;  %3603 = vmatprep.subr.bf16.mxu1 %v8200_v37 }
 0x1cc   : > { %v9574_v58 = vpop.f32.mrb[21].mxu1 }
 0x1cd   : > { %10585 = vst [vmem:[#allocation15_spill] sm:$0xff] %v9574_v58  ;;  %v9579_v32 = vpop.f32.mrb[22].mxu1  ;;  %v8244_v58 = vld [vmem:[#allocation7 + $0x24] ss:$8 sps:$4 sm:$0xff]  }
 0x1ce   : > { %10586 = vst [vmem:[#allocation16_spill] sm:$0xff] %v9579_v32  ;;  %v9584_v26 = vpop.f32.mrb[23].mxu1  ;;  %3604 = vmatpush1.bf16.msra.mxu1 %v8198_v57  ;;  %v9600_v57 = vld [vmem:[%s9193_s12 + $0x244] ss:$28 sps:$4 sm:$0xff]   ;;  %v8212_v32 = vld [vmem:[#allocation5 + $0x648] ss:$16 sps:$4 sm:$0xff]  }
 0x1cf   : > { %10587 = vst [vmem:[#allocation17_spill] sm:$0xff] %v9584_v26  ;;  %3766 = vmatprep.subr.bf16.mxu1 %v8204_v24  ;;  %v9681_v26 = vld [vmem:[%s9193_s12 + $0x50] ss:$28 sps:$4 sm:$0xff]  }
 0x1d0   : > { %2914 = vmatmul.mubr.bf16.gmra.mrb[32].mxu0 %v9577_v1  ;;  %3493 = vmatmul.mubr.bf16.gmra.mrb[64].mxu1 %v9373_v54 }
 0x1d1   : > { %2923 = vmatprep.mubr.bf16.mxu0 %v9582_v21  ;;  %3502 = vmatprep.mubr.bf16.mxu1 %v9376_v62 }
 0x1d3   : > { %v9590_v28 = vpop.f32.mrb[24].mxu1 }
 0x1d4   : > { %10588 = vst [vmem:[#allocation18_spill] sm:$0xff] %v9590_v28  ;;  %v9592_v25 = vpop.f32.mrb[25].mxu1 }
 0x1d5   : > { %10589 = vst [vmem:[#allocation19_spill] sm:$0xff] %v9592_v25  ;;  %v9597_v37 = vpop.f32.mrb[26].mxu1  ;;  %v9613_v25 = vld [vmem:[%s9193_s12 + $0x240] ss:$28 sps:$4 sm:$0xff]  }
 0x1d6   : > { %10590 = vst [vmem:[#allocation20_spill] sm:$0xff] %v9597_v37  ;;  %v9602_v24 = vpop.f32.mrb[27].mxu1 }
 0x1d7   : > { %10591 = vst [vmem:[#allocation21_spill] sm:$0xff] %v9602_v24  ;;  %v9618_v24 = vld [vmem:[%s9193_s12 + $0x27c] ss:$28 sps:$4 sm:$0xff]  }
 0x1d8   : > { %2924 = vmatmul.mubr.bf16.gmra.mrb[36].mxu0 %v9595_v18  ;;  %3503 = vmatmul.mubr.bf16.gmra.mrb[68].mxu1 %v9383_v41  ;;  %v9627_v41 = vld [vmem:[%s9193_s12 + $0x278] ss:$28 sps:$4 sm:$0xff]  }
 0x1d9   : > { %2933 = vmatprep.mubr.bf16.mxu0 %v9600_v57  ;;  %3512 = vmatprep.mubr.bf16.mxu1 %v9386_v43  ;;  %v9630_v43 = vld [vmem:[%s9193_s12 + $0x2b4] ss:$28 sps:$4 sm:$0xff]  }
 0x1db   : > { %v9608_v54 = vpop.f32.mrb[28].mxu1 }
 0x1dc   : > { %10592 = vst [vmem:[#allocation22_spill] sm:$0xff] %v9608_v54  ;;  %v9610_v62 = vpop.f32.mrb[29].mxu1  ;;  %v8214_v54 = vld [vmem:[#allocation5 + $0x64c] ss:$16 sps:$4 sm:$0xff]  }
 0x1dd   : > { %10593 = vst [vmem:[#allocation23_spill] sm:$0xff] %v9610_v62  ;;  %v9615_v37 = vpop.f32.mrb[30].mxu1  ;;  %v8231_v62 = vld [vmem:[#allocation7] ss:$8 sps:$4 sm:$0xff]  }
 0x1de   : > { %10594 = vst [vmem:[#allocation24_spill] sm:$0xff] %v9615_v37  ;;  %v9620_v28 = vpop.f32.mrb[31].mxu1  ;;  %v9650_v37 = vld [vmem:[%s9193_s12 + $0x324] ss:$28 sps:$4 sm:$0xff]  }
 0x1df   : > { %10595 = vst [vmem:[#allocation25_spill] sm:$0xff] %v9620_v28  ;;  %v9637_v28 = vld [vmem:[%s9193_s12 + $0x2b0] ss:$28 sps:$4 sm:$0xff]  }
 0x1e0   : > { %2934 = vmatmul.mubr.bf16.gmra.mrb[40].mxu0 %v9613_v25  ;;  %3513 = vmatmul.mubr.bf16.gmra.mrb[72].mxu1 %v9393_v59  ;;  %v8233_v59 = vld [vmem:[#allocation7 + $0x4] ss:$8 sps:$4 sm:$0xff]  }
 0x1e1   : > { %2943 = vmatprep.mubr.bf16.mxu0 %v9618_v24  ;;  %3522 = vmatprep.mubr.bf16.mxu1 %v9396_v2  ;;  %v9640_v2 = vld [vmem:[%s9193_s12 + $0x2ec] ss:$28 sps:$4 sm:$0xff]  }
 0x1e2   : > { %4803 = vmatprep.subr.bf16.mxu0 %v8233_v59  ;;  %v8202_v59 = vld [vmem:[#allocation5 + $0x608] ss:$16 sps:$4 sm:$0xff]  }
 0x1e8   : > { %2944 = vmatmul.mubr.bf16.gmra.mrb[44].mxu0 %v9627_v41  ;;  %3523 = vmatmul.mubr.bf16.gmra.mrb[76].mxu1 %v9403_v52  ;;  %v9647_v52 = vld [vmem:[%s9193_s12 + $0x2e8] ss:$28 sps:$4 sm:$0xff]  }
 0x1e9   : > { %2953 = vmatprep.mubr.bf16.mxu0 %v9630_v43  ;;  %3532 = vmatprep.mubr.bf16.mxu1 %v9406_v53  ;;  %v9657_v53 = vld [vmem:[%s9193_s12 + $0x320] ss:$28 sps:$4 sm:$0xff]  }
 0x1f0   : > { %2954 = vmatmul.mubr.bf16.gmra.mrb[48].mxu0 %v9637_v28  ;;  %3533 = vmatmul.mubr.bf16.gmra.mrb[80].mxu1 %v9413_v15  ;;  %v9660_v15 = vld [vmem:[%s9193_s12 + $0x35c] ss:$28 sps:$4 sm:$0xff]  }
 0x1f1   : > { %2963 = vmatprep.mubr.bf16.mxu0 %v9640_v2  ;;  %3542 = vmatprep.mubr.bf16.mxu1 %v9416_v60  ;;  %v9667_v60 = vld [vmem:[%s9193_s12 + $0x358] ss:$28 sps:$4 sm:$0xff]  }
 0x1f8   : > { %2964 = vmatmul.mubr.bf16.gmra.mrb[52].mxu0 %v9647_v52  ;;  %3543 = vmatmul.mubr.bf16.gmra.mrb[84].mxu1 %v9423_v3  ;;  %v10567_v3 = vmov 0  }
 0x1f9   : > { %2973 = vmatprep.mubr.bf16.mxu0 %v9650_v37  ;;  %3552 = vmatprep.mubr.bf16.mxu1 %v9426_v4  ;;  %v9674_v4 = vld [vmem:[%s9193_s12 + $0x18] ss:$28 sps:$4 sm:$0xff]  }
 0x200   : > { %2974 = vmatmul.mubr.bf16.gmra.mrb[56].mxu0 %v9657_v53  ;;  %3553 = vmatmul.mubr.bf16.gmra.mrb[88].mxu1 %v9433_v20  ;;  %v8209_v20 = vld [vmem:[#allocation5 + $0x62c] ss:$16 sps:$4 sm:$0xff]  }
 0x201   : > { %2983 = vmatprep.mubr.bf16.mxu0 %v9660_v15  ;;  %3562 = vmatprep.mubr.bf16.mxu1 %v9436_v27  ;;  %v8240_v27 = vld [vmem:[#allocation7 + $0x14] ss:$8 sps:$4 sm:$0xff]  }
 0x208   : > { %2984 = vmatmul.mubr.bf16.gmra.mrb[60].mxu0 %v9667_v60  ;;  %3563 = vmatmul.mubr.bf16.gmra.mrb[92].mxu1 %v9443_v12  ;;  %v8207_v12 = vld [vmem:[#allocation5 + $0x628] ss:$16 sps:$4 sm:$0xff]  }
 0x209   : > { %3026 = vmatprep.mubr.bf16.mxu0 %v10567_v3  ;;  %3605 = vmatprep.mubr.bf16.mxu1 %v9446_v14  ;;  %v8238_v14 = vld [vmem:[#allocation7 + $0x10] ss:$8 sps:$4 sm:$0xff]  }
 0x210   : > { %3027 = vmatmul.mubr.bf16.vlgmr.msra.gmra.mrb[0].mxu0 %v9674_v4  ;;  %3606 = vmatmul.mubr.bf16.vlgmr.msra.gmra.mrb[32].mxu1 %v9453_v13  ;;  %v8219_v13 = vld [vmem:[#allocation5 + $0x66c] ss:$16 sps:$4 sm:$0xff]  }
 0x211   : > { %3767 = vmatpush1.bf16.msra.mxu1 %v8202_v59  ;;  %3036 = vmatprep.mubr.bf16.mxu0 %v10567_v3  ;;  %v8242_v59 = vld [vmem:[#allocation7 + $0x20] ss:$8 sps:$4 sm:$0xff]  }
 0x212   : > { %3615 = vmatprep.mubr.bf16.mxu1 %v9456_v40  ;;  %3768 = vmatprep.subr.bf16.mxu1 %v8209_v20  ;;  %v8251_v40 = vld [vmem:[#allocation7 + $0x34] ss:$8 sps:$4 sm:$0xff]  }
 0x213   : > { %4804 = vmatpush1.bf16.msra.mxu0 %v8231_v62  ;;  %v8217_v62 = vld [vmem:[#allocation5 + $0x668] ss:$16 sps:$4 sm:$0xff]   ;;  %v8224_v20 = vld [vmem:[#allocation5 + $0x68c] ss:$16 sps:$4 sm:$0xff]  }
 0x214   : > { %4805 = vmatprep.subr.bf16.mxu0 %v8240_v27  ;;  %v9688_v27 = vld [vmem:[%s9193_s12 + $0x88] ss:$28 sps:$4 sm:$0xff]  }
 0x215   : > { %3769 = vmatpush1.bf16.msra.mxu1 %v8207_v12  ;;  %v8222_v12 = vld [vmem:[#allocation5 + $0x688] ss:$16 sps:$4 sm:$0xff]  }
 0x216   : > { %3770 = vmatprep.subr.bf16.mxu1 %v8214_v54  ;;  %v8249_v54 = vld [vmem:[#allocation7 + $0x30] ss:$8 sps:$4 sm:$0xff]  }
 0x217   : > { %4806 = vmatpush1.bf16.msra.mxu0 %v8238_v14  ;;  %v8255_v14 = vld [vmem:[#allocation7 + $0x44] ss:$8 sps:$4 sm:$0xff]  }
 0x218   : > { %3037 = vmatmul.mubr.bf16.gmra.mrb[4].mxu0 %v9681_v26  ;;  %3616 = vmatmul.mubr.bf16.gmra.mrb[36].mxu1 %v9463_v46  ;;  %v8229_v46 = vld [vmem:[#allocation5 + $0x6ac] ss:$16 sps:$4 sm:$0xff]  }
 0x219   : > { %3046 = vmatprep.mubr.bf16.mxu0 %v10567_v3  ;;  %3625 = vmatprep.mubr.bf16.mxu1 %v9466_v30  ;;  %v8253_v3 = vld [vmem:[#allocation7 + $0x40] ss:$8 sps:$4 sm:$0xff]   ;;  %v8258_v30 = vld [vmem:[#allocation7 + $0x54] ss:$8 sps:$4 sm:$0xff]  }
 0x21a   : > { %3771 = vmatpush1.bf16.msra.mxu1 %v8212_v32  ;;  %4807 = vmatprep.subr.bf16.mxu0 %v8244_v58  ;;  %v10596_v58 = vmov 0   ;;  %v8227_v32 = vld [vmem:[#allocation5 + $0x6a8] ss:$16 sps:$4 sm:$0xff]  }
 0x21b   : > { %3772 = vmatprep.subr.bf16.mxu1 %v8219_v13  ;;  %4808 = vmatpush1.bf16.msra.mxu0 %v8242_v59  ;;  %v8237_v13 = vld [vmem:[#allocation5 + $0x6cc] ss:$16 sps:$4 sm:$0xff]   ;;  %v8256_v59 = vld [vmem:[#allocation7 + $0x50] ss:$8 sps:$4 sm:$0xff]  }
 0x21c   : > { %4809 = vmatprep.subr.bf16.mxu0 %v8251_v40  ;;  %v9695_v40 = vld [vmem:[%s9193_s12 + $0xc0] ss:$28 sps:$4 sm:$0xff]  }
 0x21e   : > { %3773 = vmatpush1.bf16.msra.mxu1 %v8217_v62  ;;  %v8235_v62 = vld [vmem:[#allocation5 + $0x6c8] ss:$16 sps:$4 sm:$0xff]  }
 0x21f   : > { %3774 = vmatprep.subr.bf16.mxu1 %v8224_v20  ;;  %4810 = vmatpush1.bf16.msra.mxu0 %v8249_v54  ;;  %v8261_v20 = vld [vmem:[#allocation7 + $0x64] ss:$8 sps:$4 sm:$0xff]   ;;  %v8259_v54 = vld [vmem:[#allocation7 + $0x60] ss:$8 sps:$4 sm:$0xff]  }
 0x220   : > { %3047 = vmatmul.mubr.bf16.gmra.mrb[8].mxu0 %v9688_v27  ;;  %3626 = vmatmul.mubr.bf16.gmra.mrb[40].mxu1 %v9473_v39  ;;  %v8248_v39 = vld [vmem:[#allocation5 + $0x6ec] ss:$16 sps:$4 sm:$0xff]  }
 0x221   : > { %3056 = vmatprep.mubr.bf16.mxu0 %v10596_v58  ;;  %3635 = vmatprep.mubr.bf16.mxu1 %v9476_v48  ;;  %v8264_v48 = vld [vmem:[#allocation7 + $0x74] ss:$8 sps:$4 sm:$0xff]  }
 0x222   : > { %3775 = vmatpush1.bf16.msra.mxu1 %v8222_v12  ;;  %4811 = vmatprep.subr.bf16.mxu0 %v8255_v14  ;;  %v8262_v12 = vld [vmem:[#allocation7 + $0x70] ss:$8 sps:$4 sm:$0xff]  }
 0x223   : > { %3776 = vmatprep.subr.bf16.mxu1 %v8229_v46  ;;  %4812 = vmatpush1.bf16.msra.mxu0 %v8253_v3  ;;  %v8246_v3 = vld [vmem:[#allocation5 + $0x6e8] ss:$16 sps:$4 sm:$0xff]   ;;  %v8267_v46 = vld [vmem:[#allocation7 + $0x84] ss:$8 sps:$4 sm:$0xff]  }
 0x224   : > { %4813 = vmatprep.subr.bf16.mxu0 %v8258_v30  ;;  %v9702_v14 = vld [vmem:[%s9193_s12 + $0xf8] ss:$28 sps:$4 sm:$0xff]   ;;  %v8265_v30 = vld [vmem:[#allocation7 + $0x80] ss:$8 sps:$4 sm:$0xff]  }
 0x226   : > { %3777 = vmatpush1.bf16.msra.mxu1 %v8227_v32  ;;  %v9709_v32 = vld [vmem:[%s9193_s12 + $0x130] ss:$28 sps:$4 sm:$0xff]  }
 0x227   : > { %3778 = vmatprep.subr.bf16.mxu1 %v8237_v13  ;;  %4814 = vmatpush1.bf16.msra.mxu0 %v8256_v59  ;;  %v8273_v13 = vld [vmem:[#allocation7 + $0xa4] ss:$8 sps:$4 sm:$0xff]   ;;  %v8276_v59 = vld [vmem:[#allocation7 + $0xb4] ss:$8 sps:$4 sm:$0xff]  }
 0x228   : > { %3057 = vmatmul.mubr.bf16.gmra.mrb[12].mxu0 %v9695_v40  ;;  %3636 = vmatmul.mubr.bf16.gmra.mrb[44].mxu1 %v9487_v8  ;;  %v8270_v8 = vld [vmem:[#allocation7 + $0x94] ss:$8 sps:$4 sm:$0xff]  }
 0x229   : > { %3066 = vmatprep.mubr.bf16.mxu0 %v10596_v58  ;;  %3645 = vmatprep.mubr.bf16.mxu1 %v9492_v33  ;;  %v8268_v33 = vld [vmem:[#allocation7 + $0x90] ss:$8 sps:$4 sm:$0xff]  }
 0x22a   : > { %3779 = vmatpush1.bf16.msra.mxu1 %v8235_v62  ;;  %4815 = vmatprep.subr.bf16.mxu0 %v8261_v20  ;;  %v9723_v62 = vld [vmem:[%s9193_s12 + $0x1a0] ss:$28 sps:$4 sm:$0xff]   ;;  %v9730_v20 = vld [vmem:[%s9193_s12 + $0x1d8] ss:$28 sps:$4 sm:$0xff]  }
 0x22b   : > { %3780 = vmatprep.subr.bf16.mxu1 %v8248_v39  ;;  %4816 = vmatpush1.bf16.msra.mxu0 %v8259_v54  ;;  %v8285_v39 = vld [vmem:[#allocation7 + $0xe4] ss:$8 sps:$4 sm:$0xff]   ;;  %v9748_v54 = vld [vmem:[%s9193_s12 + $0x280] ss:$28 sps:$4 sm:$0xff]  }
 0x22c   : > { %4817 = vmatprep.subr.bf16.mxu0 %v8264_v48 }
 0x22e   : > { %3781 = vmatpush1.bf16.msra.mxu1 %v8246_v3 }
 0x22f   : > { %4818 = vmatpush1.bf16.msra.mxu0 %v8262_v12 }
 0x230   : > { %3067 = vmatmul.mubr.bf16.gmra.mrb[16].mxu0 %v9702_v14  ;;  %3646 = vmatmul.mubr.bf16.gmra.mrb[48].mxu1 %v9505_v29  ;;  %v8271_v29 = vld [vmem:[#allocation7 + $0xa0] ss:$8 sps:$4 sm:$0xff]  }
 0x231   : > { %3076 = vmatprep.mubr.bf16.mxu0 %v10596_v58  ;;  %3655 = vmatprep.mubr.bf16.mxu1 %v9510_v44  ;;  %v9716_v44 = vld [vmem:[%s9193_s12 + $0x168] ss:$28 sps:$4 sm:$0xff]  }
 0x232   : > { %4819 = vmatprep.subr.bf16.mxu0 %v8267_v46 }
 0x233   : > { %4820 = vmatpush1.bf16.msra.mxu0 %v8265_v30 }
 0x234   : > { %4821 = vmatprep.subr.bf16.mxu0 %v8270_v8 }
 0x237   : > { %4822 = vmatpush1.bf16.msra.mxu0 %v8268_v33 }
 0x238   : > { %3077 = vmatmul.mubr.bf16.gmra.mrb[20].mxu0 %v9709_v32  ;;  %3656 = vmatmul.mubr.bf16.gmra.mrb[52].mxu1 %v9523_v38  ;;  %v8274_v38 = vld [vmem:[#allocation7 + $0xb0] ss:$8 sps:$4 sm:$0xff]  }
 0x239   : > { %3086 = vmatprep.mubr.bf16.mxu0 %v10596_v58  ;;  %3665 = vmatprep.mubr.bf16.mxu1 %v9528_v23  ;;  %v8277_v23 = vld [vmem:[#allocation7 + $0xc0] ss:$8 sps:$4 sm:$0xff]  }
 0x23a   : > { %4823 = vmatprep.subr.bf16.mxu0 %v8273_v13 }
 0x23b   : > { %4824 = vmatpush1.bf16.msra.mxu0 %v8271_v29 }
 0x23c   : > { %4825 = vmatprep.subr.bf16.mxu0 %v8276_v59 }
 0x23f   : > { %4826 = vmatpush1.bf16.msra.mxu0 %v8274_v38 }
 0x240   : > { %3087 = vmatmul.mubr.bf16.gmra.mrb[24].mxu0 %v9716_v44  ;;  %3666 = vmatmul.mubr.bf16.gmra.mrb[56].mxu1 %v9541_v0  ;;  %v8279_v0 = vld [vmem:[#allocation7 + $0xc4] ss:$8 sps:$4 sm:$0xff]  }
 0x241   : > { %3096 = vmatprep.mubr.bf16.mxu0 %v10596_v58  ;;  %3675 = vmatprep.mubr.bf16.mxu1 %v9546_v19  ;;  %v8280_v19 = vld [vmem:[#allocation7 + $0xd0] ss:$8 sps:$4 sm:$0xff]  }
 0x242   : > { %4827 = vmatprep.subr.bf16.mxu0 %v8279_v0 }
 0x243   : > { %4828 = vmatpush1.bf16.msra.mxu0 %v8277_v23 }
 0x248   : > { %3097 = vmatmul.mubr.bf16.gmra.mrb[28].mxu0 %v9723_v62  ;;  %3676 = vmatmul.mubr.bf16.gmra.mrb[60].mxu1 %v9559_v45  ;;  %v8282_v45 = vld [vmem:[#allocation7 + $0xd4] ss:$8 sps:$4 sm:$0xff]  }
 0x249   : > { %3106 = vmatprep.mubr.bf16.mxu0 %v10596_v58  ;;  %3685 = vmatprep.mubr.bf16.mxu1 %v9564_v36  ;;  %v9737_v36 = vld [vmem:[%s9193_s12 + $0x210] ss:$28 sps:$4 sm:$0xff]  }
 0x24a   : > { %4829 = vmatprep.subr.bf16.mxu0 %v8282_v45 }
 0x24b   : > { %4830 = vmatpush1.bf16.msra.mxu0 %v8280_v19  ;;  %v8289_v19 = vld [vmem:[#allocation7 + $0x100] ss:$8 sps:$4 sm:$0xff]  }
 0x24c   : > { %4831 = vmatprep.subr.bf16.mxu0 %v8285_v39 }
 0x250   : > { %3107 = vmatmul.mubr.bf16.gmra.mrb[32].mxu0 %v9730_v20  ;;  %3686 = vmatmul.mubr.bf16.gmra.mrb[64].mxu1 %v9577_v1  ;;  %v8283_v1 = vld [vmem:[#allocation7 + $0xe0] ss:$8 sps:$4 sm:$0xff]  }
 0x251   : > { %3116 = vmatprep.mubr.bf16.mxu0 %v10596_v58  ;;  %3695 = vmatprep.mubr.bf16.mxu1 %v9582_v21  ;;  %v8226_v21 = vld [vmem:[%s9193_s12 + $0x248] ss:$28 sps:$4 sm:$0xff]  }
 0x252   : > { %4832 = vmatpush1.bf16.msra.mxu0 %v8283_v1  ;;  %v8294_v1 = vld [vmem:[#allocation7 + $0x114] ss:$8 sps:$4 sm:$0xff]  }
 0x258   : > { %3117 = vmatmul.mubr.bf16.gmra.mrb[36].mxu0 %v9737_v36  ;;  %3696 = vmatmul.mubr.bf16.gmra.mrb[68].mxu1 %v9595_v18  ;;  %v8288_v18 = vld [vmem:[#allocation7 + $0xf4] ss:$8 sps:$4 sm:$0xff]  }
 0x259   : > { %3126 = vmatprep.mubr.bf16.mxu0 %v10596_v58  ;;  %3705 = vmatprep.mubr.bf16.mxu1 %v9600_v57  ;;  %v8286_v57 = vld [vmem:[#allocation7 + $0xf0] ss:$8 sps:$4 sm:$0xff]  }
 0x25a   : > { %4833 = vmatprep.subr.bf16.mxu0 %v8288_v18 }
 0x25b   : > { %4834 = vmatpush1.bf16.msra.mxu0 %v8286_v57 }
 0x260   : > { %3127 = vmatmul.mubr.bf16.gmra.mrb[40].mxu0 %v8226_v21  ;;  %3706 = vmatmul.mubr.bf16.gmra.mrb[72].mxu1 %v9613_v25  ;;  %v9755_v25 = vld [vmem:[%s9193_s12 + $0x2b8] ss:$28 sps:$4 sm:$0xff]  }
 0x261   : > { %3136 = vmatprep.mubr.bf16.mxu0 %v10596_v58  ;;  %3715 = vmatprep.mubr.bf16.mxu1 %v9618_v24  ;;  %v8291_v24 = vld [vmem:[#allocation7 + $0x104] ss:$8 sps:$4 sm:$0xff]  }
 0x262   : > { %4996 = vmatprep.subr.bf16.mxu0 %v8291_v24 }
 0x268   : > { %3137 = vmatmul.mubr.bf16.gmra.mrb[44].mxu0 %v9748_v54  ;;  %3716 = vmatmul.mubr.bf16.gmra.mrb[76].mxu1 %v9627_v41  ;;  %v9762_v41 = vld [vmem:[%s9193_s12 + $0x2f0] ss:$28 sps:$4 sm:$0xff]  }
 0x269   : > { %3146 = vmatprep.mubr.bf16.mxu0 %v10596_v58  ;;  %3725 = vmatprep.mubr.bf16.mxu1 %v9630_v43  ;;  %v9769_v43 = vld [vmem:[%s9193_s12 + $0x328] ss:$28 sps:$4 sm:$0xff]  }
 0x270   : > { %3147 = vmatmul.mubr.bf16.gmra.mrb[48].mxu0 %v9755_v25  ;;  %3726 = vmatmul.mubr.bf16.gmra.mrb[80].mxu1 %v9637_v28  ;;  %v9776_v28 = vld [vmem:[%s9193_s12 + $0x360] ss:$28 sps:$4 sm:$0xff]   ;;  %s6222_s12 = scalar_lea.sflag [#allocation4], %s9189_s21 }
 0x271   : > { %3156 = vmatprep.mubr.bf16.mxu0 %v10596_v58  ;;  %3735 = vmatprep.mubr.bf16.mxu1 %v9640_v2 }
 0x278   : > { %3157 = vmatmul.mubr.bf16.gmra.mrb[52].mxu0 %v9762_v41  ;;  %3736 = vmatmul.mubr.bf16.gmra.mrb[84].mxu1 %v9647_v52  ;;  %v9807_v52 = vld [vmem:[%s10558_s2] sm:$0xf] }
 0x279   : > { %3166 = vmatprep.mubr.bf16.mxu0 %v10596_v58  ;;  %3745 = vmatprep.mubr.bf16.mxu1 %v9650_v37 }
 0x280   : > { %3167 = vmatmul.mubr.bf16.gmra.mrb[56].mxu0 %v9769_v43  ;;  %3746 = vmatmul.mubr.bf16.gmra.mrb[88].mxu1 %v9657_v53 }
 0x281   : > { %3176 = vmatprep.mubr.bf16.mxu0 %v10596_v58  ;;  %3755 = vmatprep.mubr.bf16.mxu1 %v9660_v15 }
 0x288   : > { %3177 = vmatmul.mubr.bf16.gmra.mrb[60].mxu0 %v9776_v28  ;;  %3756 = vmatmul.mubr.bf16.gmra.mrb[92].mxu1 %v9667_v60 }
 0x289   : > { %3798 = vmatprep.mubr.bf16.mxu1 %v10596_v58 }
 0x290   : > { %3799 = vmatmul.mubr.bf16.vlgmr.msra.gmra.mrb[32].mxu1 %v9674_v4 }
 0x291   : > { %3808 = vmatprep.mubr.bf16.mxu1 %v10596_v58 }
 0x298   : > { %3809 = vmatmul.mubr.bf16.gmra.mrb[36].mxu1 %v9681_v26  ;;  %v699_v26 = vlaneseq }
 0x299   : > { %3818 = vmatprep.mubr.bf16.mxu1 %v10596_v58 }
 0x29a   : > { %v9801_v37 = vshrl.u32 %v699_v26, 7  ;;  %v8292_v26 = vld [vmem:[#allocation7 + $0x110] ss:$8 sps:$4 sm:$0xff]  }
 0x29c   : > { %v701_v2 = vsub.s32 0, %v9801_v37  ;;  %v705_v53 = vsub.s32 1, %v9801_v37 }
 0x29e   : > { %v9814_v15 = vrot.slane %v9807_v52, %v701_v2  ;;  %v9819_v60 = vrot.slane %v9807_v52, %v705_v53 }
 0x2a0   : > { %3819 = vmatmul.mubr.bf16.gmra.mrb[40].mxu1 %v9688_v27 }
 0x2a1   : > { %3828 = vmatprep.mubr.bf16.mxu1 %v10596_v58 }
 0x2a8   : > { %3829 = vmatmul.mubr.bf16.gmra.mrb[44].mxu1 %v9695_v40 }
 0x2a9   : > { %3838 = vmatprep.mubr.bf16.mxu1 %v10596_v58 }
 0x2b0   : > { %3839 = vmatmul.mubr.bf16.gmra.mrb[48].mxu1 %v9702_v14 }
 0x2b1   : > { %3848 = vmatprep.mubr.bf16.mxu1 %v10596_v58 }
 0x2b8   : > { %3849 = vmatmul.mubr.bf16.gmra.mrb[52].mxu1 %v9709_v32 }
 0x2b9   : > { %3858 = vmatprep.mubr.bf16.mxu1 %v10596_v58 }
 0x2c0   : > { %3859 = vmatmul.mubr.bf16.gmra.mrb[56].mxu1 %v9716_v44 }
 0x2c1   : > { %3868 = vmatprep.mubr.bf16.mxu1 %v10596_v58 }
 0x2c8   : > { %3869 = vmatmul.mubr.bf16.gmra.mrb[60].mxu1 %v9723_v62 }
 0x2c9   : > { %3878 = vmatprep.mubr.bf16.mxu1 %v10596_v58 }
 0x2d0   : > { %3879 = vmatmul.mubr.bf16.gmra.mrb[64].mxu1 %v9730_v20 }
 0x2d1   : > { %3888 = vmatprep.mubr.bf16.mxu1 %v10596_v58 }
 0x2d8   : > { %3889 = vmatmul.mubr.bf16.gmra.mrb[68].mxu1 %v9737_v36 }
 0x2d9   : > { %3898 = vmatprep.mubr.bf16.mxu1 %v10596_v58 }
 0x2e0   : > { %3899 = vmatmul.mubr.bf16.gmra.mrb[72].mxu1 %v8226_v21 }
 0x2e1   : > { %3908 = vmatprep.mubr.bf16.mxu1 %v10596_v58 }
 0x2e3   : > { %v3028_v4 = vpop.f32.mrb[0].mxu0 }
 0x2e4   : > { %v7014_v27 = vadd.f32 %v3028_v4, %v9814_v15  ;;  %v3030_v40 = vpop.f32.mrb[1].mxu0 }
 0x2e5   : > { %v7015_v48 = vadd.f32 %v3030_v40, %v9819_v60  ;;  %v3032_v3 = vpop.f32.mrb[2].mxu0 }
 0x2e6   : > { %v4087_v12 = vmul.f32 0.01, %v7014_v27  ;;  %v7016_v14 = vadd.f32 %v3032_v3, %v9814_v15  ;;  %v3034_v46 = vpop.f32.mrb[3].mxu0  ;;  %vm3959_vm0 = vcmp.ge.f32.partialorder %v7014_v27, 0.0 }
 0x2e7   : > { %v4088_v30 = vmul.f32 0.01, %v7015_v48  ;;  %v7017_v8 = vadd.f32 %v3034_v46, %v9819_v60  ;;  %vm3960_vm1 = vcmp.ge.f32.partialorder %v7015_v48, 0.0 }
 0x2e8   : > { %vm3963_vm2 = vcmp.ge.f32.partialorder %v7016_v14, 0.0  ;;  %v4091_v33 = vmul.f32 0.01, %v7016_v14  ;;  %3909 = vmatmul.mubr.bf16.gmra.mrb[76].mxu1 %v9748_v54  ;;  %v4215_v29 = vsel %vm3959_vm0, %v7014_v27, %v4087_v12  ;;  %v8297_v27 = vld [vmem:[#allocation7 + $0x124] ss:$8 sps:$4 sm:$0xff]  }
 0x2e9   : > { %vm3964_vm3 = vcmp.ge.f32.partialorder %v7017_v8, 0.0  ;;  %v4092_v32 = vmul.f32 0.01, %v7017_v8  ;;  %3918 = vmatprep.mubr.bf16.mxu1 %v10596_v58  ;;  %v4216_v59 = vsel %vm3960_vm1, %v7015_v48, %v4088_v30 }
 0x2ea   : > { %v4219_v13 = vsel %vm3963_vm2, %v7016_v14, %v4091_v33 }
 0x2eb   : > { %v4343_v44 = vpack.c.bf16 %v4219_v13, %v4215_v29  ;;  %v3038_v38 = vpop.f32.mrb[4].mxu0  ;;  %v4220_v62 = vsel %vm3964_vm3, %v7017_v8, %v4092_v32  ;;  %v8300_v13 = vld [vmem:[#allocation7 + $0x134] ss:$8 sps:$4 sm:$0xff]  }
 0x2ec   : > { %v7018_v23 = vadd.f32 %v3038_v38, %v9814_v15  ;;  %v3040_v0 = vpop.f32.mrb[5].mxu0  ;;  %v4344_v20 = vpack.c.bf16 %v4220_v62, %v4216_v59 }
 0x2ed   : > { %v7019_v45 = vadd.f32 %v3040_v0, %v9819_v60  ;;  %v3042_v36 = vpop.f32.mrb[6].mxu0 }
 0x2ee   : > { %v4095_v39 = vmul.f32 0.01, %v7018_v23  ;;  %v7020_v21 = vadd.f32 %v3042_v36, %v9814_v15  ;;  %v3044_v54 = vpop.f32.mrb[7].mxu0  ;;  %4835 = vmatprep.mubr.bf16.mxu0 %v4344_v20  ;;  %vm3967_vm4 = vcmp.ge.f32.partialorder %v7018_v23, 0.0  ;;  %v8298_v20 = vld [vmem:[#allocation7 + $0x130] ss:$8 sps:$4 sm:$0xff]  }
 0x2ef   : > { %v4096_v18 = vmul.f32 0.01, %v7019_v45  ;;  %v7021_v57 = vadd.f32 %v3044_v54, %v9819_v60  ;;  %4836 = vmatmul.mubr.bf16.vlgmr.msra.gmra.mrb[64].mxu0 %v4343_v44  ;;  %vm3968_vm5 = vcmp.ge.f32.partialorder %v7019_v45, 0.0 }
 0x2f0   : > { %vm3971_vm6 = vcmp.ge.f32.partialorder %v7020_v21, 0.0  ;;  %v4099_v24 = vmul.f32 0.01, %v7020_v21  ;;  %3919 = vmatmul.mubr.bf16.gmra.mrb[80].mxu1 %v9755_v25  ;;  %4997 = vmatpush1.bf16.msra.mxu0 %v8289_v19  ;;  %v4223_v40 = vsel %vm3967_vm4, %v7018_v23, %v4095_v39  ;;  %v8295_v25 = vld [vmem:[#allocation7 + $0x120] ss:$8 sps:$4 sm:$0xff]  }
 0x2f1   : > { %vm3972_vm7 = vcmp.ge.f32.partialorder %v7021_v57, 0.0  ;;  %v4100_v4 = vmul.f32 0.01, %v7021_v57  ;;  %3928 = vmatprep.mubr.bf16.mxu1 %v10596_v58  ;;  %4998 = vmatprep.subr.bf16.mxu0 %v8294_v1  ;;  %v4224_v12 = vsel %vm3968_vm5, %v7019_v45, %v4096_v18  ;;  %v8303_v45 = vld [vmem:[#allocation7 + $0x144] ss:$8 sps:$4 sm:$0xff]  }
 0x2f2   : > { %v4227_v48 = vsel %vm3971_vm6, %v7020_v21, %v4099_v24 }
 0x2f3   : > { %v3048_v3 = vpop.f32.mrb[8].mxu0  ;;  %v4228_v14 = vsel %vm3972_vm7, %v7021_v57, %v4100_v4  ;;  %v4347_v46 = vpack.c.bf16 %v4227_v48, %v4223_v40  ;;  %v8306_v40 = vld [vmem:[#allocation7 + $0x154] ss:$8 sps:$4 sm:$0xff]  }
 0x2f4   : > { %v7022_v30 = vadd.f32 %v3048_v3, %v9814_v15  ;;  %v3050_v8 = vpop.f32.mrb[9].mxu0  ;;  %v4348_v33 = vpack.c.bf16 %v4228_v14, %v4224_v12  ;;  %4999 = vmatpush1.bf16.msra.mxu0 %v8292_v26 }
 0x2f5   : > { %v7023_v32 = vadd.f32 %v3050_v8, %v9819_v60  ;;  %v3052_v29 = vpop.f32.mrb[10].mxu0  ;;  %5000 = vmatprep.subr.bf16.mxu0 %v8297_v27  ;;  %v8304_v8 = vld [vmem:[#allocation7 + $0x150] ss:$8 sps:$4 sm:$0xff]  }
 0x2f6   : > { %v4103_v44 = vmul.f32 0.01, %v7022_v30  ;;  %v7024_v38 = vadd.f32 %v3052_v29, %v9814_v15  ;;  %v3054_v59 = vpop.f32.mrb[11].mxu0  ;;  %4845 = vmatprep.mubr.bf16.mxu0 %v4348_v33  ;;  %vm3975_vm8 = vcmp.ge.f32.partialorder %v7022_v30, 0.0 }
 0x2f7   : > { %v4104_v62 = vmul.f32 0.01, %v7023_v32  ;;  %v7025_v23 = vadd.f32 %v3054_v59, %v9819_v60  ;;  %4846 = vmatmul.mubr.bf16.gmra.mrb[68].mxu0 %v4347_v46  ;;  %vm3976_vm9 = vcmp.ge.f32.partialorder %v7023_v32, 0.0 }
 0x2f8   : > { %vm3979_vm10 = vcmp.ge.f32.partialorder %v7024_v38, 0.0  ;;  %v4107_v0 = vmul.f32 0.01, %v7024_v38  ;;  %3929 = vmatmul.mubr.bf16.gmra.mrb[84].mxu1 %v9762_v41  ;;  %5001 = vmatpush1.bf16.msra.mxu0 %v8295_v25  ;;  %v4231_v36 = vsel %vm3975_vm8, %v7022_v30, %v4103_v44  ;;  %v8301_v41 = vld [vmem:[#allocation7 + $0x140] ss:$8 sps:$4 sm:$0xff]  }
 0x2f9   : > { %vm3980_vm11 = vcmp.ge.f32.partialorder %v7025_v23, 0.0  ;;  %v4108_v19 = vmul.f32 0.01, %v7025_v23  ;;  %3938 = vmatprep.mubr.bf16.mxu1 %v10596_v58  ;;  %5002 = vmatprep.subr.bf16.mxu0 %v8300_v13  ;;  %v4232_v21 = vsel %vm3976_vm9, %v7023_v32, %v4104_v62  ;;  %v8309_v25 = vld [vmem:[#allocation7 + $0x164] ss:$8 sps:$4 sm:$0xff]  }
 0x2fa   : > { %v4235_v1 = vsel %vm3979_vm10, %v7024_v38, %v4107_v0 }
 0x2fb   : > { %v3058_v39 = vpop.f32.mrb[12].mxu0  ;;  %v4236_v54 = vsel %vm3980_vm11, %v7025_v23, %v4108_v19  ;;  %v4351_v18 = vpack.c.bf16 %v4235_v1, %v4231_v36 }
 0x2fc   : > { %v7026_v57 = vadd.f32 %v3058_v39, %v9814_v15  ;;  %v3060_v24 = vpop.f32.mrb[13].mxu0  ;;  %v4352_v26 = vpack.c.bf16 %v4236_v54, %v4232_v21  ;;  %5003 = vmatpush1.bf16.msra.mxu0 %v8298_v20 }
 0x2fd   : > { %v7027_v4 = vadd.f32 %v3060_v24, %v9819_v60  ;;  %v3062_v27 = vpop.f32.mrb[14].mxu0  ;;  %5004 = vmatprep.subr.bf16.mxu0 %v8303_v45  ;;  %v8312_v45 = vld [vmem:[#allocation7 + $0x174] ss:$8 sps:$4 sm:$0xff]   ;;  %v8315_v24 = vld [vmem:[#allocation7 + $0x184] ss:$8 sps:$4 sm:$0xff]  }
 0x2fe   : > { %v4111_v48 = vmul.f32 0.01, %v7026_v57  ;;  %v7028_v3 = vadd.f32 %v3062_v27, %v9814_v15  ;;  %v3064_v12 = vpop.f32.mrb[15].mxu0  ;;  %4855 = vmatprep.mubr.bf16.mxu0 %v4352_v26  ;;  %vm3983_vm12 = vcmp.ge.f32.partialorder %v7026_v57, 0.0 }
 0x2ff   : > { %v4112_v14 = vmul.f32 0.01, %v7027_v4  ;;  %v7029_v46 = vadd.f32 %v3064_v12, %v9819_v60  ;;  %4856 = vmatmul.mubr.bf16.gmra.mrb[72].mxu0 %v4351_v18  ;;  %vm3984_vm13 = vcmp.ge.f32.partialorder %v7027_v4, 0.0  ;;  %v8310_v18 = vld [vmem:[#allocation7 + $0x170] ss:$8 sps:$4 sm:$0xff]  }
 0x300   : > { %vm3987_vm14 = vcmp.ge.f32.partialorder %v7028_v3, 0.0  ;;  %v4115_v30 = vmul.f32 0.01, %v7028_v3  ;;  %3939 = vmatmul.mubr.bf16.gmra.mrb[88].mxu1 %v9769_v43  ;;  %5005 = vmatpush1.bf16.msra.mxu0 %v8301_v41  ;;  %v4239_v32 = vsel %vm3983_vm12, %v7026_v57, %v4111_v48  ;;  %v8307_v43 = vld [vmem:[#allocation7 + $0x160] ss:$8 sps:$4 sm:$0xff]  }
 0x301   : > { %vm3988_vm15 = vcmp.ge.f32.partialorder %v7029_v46, 0.0  ;;  %v4116_v33 = vmul.f32 0.01, %v7029_v46  ;;  %3948 = vmatprep.mubr.bf16.mxu1 %v10596_v58  ;;  %5006 = vmatprep.subr.bf16.mxu0 %v8306_v40  ;;  %v4240_v44 = vsel %vm3984_vm13, %v7027_v4, %v4112_v14 }
 0x302   : > { %v4243_v29 = vsel %vm3987_vm14, %v7028_v3, %v4115_v30 }
 0x303   : > { %v3068_v13 = vpop.f32.mrb[16].mxu0  ;;  %v4244_v38 = vsel %vm3988_vm15, %v7029_v46, %v4116_v33  ;;  %v4355_v59 = vpack.c.bf16 %v4243_v29, %v4239_v32  ;;  %v8313_v46 = vld [vmem:[#allocation7 + $0x180] ss:$8 sps:$4 sm:$0xff]  }
 0x304   : > { %v7030_v62 = vadd.f32 %v3068_v13, %v9814_v15  ;;  %v3070_v23 = vpop.f32.mrb[17].mxu0  ;;  %v4356_v0 = vpack.c.bf16 %v4244_v38, %v4240_v44  ;;  %5007 = vmatpush1.bf16.msra.mxu0 %v8304_v8  ;;  %v8318_v8 = vld [vmem:[#allocation7 + $0x194] ss:$8 sps:$4 sm:$0xff]   ;;  %v8316_v38 = vld [vmem:[#allocation7 + $0x190] ss:$8 sps:$4 sm:$0xff]  }
 0x305   : > { %v7031_v20 = vadd.f32 %v3070_v23, %v9819_v60  ;;  %v3072_v19 = vpop.f32.mrb[18].mxu0  ;;  %5008 = vmatprep.subr.bf16.mxu0 %v8309_v25 }
 0x306   : > { %v4119_v58 = vmul.f32 0.01, %v7030_v62  ;;  %v7032_v36 = vadd.f32 %v3072_v19, %v9814_v15  ;;  %v3074_v1 = vpop.f32.mrb[19].mxu0  ;;  %4865 = vmatprep.mubr.bf16.mxu0 %v4356_v0  ;;  %vm3991_vm0 = vcmp.ge.f32.partialorder %v7030_v62, 0.0 }
 0x307   : > { %v4120_v39 = vmul.f32 0.01, %v7031_v20  ;;  %v7033_v21 = vadd.f32 %v3074_v1, %v9819_v60  ;;  %4866 = vmatmul.mubr.bf16.gmra.mrb[76].mxu0 %v4355_v59  ;;  %vm3992_vm1 = vcmp.ge.f32.partialorder %v7031_v20, 0.0 }
 0x308   : > { %vm3995_vm2 = vcmp.ge.f32.partialorder %v7032_v36, 0.0  ;;  %v4123_v54 = vmul.f32 0.01, %v7032_v36  ;;  %3949 = vmatmul.mubr.bf16.gmra.mrb[92].mxu1 %v9776_v28  ;;  %5009 = vmatpush1.bf16.msra.mxu0 %v8307_v43  ;;  %v4247_v26 = vsel %vm3991_vm0, %v7030_v62, %v4119_v58  ;;  %v8321_v62 = vld [vmem:[#allocation7 + $0x1a4] ss:$8 sps:$4 sm:$0xff]  }
 0x309   : > { %vm3996_vm3 = vcmp.ge.f32.partialorder %v7033_v21, 0.0  ;;  %v4124_v57 = vmul.f32 0.01, %v7033_v21  ;;  %5010 = vmatprep.subr.bf16.mxu0 %v8312_v45  ;;  %v4248_v27 = vsel %vm3992_vm1, %v7031_v20, %v4120_v39  ;;  %v8319_v39 = vld [vmem:[#allocation7 + $0x1a0] ss:$8 sps:$4 sm:$0xff]  }
 0x30a   : > { %v4251_v41 = vsel %vm3995_vm2, %v7032_v36, %v4123_v54 }
 0x30b   : > { %v3078_v4 = vpop.f32.mrb[20].mxu0  ;;  %v4252_v40 = vsel %vm3996_vm3, %v7033_v21, %v4124_v57  ;;  %v4359_v48 = vpack.c.bf16 %v4251_v41, %v4247_v26 }
 0x30c   : > { %v7034_v3 = vadd.f32 %v3078_v4, %v9814_v15  ;;  %v3080_v12 = vpop.f32.mrb[21].mxu0  ;;  %v4360_v14 = vpack.c.bf16 %v4252_v40, %v4248_v27  ;;  %5011 = vmatpush1.bf16.msra.mxu0 %v8310_v18  ;;  %v8324_v18 = vld [vmem:[#allocation7 + $0x1b4] ss:$8 sps:$4 sm:$0xff]   ;;  %v8322_v40 = vld [vmem:[#allocation7 + $0x1b0] ss:$8 sps:$4 sm:$0xff]  }
 0x30d   : > { %v7035_v28 = vadd.f32 %v3080_v12, %v9819_v60  ;;  %v3082_v30 = vpop.f32.mrb[22].mxu0  ;;  %5012 = vmatprep.subr.bf16.mxu0 %v8315_v24 }
 0x30e   : > { %v4127_v33 = vmul.f32 0.01, %v7034_v3  ;;  %v7036_v25 = vadd.f32 %v3082_v30, %v9814_v15  ;;  %v3084_v32 = vpop.f32.mrb[23].mxu0  ;;  %4875 = vmatprep.mubr.bf16.mxu0 %v4360_v14  ;;  %vm3999_vm4 = vcmp.ge.f32.partialorder %v7034_v3, 0.0 }
 0x30f   : > { %v4128_v29 = vmul.f32 0.01, %v7035_v28  ;;  %v7037_v13 = vadd.f32 %v3084_v32, %v9819_v60  ;;  %4876 = vmatmul.mubr.bf16.gmra.mrb[80].mxu0 %v4359_v48  ;;  %vm4000_vm5 = vcmp.ge.f32.partialorder %v7035_v28, 0.0 }
 0x310   : > { %vm4003_vm6 = vcmp.ge.f32.partialorder %v7036_v25, 0.0  ;;  %v4131_v44 = vmul.f32 0.01, %v7036_v25  ;;  %5013 = vmatpush1.bf16.msra.mxu0 %v8313_v46  ;;  %v4255_v23 = vsel %vm3999_vm4, %v7034_v3, %v4127_v33  ;;  %v8327_v3 = vld [vmem:[#allocation7 + $0x1c4] ss:$8 sps:$4 sm:$0xff]  }
 0x311   : > { %vm4004_vm7 = vcmp.ge.f32.partialorder %v7037_v13, 0.0  ;;  %v4132_v59 = vmul.f32 0.01, %v7037_v13  ;;  %5014 = vmatprep.subr.bf16.mxu0 %v8318_v8  ;;  %v4256_v20 = vsel %vm4000_vm5, %v7035_v28, %v4128_v29  ;;  %v8325_v29 = vld [vmem:[#allocation7 + $0x1c0] ss:$8 sps:$4 sm:$0xff]  }
 0x312   : > { %v4259_v0 = vsel %vm4003_vm6, %v7036_v25, %v4131_v44 }
 0x313   : > { %v3088_v43 = vpop.f32.mrb[24].mxu0  ;;  %v4260_v19 = vsel %vm4004_vm7, %v7037_v13, %v4132_v59  ;;  %v4363_v45 = vpack.c.bf16 %v4259_v0, %v4255_v23 }
 0x314   : > { %v7038_v58 = vadd.f32 %v3088_v43, %v9814_v15  ;;  %v3090_v36 = vpop.f32.mrb[25].mxu0  ;;  %v4364_v1 = vpack.c.bf16 %v4260_v19, %v4256_v20  ;;  %5015 = vmatpush1.bf16.msra.mxu0 %v8316_v38  ;;  %v8330_v38 = vld [vmem:[#allocation7 + $0x1d4] ss:$8 sps:$4 sm:$0xff]   ;;  %v8328_v19 = vld [vmem:[#allocation7 + $0x1d0] ss:$8 sps:$4 sm:$0xff]  }
 0x315   : > { %v7039_v21 = vadd.f32 %v3090_v36, %v9819_v60  ;;  %v3092_v54 = vpop.f32.mrb[26].mxu0  ;;  %5016 = vmatprep.subr.bf16.mxu0 %v8321_v62  ;;  %v2530_v36 = vadd.f32 %v9482_v7, %v9814_v15  ;;  %v2536_v7 = vadd.f32 %v9494_v10, %v9819_v60  ;;  %v2540_v10 = vadd.f32 %v9500_v35, %v9814_v15 }
 0x316   : > { %v4135_v57 = vmul.f32 0.01, %v7038_v58  ;;  %v7040_v24 = vadd.f32 %v3092_v54, %v9814_v15  ;;  %v3094_v26 = vpop.f32.mrb[27].mxu0  ;;  %4885 = vmatprep.mubr.bf16.mxu0 %v4364_v1  ;;  %vm4007_vm8 = vcmp.ge.f32.partialorder %v7038_v58, 0.0 }
 0x317   : > { %v4136_v41 = vmul.f32 0.01, %v7039_v21  ;;  %v7041_v4 = vadd.f32 %v3094_v26, %v9819_v60  ;;  %4886 = vmatmul.mubr.bf16.gmra.mrb[84].mxu0 %v4363_v45  ;;  %vm4008_vm9 = vcmp.ge.f32.partialorder %v7039_v21, 0.0  ;;  %v2534_v26 = vadd.f32 %v9489_v9, %v9814_v15 }
 0x318   : > { %vm4011_vm10 = vcmp.ge.f32.partialorder %v7040_v24, 0.0  ;;  %v4139_v27 = vmul.f32 0.01, %v7040_v24  ;;  %5017 = vmatpush1.bf16.msra.mxu0 %v8319_v39  ;;  %v4263_v12 = vsel %vm4007_vm8, %v7038_v58, %v4135_v57  ;;  %v8333_v58 = vld [vmem:[#allocation7 + $0x1e4] ss:$8 sps:$4 sm:$0xff]  }
 0x319   : > { %vm4012_vm11 = vcmp.ge.f32.partialorder %v7041_v4, 0.0  ;;  %v4140_v48 = vmul.f32 0.01, %v7041_v4  ;;  %5018 = vmatprep.subr.bf16.mxu0 %v8324_v18  ;;  %v4264_v28 = vsel %vm4008_vm9, %v7039_v21, %v4136_v41  ;;  %v2532_v21 = vadd.f32 %v9484_v6, %v9819_v60 }
 0x31a   : > { %v4267_v14 = vsel %vm4011_vm10, %v7040_v24, %v4139_v27 }
 0x31b   : > { %v3098_v46 = vpop.f32.mrb[28].mxu0  ;;  %v4268_v30 = vsel %vm4012_vm11, %v7041_v4, %v4140_v48  ;;  %v4367_v8 = vpack.c.bf16 %v4267_v14, %v4263_v12  ;;  %v8336_v12 = vld [vmem:[#allocation7 + $0x1f4] ss:$8 sps:$4 sm:$0xff]  }
 0x31c   : > { %v7042_v33 = vadd.f32 %v3098_v46, %v9814_v15  ;;  %v3100_v25 = vpop.f32.mrb[29].mxu0  ;;  %v4368_v32 = vpack.c.bf16 %v4268_v30, %v4264_v28  ;;  %5019 = vmatpush1.bf16.msra.mxu0 %v8322_v40  ;;  %v8331_v40 = vld [vmem:[#allocation7 + $0x1e0] ss:$8 sps:$4 sm:$0xff]  }
 0x31d   : > { %v7043_v13 = vadd.f32 %v3100_v25, %v9819_v60  ;;  %v3102_v44 = vpop.f32.mrb[30].mxu0  ;;  %5020 = vmatprep.subr.bf16.mxu0 %v8327_v3 }
 0x31e   : > { %v4143_v59 = vmul.f32 0.01, %v7042_v33  ;;  %v7044_v62 = vadd.f32 %v3102_v44, %v9814_v15  ;;  %v3104_v23 = vpop.f32.mrb[31].mxu0  ;;  %4895 = vmatprep.mubr.bf16.mxu0 %v4368_v32  ;;  %vm4015_vm12 = vcmp.ge.f32.partialorder %v7042_v33, 0.0 }
 0x31f   : > { %v4144_v0 = vmul.f32 0.01, %v7043_v13  ;;  %v7045_v43 = vadd.f32 %v3104_v23, %v9819_v60  ;;  %4896 = vmatmul.mubr.bf16.gmra.mrb[88].mxu0 %v4367_v8  ;;  %vm4016_vm13 = vcmp.ge.f32.partialorder %v7043_v13, 0.0  ;;  %v8334_v8 = vld [vmem:[#allocation7 + $0x1f0] ss:$8 sps:$4 sm:$0xff]  }
 0x320   : > { %vm4019_vm14 = vcmp.ge.f32.partialorder %v7044_v62, 0.0  ;;  %v4147_v20 = vmul.f32 0.01, %v7044_v62  ;;  %5021 = vmatpush1.bf16.msra.mxu0 %v8325_v29  ;;  %v4271_v1 = vsel %vm4015_vm12, %v7042_v33, %v4143_v59  ;;  %v2542_v29 = vadd.f32 %v9502_v5, %v9819_v60 }
 0x321   : > { %vm4020_vm15 = vcmp.ge.f32.partialorder %v7045_v43, 0.0  ;;  %v4148_v45 = vmul.f32 0.01, %v7045_v43  ;;  %5022 = vmatprep.subr.bf16.mxu0 %v8330_v38  ;;  %v4272_v18 = vsel %vm4016_vm13, %v7043_v13, %v4144_v0 }
 0x322   : > { %v4275_v39 = vsel %vm4019_vm14, %v7044_v62, %v4147_v20  ;;  %v2544_v62 = vadd.f32 %v9507_v55, %v9814_v15  ;;  %v2546_v20 = vadd.f32 %v9512_v11, %v9819_v60 }
 0x323   : > { %v3108_v54 = vpop.f32.mrb[32].mxu0  ;;  %v4276_v57 = vsel %vm4020_vm15, %v7045_v43, %v4148_v45  ;;  %v4371_v24 = vpack.c.bf16 %v4275_v39, %v4271_v1 }
 0x324   : > { %v7047_v41 = vadd.f32 %v3108_v54, %v2530_v36  ;;  %v3110_v4 = vpop.f32.mrb[33].mxu0  ;;  %v4372_v27 = vpack.c.bf16 %v4276_v57, %v4272_v18  ;;  %5023 = vmatpush1.bf16.msra.mxu0 %v8328_v19  ;;  %v2552_v18 = vadd.f32 %v9520_v47, %v9819_v60 }
 0x325   : > { %v7049_v48 = vadd.f32 %v3110_v4, %v2532_v21  ;;  %v3112_v3 = vpop.f32.mrb[34].mxu0  ;;  %5024 = vmatprep.subr.bf16.mxu0 %v8333_v58  ;;  %v2550_v21 = vadd.f32 %v9518_v16, %v9814_v15  ;;  %v2554_v4 = vadd.f32 %v9525_v49, %v9814_v15 }
 0x326   : > { %v4151_v6 = vmul.f32 0.01, %v7047_v41  ;;  %v7051_v14 = vadd.f32 %v3112_v3, %v2534_v26  ;;  %v3114_v46 = vpop.f32.mrb[35].mxu0  ;;  %4905 = vmatprep.mubr.bf16.mxu0 %v4372_v27  ;;  %vm4023_vm0 = vcmp.ge.f32.partialorder %v7047_v41, 0.0 }
 0x327   : > { %v4152_v28 = vmul.f32 0.01, %v7049_v48  ;;  %v7053_v30 = vadd.f32 %v3114_v46, %v2536_v7  ;;  %4906 = vmatmul.mubr.bf16.gmra.mrb[92].mxu0 %v4371_v24  ;;  %vm4024_vm1 = vcmp.ge.f32.partialorder %v7049_v48, 0.0 }
 0x328   : > { %vm4027_vm2 = vcmp.ge.f32.partialorder %v7051_v14, 0.0  ;;  %v4155_v9 = vmul.f32 0.01, %v7051_v14  ;;  %5025 = vmatpush1.bf16.msra.mxu0 %v8331_v40  ;;  %v4279_v25 = vsel %vm4023_vm0, %v7047_v41, %v4151_v6 }
 0x329   : > { %vm4028_vm3 = vcmp.ge.f32.partialorder %v7053_v30, 0.0  ;;  %v4156_v33 = vmul.f32 0.01, %v7053_v30  ;;  %5026 = vmatprep.subr.bf16.mxu0 %v8336_v12  ;;  %v4280_v44 = vsel %vm4024_vm1, %v7049_v48, %v4152_v28  ;;  %v2556_v48 = vadd.f32 %v9530_v56, %v9819_v60 }
 0x32a   : > { %v4283_v32 = vsel %vm4027_vm2, %v7051_v14, %v4155_v9 }
 0x32b   : > { %v3118_v13 = vpop.f32.mrb[36].mxu0  ;;  %v4284_v38 = vsel %vm4028_vm3, %v7053_v30, %v4156_v33  ;;  %v4375_v59 = vpack.c.bf16 %v4283_v32, %v4279_v25  ;;  %v2560_v30 = vadd.f32 %v9536_v51, %v9814_v15 }
 0x32c   : > { %v7055_v23 = vadd.f32 %v3118_v13, %v2540_v10  ;;  %v3120_v0 = vpop.f32.mrb[37].mxu0  ;;  %v4376_v43 = vpack.c.bf16 %v4284_v38, %v4280_v44  ;;  %5027 = vmatpush1.bf16.msra.mxu0 %v8334_v8  ;;  %v2562_v8 = vadd.f32 %v9538_v61, %v9819_v60 }
 0x32d   : > { %v7057_v35 = vadd.f32 %v3120_v0, %v2542_v29  ;;  %v3122_v19 = vpop.f32.mrb[38].mxu0  ;;  %v2564_v29 = vadd.f32 %v9543_v34, %v9814_v15 }
 0x32e   : > { %v4159_v45 = vmul.f32 0.01, %v7055_v23  ;;  %v7059_v58 = vadd.f32 %v3122_v19, %v2544_v62  ;;  %v3124_v36 = vpop.f32.mrb[39].mxu0  ;;  %4915 = vmatprep.mubr.bf16.mxu0 %v4376_v43  ;;  %vm4031_vm4 = vcmp.ge.f32.partialorder %v7055_v23, 0.0  ;;  %v2570_v19 = vadd.f32 %v9554_v22, %v9814_v15 }
 0x32f   : > { %v4160_v5 = vmul.f32 0.01, %v7057_v35  ;;  %v7061_v1 = vadd.f32 %v3124_v36, %v2546_v20  ;;  %4916 = vmatmul.mubr.bf16.gmra.mrb[96].mxu0 %v4375_v59  ;;  %vm4032_vm5 = vcmp.ge.f32.partialorder %v7057_v35, 0.0  ;;  %v2566_v59 = vadd.f32 %v9548_v63, %v9819_v60 }
 0x330   : > { %vm4035_vm6 = vcmp.ge.f32.partialorder %v7059_v58, 0.0  ;;  %v4163_v55 = vmul.f32 0.01, %v7059_v58  ;;  %v4287_v54 = vsel %vm4031_vm4, %v7055_v23, %v4159_v45 }
 0x331   : > { %vm4036_vm7 = vcmp.ge.f32.partialorder %v7061_v1, 0.0  ;;  %v4164_v39 = vmul.f32 0.01, %v7061_v1  ;;  %v4288_v24 = vsel %vm4032_vm5, %v7057_v35, %v4160_v5 }
 0x332   : > { %v4291_v11 = vsel %vm4035_vm6, %v7059_v58, %v4163_v55  ;;  %v2572_v58 = vadd.f32 %v9556_v42, %v9819_v60 }
 0x333   : > { %v3128_v57 = vpop.f32.mrb[40].mxu0  ;;  %v4292_v26 = vsel %vm4036_vm7, %v7061_v1, %v4164_v39  ;;  %v4379_v41 = vpack.c.bf16 %v4291_v11, %v4287_v54  ;;  %v2574_v39 = vadd.f32 %v9561_v31, %v9814_v15 }
 0x334   : > { %v7063_v27 = vadd.f32 %v3128_v57, %v2550_v21  ;;  %v3130_v40 = vpop.f32.mrb[41].mxu0  ;;  %v4380_v7 = vpack.c.bf16 %v4292_v26, %v4288_v24 }
 0x335   : > { %v7065_v3 = vadd.f32 %v3130_v40, %v2552_v18  ;;  %v3132_v16 = vpop.f32.mrb[42].mxu0  ;;  %v2576_v18 = vadd.f32 %v9566_v17, %v9819_v60  ;;  %v2580_v40 = vadd.f32 %v9572_v50, %v9814_v15 }
 0x336   : > { %v4167_v12 = vmul.f32 0.01, %v7063_v27  ;;  %v7067_v6 = vadd.f32 %v3132_v16, %v2554_v4  ;;  %v3134_v14 = vpop.f32.mrb[43].mxu0  ;;  %4925 = vmatprep.mubr.bf16.mxu0 %v4380_v7  ;;  %vm4039_vm8 = vcmp.ge.f32.partialorder %v7063_v27, 0.0 }
 0x337   : > { %v4168_v47 = vmul.f32 0.01, %v7065_v3  ;;  %v7069_v46 = vadd.f32 %v3134_v14, %v2556_v48  ;;  %4926 = vmatmul.mubr.bf16.gmra.mrb[100].mxu0 %v4379_v41  ;;  %vm4040_vm9 = vcmp.ge.f32.partialorder %v7065_v3, 0.0  ;;  %v10597_v48 = vld [vmem:[#allocation15_spill] sm:$0xff] }
 0x338   : > { %vm4043_vm10 = vcmp.ge.f32.partialorder %v7067_v6, 0.0  ;;  %v4171_v28 = vmul.f32 0.01, %v7067_v6  ;;  %v4295_v9 = vsel %vm4039_vm8, %v7063_v27, %v4167_v12 }
 0x339   : > { %vm4044_vm11 = vcmp.ge.f32.partialorder %v7069_v46, 0.0  ;;  %v4172_v49 = vmul.f32 0.01, %v7069_v46  ;;  %v4296_v10 = vsel %vm4040_vm9, %v7065_v3, %v4168_v47  ;;  %v2582_v3 = vadd.f32 %v10597_v48, %v9819_v60  ;;  %v10598_v47 = vld [vmem:[#allocation16_spill] sm:$0xff] }
 0x33a   : > { %v4299_v56 = vsel %vm4043_vm10, %v7067_v6, %v4171_v28  ;;  %v10606_v48 = vld [vmem:[#allocation24_spill] sm:$0xff] }
 0x33b   : > { %v3138_v33 = vpop.f32.mrb[44].mxu0  ;;  %v4300_v25 = vsel %vm4044_vm11, %v7069_v46, %v4172_v49  ;;  %v4383_v32 = vpack.c.bf16 %v4299_v56, %v4295_v9  ;;  %v2584_v46 = vadd.f32 %v10598_v47, %v9814_v15  ;;  %v10599_v9 = vld [vmem:[#allocation17_spill] sm:$0xff] }
 0x33c   : > { %v7071_v13 = vadd.f32 %v3138_v33, %v2560_v30  ;;  %v3140_v44 = vpop.f32.mrb[45].mxu0  ;;  %v4384_v38 = vpack.c.bf16 %v4300_v25, %v4296_v10  ;;  %v2586_v56 = vadd.f32 %v10599_v9, %v9819_v60  ;;  %v10607_v47 = vld [vmem:[#allocation25_spill] sm:$0xff] }
 0x33d   : > { %v7073_v62 = vadd.f32 %v3140_v44, %v2562_v8  ;;  %v3142_v51 = vpop.f32.mrb[46].mxu0 }
 0x33e   : > { %v4175_v23 = vmul.f32 0.01, %v7071_v13  ;;  %v7075_v0 = vadd.f32 %v3142_v51, %v2564_v29  ;;  %v3144_v43 = vpop.f32.mrb[47].mxu0  ;;  %4935 = vmatprep.mubr.bf16.mxu0 %v4384_v38  ;;  %vm4047_vm12 = vcmp.ge.f32.partialorder %v7071_v13, 0.0  ;;  %v10600_v38 = vld [vmem:[#allocation18_spill] sm:$0xff] }
 0x33f   : > { %v4176_v61 = vmul.f32 0.01, %v7073_v62  ;;  %v7077_v20 = vadd.f32 %v3144_v43, %v2566_v59  ;;  %4936 = vmatmul.mubr.bf16.gmra.mrb[104].mxu0 %v4383_v32  ;;  %vm4048_vm13 = vcmp.ge.f32.partialorder %v7073_v62, 0.0  ;;  %v2590_v59 = vadd.f32 %v10600_v38, %v9814_v15 }
 0x340   : > { %vm4051_vm14 = vcmp.ge.f32.partialorder %v7075_v0, 0.0  ;;  %v4179_v35 = vmul.f32 0.01, %v7075_v0  ;;  %v4303_v45 = vsel %vm4047_vm12, %v7071_v13, %v4175_v23  ;;  %v10601_v23 = vld [vmem:[#allocation19_spill] sm:$0xff] }
 0x341   : > { %vm4052_vm15 = vcmp.ge.f32.partialorder %v7077_v20, 0.0  ;;  %v4180_v34 = vmul.f32 0.01, %v7077_v20  ;;  %v4304_v5 = vsel %vm4048_vm13, %v7073_v62, %v4176_v61 }
 0x342   : > { %v4307_v63 = vsel %vm4051_vm14, %v7075_v0, %v4179_v35  ;;  %v2592_v0 = vadd.f32 %v10601_v23, %v9819_v60 }
 0x343   : > { %v3148_v36 = vpop.f32.mrb[48].mxu0  ;;  %v4308_v1 = vsel %vm4052_vm15, %v7077_v20, %v4180_v34  ;;  %v4387_v55 = vpack.c.bf16 %v4307_v63, %v4303_v45  ;;  %v10602_v34 = vld [vmem:[#allocation20_spill] sm:$0xff] }
 0x344   : > { %v7079_v21 = vadd.f32 %v3148_v36, %v2570_v19  ;;  %v3150_v54 = vpop.f32.mrb[49].mxu0  ;;  %v4388_v11 = vpack.c.bf16 %v4308_v1, %v4304_v5  ;;  %v2594_v19 = vadd.f32 %v10602_v34, %v9814_v15  ;;  %v10603_v36 = vld [vmem:[#allocation21_spill] sm:$0xff] }
 0x345   : > { %v7081_v57 = vadd.f32 %v3150_v54, %v2572_v58  ;;  %v3152_v22 = vpop.f32.mrb[50].mxu0  ;;  %v2596_v5 = vadd.f32 %v10603_v36, %v9819_v60 }
 0x346   : > { %v4183_v24 = vmul.f32 0.01, %v7079_v21  ;;  %v7083_v26 = vadd.f32 %v3152_v22, %v2574_v39  ;;  %v3154_v41 = vpop.f32.mrb[51].mxu0  ;;  %4945 = vmatprep.mubr.bf16.mxu0 %v4388_v11  ;;  %vm4055_vm0 = vcmp.ge.f32.partialorder %v7079_v21, 0.0 }
 0x347   : > { %v4184_v42 = vmul.f32 0.01, %v7081_v57  ;;  %v7085_v4 = vadd.f32 %v3154_v41, %v2576_v18  ;;  %4946 = vmatmul.mubr.bf16.gmra.mrb[108].mxu0 %v4387_v55  ;;  %vm4056_vm1 = vcmp.ge.f32.partialorder %v7081_v57, 0.0 }
 0x348   : > { %vm4059_vm2 = vcmp.ge.f32.partialorder %v7083_v26, 0.0  ;;  %v4187_v27 = vmul.f32 0.01, %v7083_v26  ;;  %v4311_v7 = vsel %vm4055_vm0, %v7079_v21, %v4183_v24  ;;  %v10604_v24 = vld [vmem:[#allocation22_spill] sm:$0xff] }
 0x349   : > { %vm4060_vm3 = vcmp.ge.f32.partialorder %v7085_v4, 0.0  ;;  %v4188_v31 = vmul.f32 0.01, %v7085_v4  ;;  %v4312_v12 = vsel %vm4056_vm1, %v7081_v57, %v4184_v42 }
 0x34a   : > { %v4315_v17 = vsel %vm4059_vm2, %v7083_v26, %v4187_v27  ;;  %v2600_v26 = vadd.f32 %v10604_v24, %v9814_v15 }
 0x34b   : > { %v3158_v16 = vpop.f32.mrb[52].mxu0  ;;  %v4316_v6 = vsel %vm4060_vm3, %v7085_v4, %v4188_v31  ;;  %v4391_v14 = vpack.c.bf16 %v4315_v17, %v4311_v7  ;;  %v10605_v4 = vld [vmem:[#allocation23_spill] sm:$0xff] }
 0x34c   : > { %v7087_v28 = vadd.f32 %v3158_v16, %v2580_v40  ;;  %v3160_v49 = vpop.f32.mrb[53].mxu0  ;;  %v4392_v30 = vpack.c.bf16 %v4316_v6, %v4312_v12  ;;  %v2602_v27 = vadd.f32 %v10605_v4, %v9819_v60 }
 0x34d   : > { %v7089_v8 = vadd.f32 %v3160_v49, %v2582_v3  ;;  %v3162_v50 = vpop.f32.mrb[54].mxu0  ;;  %v2604_v3 = vadd.f32 %v10606_v48, %v9814_v15 }
 0x34e   : > { %v4191_v33 = vmul.f32 0.01, %v7087_v28  ;;  %v7091_v10 = vadd.f32 %v3162_v50, %v2584_v46  ;;  %v3164_v25 = vpop.f32.mrb[55].mxu0  ;;  %4955 = vmatprep.mubr.bf16.mxu0 %v4392_v30  ;;  %vm4063_vm4 = vcmp.ge.f32.partialorder %v7087_v28, 0.0  ;;  %v2606_v46 = vadd.f32 %v10607_v47, %v9819_v60 }
 0x34f   : > { %v4192_v32 = vmul.f32 0.01, %v7089_v8  ;;  %v7093_v29 = vadd.f32 %v3164_v25, %v2586_v56  ;;  %4956 = vmatmul.mubr.bf16.gmra.mrb[112].mxu0 %v4391_v14  ;;  %vm4064_vm5 = vcmp.ge.f32.partialorder %v7089_v8, 0.0  ;;  %v709_v14 = vsub.s32 2, %v9801_v37 }
 0x350   : > { %vm4067_vm6 = vcmp.ge.f32.partialorder %v7091_v10, 0.0  ;;  %v4195_v13 = vmul.f32 0.01, %v7091_v10  ;;  %v4319_v62 = vsel %vm4063_vm4, %v7087_v28, %v4191_v33  ;;  %v713_v30 = vsub.s32 3, %v9801_v37 }
 0x351   : > { %vm4068_vm7 = vcmp.ge.f32.partialorder %v7093_v29, 0.0  ;;  %v4196_v44 = vmul.f32 0.01, %v7093_v29  ;;  %v4320_v61 = vsel %vm4064_vm5, %v7089_v8, %v4192_v32 }
 0x352   : > { %v4323_v51 = vsel %vm4067_vm6, %v7091_v10, %v4195_v13  ;;  %v9929_v10 = vrot.slane %v9807_v52, %v709_v14  ;;  %v9932_v25 = vrot.slane %v9807_v52, %v713_v30 }
 0x353   : > { %v3168_v43 = vpop.f32.mrb[56].mxu0  ;;  %v4324_v20 = vsel %vm4068_vm7, %v7093_v29, %v4196_v44  ;;  %v4395_v35 = vpack.c.bf16 %v4323_v51, %v4319_v62 }
 0x354   : > { %v7095_v45 = vadd.f32 %v3168_v43, %v2590_v59  ;;  %v3170_v63 = vpop.f32.mrb[57].mxu0  ;;  %v4396_v58 = vpack.c.bf16 %v4324_v20, %v4320_v61 }
 0x355   : > { %v7097_v1 = vadd.f32 %v3170_v63, %v2592_v0  ;;  %v3172_v55 = vpop.f32.mrb[58].mxu0  ;;  %v8339_v63 = vld [vmem:[#allocation8 + $0x48] sm:$0xff]  }
 0x356   : > { %v4199_v39 = vmul.f32 0.01, %v7095_v45  ;;  %v7099_v21 = vadd.f32 %v3172_v55, %v2594_v19  ;;  %v3174_v54 = vpop.f32.mrb[59].mxu0  ;;  %4965 = vmatprep.mubr.bf16.mxu0 %v4396_v58  ;;  %vm4071_vm8 = vcmp.ge.f32.partialorder %v7095_v45, 0.0  ;;  %v8337_v19 = vld [vmem:[#allocation8 + $0x40] sm:$0xff]   ;;  %v8340_v55 = vld [vmem:[#allocation8 + $0x8] sm:$0xff]  }
 0x357   : > { %v4200_v11 = vmul.f32 0.01, %v7097_v1  ;;  %v7101_v18 = vadd.f32 %v3174_v54, %v2596_v5  ;;  %4966 = vmatmul.mubr.bf16.gmra.mrb[116].mxu0 %v4395_v35  ;;  %vm4072_vm9 = vcmp.ge.f32.partialorder %v7097_v1, 0.0  ;;  %6870 = vmatprep.subr.bf16.mxu1 %v8337_v19 }
 0x358   : > { %vm4075_vm10 = vcmp.ge.f32.partialorder %v7099_v21, 0.0  ;;  %v4203_v57 = vmul.f32 0.01, %v7099_v21  ;;  %v4327_v41 = vsel %vm4071_vm8, %v7095_v45, %v4199_v39  ;;  %v8338_v45 = vld [vmem:[#allocation8] sm:$0xff]  }
 0x359   : > { %vm4076_vm11 = vcmp.ge.f32.partialorder %v7101_v18, 0.0  ;;  %v4204_v22 = vmul.f32 0.01, %v7101_v18  ;;  %v4328_v40 = vsel %vm4072_vm9, %v7097_v1, %v4200_v11  ;;  %6871 = vmatpush3.bf16.msra.mxu1 %v8338_v45 }
 0x35a   : > { %v4331_v42 = vsel %vm4075_vm10, %v7099_v21, %v4203_v57  ;;  %6872 = vmatprep.subr.bf16.mxu1 %v8339_v63 }
 0x35b   : > { %v3178_v31 = vpop.f32.mrb[60].mxu0  ;;  %v4332_v7 = vsel %vm4076_vm11, %v7101_v18, %v4204_v22  ;;  %v4399_v17 = vpack.c.bf16 %v4331_v42, %v4327_v41  ;;  %v8341_v18 = vld [vmem:[#allocation8 + $0x50] sm:$0xff]  }
 0x35c   : > { %v7103_v16 = vadd.f32 %v3178_v31, %v2600_v26  ;;  %v3180_v12 = vpop.f32.mrb[61].mxu0  ;;  %v4400_v6 = vpack.c.bf16 %v4332_v7, %v4328_v40  ;;  %v8342_v31 = vld [vmem:[#allocation8 + $0x10] sm:$0xff]  }
 0x35d   : > { %v7105_v28 = vadd.f32 %v3180_v12, %v2602_v27  ;;  %v3182_v49 = vpop.f32.mrb[62].mxu0  ;;  %6873 = vmatpush3.bf16.msra.mxu1 %v8340_v55 }
 0x35e   : > { %v4207_v9 = vmul.f32 0.01, %v7103_v16  ;;  %v7107_v56 = vadd.f32 %v3182_v49, %v2604_v3  ;;  %v3184_v8 = vpop.f32.mrb[63].mxu0  ;;  %4975 = vmatprep.mubr.bf16.mxu0 %v4400_v6  ;;  %vm4079_vm12 = vcmp.ge.f32.partialorder %v7103_v16, 0.0  ;;  %6874 = vmatprep.subr.bf16.mxu1 %v8341_v18  ;;  %v8344_v6 = vld [vmem:[#allocation8 + $0x18] sm:$0xff]   ;;  %v8345_v49 = vld [vmem:[#allocation8 + $0x60] sm:$0xff]  }
 0x35f   : > { %v4208_v50 = vmul.f32 0.01, %v7105_v28  ;;  %v7109_v33 = vadd.f32 %v3184_v8, %v2606_v46  ;;  %4976 = vmatmul.mubr.bf16.gmra.mrb[120].mxu0 %v4399_v17  ;;  %vm4080_vm13 = vcmp.ge.f32.partialorder %v7105_v28, 0.0  ;;  %v8343_v17 = vld [vmem:[#allocation8 + $0x58] sm:$0xff]  }
 0x360   : > { %vm4083_vm14 = vcmp.ge.f32.partialorder %v7107_v56, 0.0  ;;  %v4211_v15 = vmul.f32 0.01, %v7107_v56  ;;  %v4335_v32 = vsel %vm4079_vm12, %v7103_v16, %v4207_v9 }
 0x361   : > { %vm4084_vm15 = vcmp.ge.f32.partialorder %v7109_v33, 0.0  ;;  %v4212_v60 = vmul.f32 0.01, %v7109_v33  ;;  %v4336_v44 = vsel %vm4080_vm13, %v7105_v28, %v4208_v50  ;;  %6875 = vmatpush3.bf16.msra.mxu1 %v8342_v31 }
 0x362   : > { %v4339_v29 = vsel %vm4083_vm14, %v7107_v56, %v4211_v15  ;;  %6876 = vmatprep.subr.bf16.mxu1 %v8343_v17 }
 0x363   : > { %v3800_v13 = vpop.f32.mrb[32].mxu1  ;;  %v4340_v38 = vsel %vm4084_vm15, %v7109_v33, %v4212_v60  ;;  %v4403_v59 = vpack.c.bf16 %v4339_v29, %v4335_v32  ;;  %v8346_v32 = vld [vmem:[#allocation8 + $0x20] sm:$0xff]  }
 0x364   : > { %v7110_v62 = vadd.f32 %v3800_v13, %v9929_v10  ;;  %v3802_v51 = vpop.f32.mrb[33].mxu1  ;;  %v4404_v23 = vpack.c.bf16 %v4340_v38, %v4336_v44  ;;  %v8347_v44 = vld [vmem:[#allocation8 + $0x68] sm:$0xff]  }
 0x365   : > { %v7111_v0 = vadd.f32 %v3802_v51, %v9932_v25  ;;  %v3804_v43 = vpop.f32.mrb[34].mxu1  ;;  %6877 = vmatpush3.bf16.msra.mxu1 %v8344_v6 }
 0x366   : > { %v4089_v61 = vmul.f32 0.01, %v7110_v62  ;;  %v7112_v20 = vadd.f32 %v3804_v43, %v9929_v10  ;;  %v3806_v35 = vpop.f32.mrb[35].mxu1  ;;  %4985 = vmatprep.mubr.bf16.mxu0 %v4404_v23  ;;  %vm3961_vm0 = vcmp.ge.f32.partialorder %v7110_v62, 0.0  ;;  %6878 = vmatprep.subr.bf16.mxu1 %v8345_v49  ;;  %v8348_v23 = vld [vmem:[#allocation8 + $0x28] sm:$0xff]  }
 0x367   : > { %v4090_v52 = vmul.f32 0.01, %v7111_v0  ;;  %v7113_v34 = vadd.f32 %v3806_v35, %v9932_v25  ;;  %4986 = vmatmul.mubr.bf16.gmra.mrb[124].mxu0 %v4403_v59  ;;  %vm3962_vm1 = vcmp.ge.f32.partialorder %v7111_v0, 0.0 }
 0x368   : > { %vm3965_vm2 = vcmp.ge.f32.partialorder %v7112_v20, 0.0  ;;  %v4093_v58 = vmul.f32 0.01, %v7112_v20  ;;  %v4217_v5 = vsel %vm3961_vm0, %v7110_v62, %v4089_v61 }
 0x369   : > { %vm3966_vm3 = vcmp.ge.f32.partialorder %v7113_v34, 0.0  ;;  %v4094_v36 = vmul.f32 0.01, %v7113_v34  ;;  %v4218_v54 = vsel %vm3962_vm1, %v7111_v0, %v4090_v52  ;;  %6879 = vmatpush3.bf16.msra.mxu1 %v8346_v32 }
 0x36a   : > { %v4221_v1 = vsel %vm3965_vm2, %v7112_v20, %v4093_v58  ;;  %6880 = vmatprep.subr.bf16.mxu1 %v8347_v44 }
 0x36b   : > { %v4345_v39 = vpack.c.bf16 %v4221_v1, %v4217_v5  ;;  %v3810_v21 = vpop.f32.mrb[36].mxu1  ;;  %v4222_v11 = vsel %vm3966_vm3, %v7113_v34, %v4094_v36 }
 0x36c   : > { %v7114_v57 = vadd.f32 %v3810_v21, %v9929_v10  ;;  %v3812_v22 = vpop.f32.mrb[37].mxu1  ;;  %v4346_v24 = vpack.c.bf16 %v4222_v11, %v4218_v54 }
 0x36d   : > { %v7115_v26 = vadd.f32 %v3812_v22, %v9932_v25  ;;  %v3814_v41 = vpop.f32.mrb[38].mxu1  ;;  %6881 = vmatpush3.bf16.msra.mxu1 %v8348_v23 }
 0x36e   : > { %v4097_v42 = vmul.f32 0.01, %v7114_v57  ;;  %v7116_v4 = vadd.f32 %v3814_v41, %v9929_v10  ;;  %v3816_v27 = vpop.f32.mrb[39].mxu1  ;;  %5028 = vmatprep.mubr.bf16.mxu0 %v4346_v24  ;;  %vm3969_vm4 = vcmp.ge.f32.partialorder %v7114_v57, 0.0 }
 0x36f   : > { %v4098_v40 = vmul.f32 0.01, %v7115_v26  ;;  %v7117_v7 = vadd.f32 %v3816_v27, %v9932_v25  ;;  %5029 = vmatmul.mubr.bf16.vlgmr.msra.gmra.mrb[64].mxu0 %v4345_v39  ;;  %vm3970_vm5 = vcmp.ge.f32.partialorder %v7115_v26, 0.0 }
 0x370   : > { %vm3973_vm6 = vcmp.ge.f32.partialorder %v7116_v4, 0.0  ;;  %v4101_v48 = vmul.f32 0.01, %v7116_v4  ;;  %v4225_v16 = vsel %vm3969_vm4, %v7114_v57, %v4097_v42 }
 0x371   : > { %vm3974_vm7 = vcmp.ge.f32.partialorder %v7117_v7, 0.0  ;;  %v4102_v3 = vmul.f32 0.01, %v7117_v7  ;;  %v4226_v47 = vsel %vm3970_vm5, %v7115_v26, %v4098_v40 }
 0x372   : > { %v4229_v12 = vsel %vm3973_vm6, %v7116_v4, %v4101_v48 }
 0x373   : > { %v3820_v14 = vpop.f32.mrb[40].mxu1  ;;  %v4230_v46 = vsel %vm3974_vm7, %v7117_v7, %v4102_v3  ;;  %v4349_v28 = vpack.c.bf16 %v4229_v12, %v4225_v16 }
 0x374   : > { %v7118_v30 = vadd.f32 %v3820_v14, %v9929_v10  ;;  %v3822_v9 = vpop.f32.mrb[41].mxu1  ;;  %v4350_v56 = vpack.c.bf16 %v4230_v46, %v4226_v47 }
 0x375   : > { %v7119_v8 = vadd.f32 %v3822_v9, %v9932_v25  ;;  %v3824_v50 = vpop.f32.mrb[42].mxu1 }
 0x376   : > { %v4105_v33 = vmul.f32 0.01, %v7118_v30  ;;  %v7120_v15 = vadd.f32 %v3824_v50, %v9929_v10  ;;  %v3826_v60 = vpop.f32.mrb[43].mxu1  ;;  %5038 = vmatprep.mubr.bf16.mxu0 %v4350_v56  ;;  %vm3977_vm8 = vcmp.ge.f32.partialorder %v7118_v30, 0.0 }
 0x377   : > { %v4106_v29 = vmul.f32 0.01, %v7119_v8  ;;  %v7121_v13 = vadd.f32 %v3826_v60, %v9932_v25  ;;  %5039 = vmatmul.mubr.bf16.gmra.mrb[68].mxu0 %v4349_v28  ;;  %vm3978_vm9 = vcmp.ge.f32.partialorder %v7119_v8, 0.0 }
 0x378   : > { %vm3981_vm10 = vcmp.ge.f32.partialorder %v7120_v15, 0.0  ;;  %v4109_v38 = vmul.f32 0.01, %v7120_v15  ;;  %v4233_v62 = vsel %vm3977_vm8, %v7118_v30, %v4105_v33 }
 0x379   : > { %vm3982_vm11 = vcmp.ge.f32.partialorder %v7121_v13, 0.0  ;;  %v4110_v59 = vmul.f32 0.01, %v7121_v13  ;;  %v4234_v43 = vsel %vm3978_vm9, %v7119_v8, %v4106_v29 }
 0x37a   : > { %v4237_v51 = vsel %vm3981_vm10, %v7120_v15, %v4109_v38 }
 0x37b   : > { %v3830_v0 = vpop.f32.mrb[44].mxu1  ;;  %v4238_v61 = vsel %vm3982_vm11, %v7121_v13, %v4110_v59  ;;  %v4353_v20 = vpack.c.bf16 %v4237_v51, %v4233_v62 }
 0x37c   : > { %v7122_v35 = vadd.f32 %v3830_v0, %v9929_v10  ;;  %v3832_v52 = vpop.f32.mrb[45].mxu1  ;;  %v4354_v34 = vpack.c.bf16 %v4238_v61, %v4234_v43 }
 0x37d   : > { %v7123_v19 = vadd.f32 %v3832_v52, %v9932_v25  ;;  %v3834_v45 = vpop.f32.mrb[46].mxu1 }
 0x37e   : > { %v4113_v63 = vmul.f32 0.01, %v7122_v35  ;;  %v7124_v58 = vadd.f32 %v3834_v45, %v9929_v10  ;;  %v3836_v36 = vpop.f32.mrb[47].mxu1  ;;  %5048 = vmatprep.mubr.bf16.mxu0 %v4354_v34  ;;  %vm3985_vm12 = vcmp.ge.f32.partialorder %v7122_v35, 0.0 }
 0x37f   : > { %v4114_v5 = vmul.f32 0.01, %v7123_v19  ;;  %v7125_v1 = vadd.f32 %v3836_v36, %v9932_v25  ;;  %5049 = vmatmul.mubr.bf16.gmra.mrb[72].mxu0 %v4353_v20  ;;  %vm3986_vm13 = vcmp.ge.f32.partialorder %v7123_v19, 0.0 }
 0x380   : > { %vm3989_vm14 = vcmp.ge.f32.partialorder %v7124_v58, 0.0  ;;  %v4117_v55 = vmul.f32 0.01, %v7124_v58  ;;  %v4241_v21 = vsel %vm3985_vm12, %v7122_v35, %v4113_v63 }
 0x381   : > { %vm3990_vm15 = vcmp.ge.f32.partialorder %v7125_v1, 0.0  ;;  %v4118_v39 = vmul.f32 0.01, %v7125_v1  ;;  %v4242_v18 = vsel %vm3986_vm13, %v7123_v19, %v4114_v5 }
 0x382   : > { %v4245_v54 = vsel %vm3989_vm14, %v7124_v58, %v4117_v55 }
 0x383   : > { %v3840_v11 = vpop.f32.mrb[48].mxu1  ;;  %v4246_v57 = vsel %vm3990_vm15, %v7125_v1, %v4118_v39  ;;  %v4357_v22 = vpack.c.bf16 %v4245_v54, %v4241_v21 }
 0x384   : > { %v7126_v24 = vadd.f32 %v3840_v11, %v9929_v10  ;;  %v3842_v26 = vpop.f32.mrb[49].mxu1  ;;  %v4358_v41 = vpack.c.bf16 %v4246_v57, %v4242_v18 }
 0x385   : > { %v7127_v42 = vadd.f32 %v3842_v26, %v9932_v25  ;;  %v3844_v4 = vpop.f32.mrb[50].mxu1 }
 0x386   : > { %v4121_v27 = vmul.f32 0.01, %v7126_v24  ;;  %v7128_v31 = vadd.f32 %v3844_v4, %v9929_v10  ;;  %v3846_v40 = vpop.f32.mrb[51].mxu1  ;;  %5058 = vmatprep.mubr.bf16.mxu0 %v4358_v41  ;;  %vm3993_vm0 = vcmp.ge.f32.partialorder %v7126_v24, 0.0 }
 0x387   : > { %v4122_v7 = vmul.f32 0.01, %v7127_v42  ;;  %v7129_v17 = vadd.f32 %v3846_v40, %v9932_v25  ;;  %5059 = vmatmul.mubr.bf16.gmra.mrb[76].mxu0 %v4357_v22  ;;  %vm3994_vm1 = vcmp.ge.f32.partialorder %v7127_v42, 0.0 }
 0x388   : > { %vm3997_vm2 = vcmp.ge.f32.partialorder %v7128_v31, 0.0  ;;  %v4125_v48 = vmul.f32 0.01, %v7128_v31  ;;  %v4249_v16 = vsel %vm3993_vm0, %v7126_v24, %v4121_v27 }
 0x389   : > { %vm3998_vm3 = vcmp.ge.f32.partialorder %v7129_v17, 0.0  ;;  %v4126_v3 = vmul.f32 0.01, %v7129_v17  ;;  %v4250_v14 = vsel %vm3994_vm1, %v7127_v42, %v4122_v7 }
 0x38a   : > { %v4253_v12 = vsel %vm3997_vm2, %v7128_v31, %v4125_v48 }
 0x38b   : > { %v3850_v6 = vpop.f32.mrb[52].mxu1  ;;  %v4254_v47 = vsel %vm3998_vm3, %v7129_v17, %v4126_v3  ;;  %v4361_v46 = vpack.c.bf16 %v4253_v12, %v4249_v16 }
 0x38c   : > { %v7130_v28 = vadd.f32 %v3850_v6, %v9929_v10  ;;  %v3852_v49 = vpop.f32.mrb[53].mxu1  ;;  %v4362_v30 = vpack.c.bf16 %v4254_v47, %v4250_v14 }
 0x38d   : > { %v7131_v9 = vadd.f32 %v3852_v49, %v9932_v25  ;;  %v3854_v56 = vpop.f32.mrb[54].mxu1 }
 0x38e   : > { %v4129_v8 = vmul.f32 0.01, %v7130_v28  ;;  %v7132_v50 = vadd.f32 %v3854_v56, %v9929_v10  ;;  %v3856_v33 = vpop.f32.mrb[55].mxu1  ;;  %5068 = vmatprep.mubr.bf16.mxu0 %v4362_v30  ;;  %vm4001_vm4 = vcmp.ge.f32.partialorder %v7130_v28, 0.0 }
 0x38f   : > { %v4130_v15 = vmul.f32 0.01, %v7131_v9  ;;  %v7133_v60 = vadd.f32 %v3856_v33, %v9932_v25  ;;  %5069 = vmatmul.mubr.bf16.gmra.mrb[80].mxu0 %v4361_v46  ;;  %vm4002_vm5 = vcmp.ge.f32.partialorder %v7131_v9, 0.0 }
 0x390   : > { %vm4005_vm6 = vcmp.ge.f32.partialorder %v7132_v50, 0.0  ;;  %v4133_v32 = vmul.f32 0.01, %v7132_v50  ;;  %v4257_v13 = vsel %vm4001_vm4, %v7130_v28, %v4129_v8 }
 0x391   : > { %vm4006_vm7 = vcmp.ge.f32.partialorder %v7133_v60, 0.0  ;;  %v4134_v29 = vmul.f32 0.01, %v7133_v60  ;;  %v4258_v59 = vsel %vm4002_vm5, %v7131_v9, %v4130_v15 }
 0x392   : > { %v4261_v44 = vsel %vm4005_vm6, %v7132_v50, %v4133_v32 }
 0x393   : > { %v3860_v38 = vpop.f32.mrb[56].mxu1  ;;  %v4262_v62 = vsel %vm4006_vm7, %v7133_v60, %v4134_v29  ;;  %v4365_v51 = vpack.c.bf16 %v4261_v44, %v4257_v13 }
 0x394   : > { %v7134_v23 = vadd.f32 %v3860_v38, %v9929_v10  ;;  %v3862_v0 = vpop.f32.mrb[57].mxu1  ;;  %v4366_v43 = vpack.c.bf16 %v4262_v62, %v4258_v59 }
 0x395   : > { %v7135_v61 = vadd.f32 %v3862_v0, %v9932_v25  ;;  %v3864_v20 = vpop.f32.mrb[58].mxu1 }
 0x396   : > { %v4137_v35 = vmul.f32 0.01, %v7134_v23  ;;  %v7136_v52 = vadd.f32 %v3864_v20, %v9929_v10  ;;  %v3866_v34 = vpop.f32.mrb[59].mxu1  ;;  %5078 = vmatprep.mubr.bf16.mxu0 %v4366_v43  ;;  %vm4009_vm8 = vcmp.ge.f32.partialorder %v7134_v23, 0.0 }
 0x397   : > { %v4138_v19 = vmul.f32 0.01, %v7135_v61  ;;  %v7137_v45 = vadd.f32 %v3866_v34, %v9932_v25  ;;  %5079 = vmatmul.mubr.bf16.gmra.mrb[84].mxu0 %v4365_v51  ;;  %vm4010_vm9 = vcmp.ge.f32.partialorder %v7135_v61, 0.0 }
 0x398   : > { %vm4013_vm10 = vcmp.ge.f32.partialorder %v7136_v52, 0.0  ;;  %v4141_v63 = vmul.f32 0.01, %v7136_v52  ;;  %v4265_v36 = vsel %vm4009_vm8, %v7134_v23, %v4137_v35 }
 0x399   : > { %vm4014_vm11 = vcmp.ge.f32.partialorder %v7137_v45, 0.0  ;;  %v4142_v58 = vmul.f32 0.01, %v7137_v45  ;;  %v4266_v55 = vsel %vm4010_vm9, %v7135_v61, %v4138_v19 }
 0x39a   : > { %v4269_v5 = vsel %vm4013_vm10, %v7136_v52, %v4141_v63 }
 0x39b   : > { %v3870_v1 = vpop.f32.mrb[60].mxu1  ;;  %v4270_v39 = vsel %vm4014_vm11, %v7137_v45, %v4142_v58  ;;  %v4369_v21 = vpack.c.bf16 %v4269_v5, %v4265_v36 }
 0x39c   : > { %v7138_v54 = vadd.f32 %v3870_v1, %v9929_v10  ;;  %v3872_v11 = vpop.f32.mrb[61].mxu1  ;;  %v4370_v18 = vpack.c.bf16 %v4270_v39, %v4266_v55 }
 0x39d   : > { %v7139_v57 = vadd.f32 %v3872_v11, %v9932_v25  ;;  %v3874_v22 = vpop.f32.mrb[62].mxu1 }
 0x39e   : > { %v4145_v24 = vmul.f32 0.01, %v7138_v54  ;;  %v7140_v26 = vadd.f32 %v3874_v22, %v9929_v10  ;;  %v3876_v41 = vpop.f32.mrb[63].mxu1  ;;  %5088 = vmatprep.mubr.bf16.mxu0 %v4370_v18  ;;  %vm4017_vm12 = vcmp.ge.f32.partialorder %v7138_v54, 0.0 }
 0x39f   : > { %v4146_v42 = vmul.f32 0.01, %v7139_v57  ;;  %v7141_v4 = vadd.f32 %v3876_v41, %v9932_v25  ;;  %5089 = vmatmul.mubr.bf16.gmra.mrb[88].mxu0 %v4369_v21  ;;  %vm4018_vm13 = vcmp.ge.f32.partialorder %v7139_v57, 0.0 }
 0x3a0   : > { %vm4021_vm14 = vcmp.ge.f32.partialorder %v7140_v26, 0.0  ;;  %v4149_v27 = vmul.f32 0.01, %v7140_v26  ;;  %v4273_v40 = vsel %vm4017_vm12, %v7138_v54, %v4145_v24 }
 0x3a1   : > { %vm4022_vm15 = vcmp.ge.f32.partialorder %v7141_v4, 0.0  ;;  %v4150_v31 = vmul.f32 0.01, %v7141_v4  ;;  %v4274_v48 = vsel %vm4018_vm13, %v7139_v57, %v4146_v42 }
 0x3a2   : > { %v4277_v7 = vsel %vm4021_vm14, %v7140_v26, %v4149_v27 }
 0x3a3   : > { %v3880_v17 = vpop.f32.mrb[64].mxu1  ;;  %v4278_v3 = vsel %vm4022_vm15, %v7141_v4, %v4150_v31  ;;  %v4373_v16 = vpack.c.bf16 %v4277_v7, %v4273_v40 }
 0x3a4   : > { %v7142_v12 = vadd.f32 %v3880_v17, %v9929_v10  ;;  %v3882_v6 = vpop.f32.mrb[65].mxu1  ;;  %v4374_v14 = vpack.c.bf16 %v4278_v3, %v4274_v48 }
 0x3a5   : > { %v7143_v47 = vadd.f32 %v3882_v6, %v9932_v25  ;;  %v3884_v46 = vpop.f32.mrb[66].mxu1 }
 0x3a6   : > { %v4153_v28 = vmul.f32 0.01, %v7142_v12  ;;  %v7144_v49 = vadd.f32 %v3884_v46, %v9929_v10  ;;  %v3886_v30 = vpop.f32.mrb[67].mxu1  ;;  %5098 = vmatprep.mubr.bf16.mxu0 %v4374_v14  ;;  %vm4025_vm0 = vcmp.ge.f32.partialorder %v7142_v12, 0.0 }
 0x3a7   : > { %v4154_v9 = vmul.f32 0.01, %v7143_v47  ;;  %v7145_v56 = vadd.f32 %v3886_v30, %v9932_v25  ;;  %5099 = vmatmul.mubr.bf16.gmra.mrb[92].mxu0 %v4373_v16  ;;  %vm4026_vm1 = vcmp.ge.f32.partialorder %v7143_v47, 0.0 }
 0x3a8   : > { %vm4029_vm2 = vcmp.ge.f32.partialorder %v7144_v49, 0.0  ;;  %v4157_v8 = vmul.f32 0.01, %v7144_v49  ;;  %v4281_v33 = vsel %vm4025_vm0, %v7142_v12, %v4153_v28 }
 0x3a9   : > { %vm4030_vm3 = vcmp.ge.f32.partialorder %v7145_v56, 0.0  ;;  %v4158_v50 = vmul.f32 0.01, %v7145_v56  ;;  %v4282_v32 = vsel %vm4026_vm1, %v7143_v47, %v4154_v9 }
 0x3aa   : > { %v4285_v15 = vsel %vm4029_vm2, %v7144_v49, %v4157_v8 }
 0x3ab   : > { %v3890_v60 = vpop.f32.mrb[68].mxu1  ;;  %v4286_v29 = vsel %vm4030_vm3, %v7145_v56, %v4158_v50  ;;  %v4377_v13 = vpack.c.bf16 %v4285_v15, %v4281_v33 }
 0x3ac   : > { %v7146_v44 = vadd.f32 %v3890_v60, %v9929_v10  ;;  %v3892_v38 = vpop.f32.mrb[69].mxu1  ;;  %v4378_v59 = vpack.c.bf16 %v4286_v29, %v4282_v32 }
 0x3ad   : > { %v7147_v62 = vadd.f32 %v3892_v38, %v9932_v25  ;;  %v3894_v51 = vpop.f32.mrb[70].mxu1 }
 0x3ae   : > { %v4161_v23 = vmul.f32 0.01, %v7146_v44  ;;  %v7148_v0 = vadd.f32 %v3894_v51, %v9929_v10  ;;  %v3896_v43 = vpop.f32.mrb[71].mxu1  ;;  %5108 = vmatprep.mubr.bf16.mxu0 %v4378_v59  ;;  %vm4033_vm4 = vcmp.ge.f32.partialorder %v7146_v44, 0.0 }
 0x3af   : > { %v4162_v61 = vmul.f32 0.01, %v7147_v62  ;;  %v7149_v20 = vadd.f32 %v3896_v43, %v9932_v25  ;;  %5109 = vmatmul.mubr.bf16.gmra.mrb[96].mxu0 %v4377_v13  ;;  %vm4034_vm5 = vcmp.ge.f32.partialorder %v7147_v62, 0.0 }
 0x3b0   : > { %vm4037_vm6 = vcmp.ge.f32.partialorder %v7148_v0, 0.0  ;;  %v4165_v35 = vmul.f32 0.01, %v7148_v0  ;;  %v4289_v34 = vsel %vm4033_vm4, %v7146_v44, %v4161_v23 }
 0x3b1   : > { %vm4038_vm7 = vcmp.ge.f32.partialorder %v7149_v20, 0.0  ;;  %v4166_v52 = vmul.f32 0.01, %v7149_v20  ;;  %v4290_v63 = vsel %vm4034_vm5, %v7147_v62, %v4162_v61 }
 0x3b2   : > { %v4293_v19 = vsel %vm4037_vm6, %v7148_v0, %v4165_v35 }
 0x3b3   : > { %v3900_v45 = vpop.f32.mrb[72].mxu1  ;;  %v4294_v58 = vsel %vm4038_vm7, %v7149_v20, %v4166_v52  ;;  %v4381_v36 = vpack.c.bf16 %v4293_v19, %v4289_v34 }
 0x3b4   : > { %v7150_v5 = vadd.f32 %v3900_v45, %v9929_v10  ;;  %v3902_v1 = vpop.f32.mrb[73].mxu1  ;;  %v4382_v55 = vpack.c.bf16 %v4294_v58, %v4290_v63 }
 0x3b5   : > { %v7151_v39 = vadd.f32 %v3902_v1, %v9932_v25  ;;  %v3904_v21 = vpop.f32.mrb[74].mxu1 }
 0x3b6   : > { %v4169_v54 = vmul.f32 0.01, %v7150_v5  ;;  %v7152_v11 = vadd.f32 %v3904_v21, %v9929_v10  ;;  %v3906_v18 = vpop.f32.mrb[75].mxu1  ;;  %5118 = vmatprep.mubr.bf16.mxu0 %v4382_v55  ;;  %vm4041_vm8 = vcmp.ge.f32.partialorder %v7150_v5, 0.0 }
 0x3b7   : > { %v4170_v57 = vmul.f32 0.01, %v7151_v39  ;;  %v7153_v22 = vadd.f32 %v3906_v18, %v9932_v25  ;;  %5119 = vmatmul.mubr.bf16.gmra.mrb[100].mxu0 %v4381_v36  ;;  %vm4042_vm9 = vcmp.ge.f32.partialorder %v7151_v39, 0.0 }
 0x3b8   : > { %vm4045_vm10 = vcmp.ge.f32.partialorder %v7152_v11, 0.0  ;;  %v4173_v24 = vmul.f32 0.01, %v7152_v11  ;;  %v4297_v41 = vsel %vm4041_vm8, %v7150_v5, %v4169_v54 }
 0x3b9   : > { %vm4046_vm11 = vcmp.ge.f32.partialorder %v7153_v22, 0.0  ;;  %v4174_v26 = vmul.f32 0.01, %v7153_v22  ;;  %v4298_v27 = vsel %vm4042_vm9, %v7151_v39, %v4170_v57 }
 0x3ba   : > { %v4301_v42 = vsel %vm4045_vm10, %v7152_v11, %v4173_v24 }
 0x3bb   : > { %v3910_v4 = vpop.f32.mrb[76].mxu1  ;;  %v4302_v31 = vsel %vm4046_vm11, %v7153_v22, %v4174_v26  ;;  %v4385_v40 = vpack.c.bf16 %v4301_v42, %v4297_v41 }
 0x3bc   : > { %v7154_v7 = vadd.f32 %v3910_v4, %v9929_v10  ;;  %v3912_v17 = vpop.f32.mrb[77].mxu1  ;;  %v4386_v48 = vpack.c.bf16 %v4302_v31, %v4298_v27 }
 0x3bd   : > { %v7155_v3 = vadd.f32 %v3912_v17, %v9932_v25  ;;  %v3914_v16 = vpop.f32.mrb[78].mxu1 }
 0x3be   : > { %v4177_v12 = vmul.f32 0.01, %v7154_v7  ;;  %v7156_v6 = vadd.f32 %v3914_v16, %v9929_v10  ;;  %v3916_v14 = vpop.f32.mrb[79].mxu1  ;;  %5128 = vmatprep.mubr.bf16.mxu0 %v4386_v48  ;;  %vm4049_vm12 = vcmp.ge.f32.partialorder %v7154_v7, 0.0 }
 0x3bf   : > { %v4178_v47 = vmul.f32 0.01, %v7155_v3  ;;  %v7157_v46 = vadd.f32 %v3916_v14, %v9932_v25  ;;  %5129 = vmatmul.mubr.bf16.gmra.mrb[104].mxu0 %v4385_v40  ;;  %vm4050_vm13 = vcmp.ge.f32.partialorder %v7155_v3, 0.0 }
 0x3c0   : > { %vm4053_vm14 = vcmp.ge.f32.partialorder %v7156_v6, 0.0  ;;  %v4181_v28 = vmul.f32 0.01, %v7156_v6  ;;  %v4305_v30 = vsel %vm4049_vm12, %v7154_v7, %v4177_v12 }
 0x3c1   : > { %vm4054_vm15 = vcmp.ge.f32.partialorder %v7157_v46, 0.0  ;;  %v4182_v49 = vmul.f32 0.01, %v7157_v46  ;;  %v4306_v8 = vsel %vm4050_vm13, %v7155_v3, %v4178_v47 }
 0x3c2   : > { %v4309_v9 = vsel %vm4053_vm14, %v7156_v6, %v4181_v28 }
 0x3c3   : > { %v3920_v56 = vpop.f32.mrb[80].mxu1  ;;  %v4310_v50 = vsel %vm4054_vm15, %v7157_v46, %v4182_v49  ;;  %v4389_v33 = vpack.c.bf16 %v4309_v9, %v4305_v30 }
 0x3c4   : > { %v7158_v15 = vadd.f32 %v3920_v56, %v9929_v10  ;;  %v3922_v60 = vpop.f32.mrb[81].mxu1  ;;  %v4390_v32 = vpack.c.bf16 %v4310_v50, %v4306_v8 }
 0x3c5   : > { %v7159_v29 = vadd.f32 %v3922_v60, %v9932_v25  ;;  %v3924_v13 = vpop.f32.mrb[82].mxu1 }
 0x3c6   : > { %v4185_v44 = vmul.f32 0.01, %v7158_v15  ;;  %v7160_v38 = vadd.f32 %v3924_v13, %v9929_v10  ;;  %v3926_v59 = vpop.f32.mrb[83].mxu1  ;;  %5138 = vmatprep.mubr.bf16.mxu0 %v4390_v32  ;;  %vm4057_vm0 = vcmp.ge.f32.partialorder %v7158_v15, 0.0  ;;  %v8350_v13 = vld [vmem:[#allocation8 + $0x30] sm:$0xff]  }
 0x3c7   : > { %v4186_v62 = vmul.f32 0.01, %v7159_v29  ;;  %v7161_v51 = vadd.f32 %v3926_v59, %v9932_v25  ;;  %5139 = vmatmul.mubr.bf16.gmra.mrb[108].mxu0 %v4389_v33  ;;  %vm4058_vm1 = vcmp.ge.f32.partialorder %v7159_v29, 0.0 }
 0x3c8   : > { %vm4061_vm2 = vcmp.ge.f32.partialorder %v7160_v38, 0.0  ;;  %v4189_v23 = vmul.f32 0.01, %v7160_v38  ;;  %v4313_v43 = vsel %vm4057_vm0, %v7158_v15, %v4185_v44  ;;  %v8349_v15 = vld [vmem:[#allocation8 + $0x70] sm:$0xff]  }
 0x3c9   : > { %vm4062_vm3 = vcmp.ge.f32.partialorder %v7161_v51, 0.0  ;;  %v4190_v0 = vmul.f32 0.01, %v7161_v51  ;;  %v4314_v35 = vsel %vm4058_vm1, %v7159_v29, %v4186_v62  ;;  %6882 = vmatprep.subr.bf16.mxu1 %v8349_v15 }
 0x3ca   : > { %v4317_v61 = vsel %vm4061_vm2, %v7160_v38, %v4189_v23  ;;  %6883 = vmatpush3.bf16.msra.mxu1 %v8350_v13 }
 0x3cb   : > { %v3930_v20 = vpop.f32.mrb[84].mxu1  ;;  %v4318_v52 = vsel %vm4062_vm3, %v7161_v51, %v4190_v0  ;;  %v4393_v34 = vpack.c.bf16 %v4317_v61, %v4313_v43  ;;  %v8351_v0 = vld [vmem:[#allocation8 + $0x78] sm:$0xff]  }
 0x3cc   : > { %v7162_v19 = vadd.f32 %v3930_v20, %v9929_v10  ;;  %v3932_v45 = vpop.f32.mrb[85].mxu1  ;;  %v4394_v63 = vpack.c.bf16 %v4318_v52, %v4314_v35  ;;  %v8352_v20 = vld [vmem:[#allocation8 + $0x38] sm:$0xff]   ;;  %6884 = vmatprep.subr.bf16.mxu1 %v8351_v0 }
 0x3cd   : > { %v7163_v58 = vadd.f32 %v3932_v45, %v9932_v25  ;;  %v3934_v36 = vpop.f32.mrb[86].mxu1 }
 0x3ce   : > { %v4193_v5 = vmul.f32 0.01, %v7162_v19  ;;  %v7164_v1 = vadd.f32 %v3934_v36, %v9929_v10  ;;  %v3936_v55 = vpop.f32.mrb[87].mxu1  ;;  %5148 = vmatprep.mubr.bf16.mxu0 %v4394_v63  ;;  %vm4065_vm4 = vcmp.ge.f32.partialorder %v7162_v19, 0.0  ;;  %6885 = vmatpush3.bf16.msra.mxu1 %v8352_v20 }
 0x3cf   : > { %v4194_v39 = vmul.f32 0.01, %v7163_v58  ;;  %v7165_v21 = vadd.f32 %v3936_v55, %v9932_v25  ;;  %5149 = vmatmul.mubr.bf16.gmra.mrb[112].mxu0 %v4393_v34  ;;  %vm4066_vm5 = vcmp.ge.f32.partialorder %v7163_v58, 0.0 }
 0x3d0   : > { %vm4069_vm6 = vcmp.ge.f32.partialorder %v7164_v1, 0.0  ;;  %v4197_v54 = vmul.f32 0.01, %v7164_v1  ;;  %v4321_v18 = vsel %vm4065_vm4, %v7162_v19, %v4193_v5 }
 0x3d1   : > { %vm4070_vm7 = vcmp.ge.f32.partialorder %v7165_v21, 0.0  ;;  %v4198_v11 = vmul.f32 0.01, %v7165_v21  ;;  %v4322_v24 = vsel %vm4066_vm5, %v7163_v58, %v4194_v39 }
 0x3d2   : > { %v4325_v57 = vsel %vm4069_vm6, %v7164_v1, %v4197_v54 }
 0x3d3   : > { %v3940_v22 = vpop.f32.mrb[88].mxu1  ;;  %v4326_v26 = vsel %vm4070_vm7, %v7165_v21, %v4198_v11  ;;  %v4397_v41 = vpack.c.bf16 %v4325_v57, %v4321_v18 }
 0x3d4   : > { %v7166_v42 = vadd.f32 %v3940_v22, %v9929_v10  ;;  %v3942_v4 = vpop.f32.mrb[89].mxu1  ;;  %v4398_v27 = vpack.c.bf16 %v4326_v26, %v4322_v24 }
 0x3d5   : > { %v7167_v31 = vadd.f32 %v3942_v4, %v9932_v25  ;;  %v3944_v40 = vpop.f32.mrb[90].mxu1 }
 0x3d6   : > { %v4201_v7 = vmul.f32 0.01, %v7166_v42  ;;  %v7168_v17 = vadd.f32 %v3944_v40, %v9929_v10  ;;  %v3946_v48 = vpop.f32.mrb[91].mxu1  ;;  %5158 = vmatprep.mubr.bf16.mxu0 %v4398_v27  ;;  %vm4073_vm8 = vcmp.ge.f32.partialorder %v7166_v42, 0.0 }
 0x3d7   : > { %v4202_v3 = vmul.f32 0.01, %v7167_v31  ;;  %v7169_v16 = vadd.f32 %v3946_v48, %v9932_v25  ;;  %5159 = vmatmul.mubr.bf16.gmra.mrb[116].mxu0 %v4397_v41  ;;  %vm4074_vm9 = vcmp.ge.f32.partialorder %v7167_v31, 0.0 }
 0x3d8   : > { %vm4077_vm10 = vcmp.ge.f32.partialorder %v7168_v17, 0.0  ;;  %v4205_v12 = vmul.f32 0.01, %v7168_v17  ;;  %v4329_v14 = vsel %vm4073_vm8, %v7166_v42, %v4201_v7 }
 0x3d9   : > { %vm4078_vm11 = vcmp.ge.f32.partialorder %v7169_v16, 0.0  ;;  %v4206_v6 = vmul.f32 0.01, %v7169_v16  ;;  %v4330_v28 = vsel %vm4074_vm9, %v7167_v31, %v4202_v3 }
 0x3da   : > { %v4333_v47 = vsel %vm4077_vm10, %v7168_v17, %v4205_v12 }
 0x3db   : > { %v3950_v46 = vpop.f32.mrb[92].mxu1  ;;  %v4334_v49 = vsel %vm4078_vm11, %v7169_v16, %v4206_v6  ;;  %v4401_v30 = vpack.c.bf16 %v4333_v47, %v4329_v14 }
 0x3dc   : > { %v7170_v9 = vadd.f32 %v3950_v46, %v9929_v10  ;;  %v3952_v56 = vpop.f32.mrb[93].mxu1  ;;  %v4402_v8 = vpack.c.bf16 %v4334_v49, %v4330_v28 }
 0x3dd   : > { %v7171_v50 = vadd.f32 %v3952_v56, %v9932_v25  ;;  %v3954_v33 = vpop.f32.mrb[94].mxu1 }
 0x3de   : > { %v4209_v60 = vmul.f32 0.01, %v7170_v9  ;;  %v7172_v32 = vadd.f32 %v3954_v33, %v9929_v10  ;;  %v3956_v29 = vpop.f32.mrb[95].mxu1  ;;  %5168 = vmatprep.mubr.bf16.mxu0 %v4402_v8  ;;  %vm4081_vm12 = vcmp.ge.f32.partialorder %v7170_v9, 0.0 }
 0x3df   : > { %v4210_v44 = vmul.f32 0.01, %v7171_v50  ;;  %v7173_v38 = vadd.f32 %v3956_v29, %v9932_v25  ;;  %5169 = vmatmul.mubr.bf16.gmra.mrb[120].mxu0 %v4401_v30  ;;  %vm4082_vm13 = vcmp.ge.f32.partialorder %v7171_v50, 0.0  ;;  %v4471_v25 = vld [vmem:[%s10560_s4] sm:$0x3] }
 0x3e0   : > { %vm4085_vm14 = vcmp.ge.f32.partialorder %v7172_v32, 0.0  ;;  %v4213_v59 = vmul.f32 0.01, %v7172_v32  ;;  %v4337_v51 = vsel %vm4081_vm12, %v7170_v9, %v4209_v60  ;;  %v10003_v52 = vrot.slane %v4471_v25, %v701_v2 }
 0x3e1   : > { %vm4086_vm15 = vcmp.ge.f32.partialorder %v7173_v38, 0.0  ;;  %v4214_v62 = vmul.f32 0.01, %v7173_v38  ;;  %v4338_v43 = vsel %vm4082_vm13, %v7171_v50, %v4210_v44  ;;  %v10007_v34 = vrot.slane %v4471_v25, %v705_v53 }
 0x3e2   : > { %v4341_v23 = vsel %vm4085_vm14, %v7172_v32, %v4213_v59 }
 0x3e3   : > { %v4342_v10 = vsel %vm4086_vm15, %v7173_v38, %v4214_v62  ;;  %v4405_v61 = vpack.c.bf16 %v4341_v23, %v4337_v51 }
 0x3e4   : > { %v4406_v35 = vpack.c.bf16 %v4342_v10, %v4338_v43 }
 0x3e6   : > { %5178 = vmatprep.mubr.bf16.mxu0 %v4406_v35 }
 0x3e7   : > { %5179 = vmatmul.mubr.bf16.gmra.mrb[124].mxu0 %v4405_v61 }
 0x442   : > { %v5030_v19 = vpop.f32.mrb[64].mxu0 }
 0x443   : > { %v10010_v45 = vadd.f32 %v5030_v19, %v10003_v52  ;;  %v5032_v63 = vpop.f32.mrb[65].mxu0 }
 0x444   : > { %v10013_v58 = vadd.f32 %v5032_v63, %v10007_v34  ;;  %v5034_v36 = vpop.f32.mrb[66].mxu0 }
 0x445   : > { %v6751_v5 = vmul.f32 -1.442695, %v10010_v45  ;;  %v10017_v1 = vadd.f32 %v5034_v36, %v10003_v52  ;;  %v5036_v2 = vpop.f32.mrb[67].mxu0 }
 0x446   : > { %v6752_v55 = vmul.f32 -1.442695, %v10013_v58  ;;  %v10021_v37 = vadd.f32 %v5036_v2, %v10007_v34 }
 0x447   : > { %8353 = vpow2.f32 %v6751_v5  ;;  %v6753_v53 = vmul.f32 -1.442695, %v10017_v1 }
 0x448   : > { %8355 = vpow2.f32 %v6752_v55  ;;  %v6754_v39 = vmul.f32 -1.442695, %v10021_v37 }
 0x449   : > { %8357 = vpow2.f32 %v6753_v53 }
 0x44a   : > { %8359 = vpow2.f32 %v6754_v39  ;;  %v5040_v21 = vpop.f32.mrb[68].mxu0 }
 0x44b   : > { %v10026_v54 = vadd.f32 %v5040_v21, %v10003_v52  ;;  %v5042_v11 = vpop.f32.mrb[69].mxu0 }
 0x44c   : > { %v10029_v18 = vadd.f32 %v5042_v11, %v10007_v34  ;;  %v5044_v57 = vpop.f32.mrb[70].mxu0 }
 0x44d   : > { %v6755_v22 = vmul.f32 -1.442695, %v10026_v54  ;;  %v10033_v24 = vadd.f32 %v5044_v57, %v10003_v52  ;;  %v5046_v26 = vpop.f32.mrb[71].mxu0 }
 0x44e   : > { %v6756_v41 = vmul.f32 -1.442695, %v10029_v18  ;;  %v10037_v42 = vadd.f32 %v5046_v26, %v10007_v34 }
 0x44f   : > { %8361 = vpow2.f32 %v6755_v22  ;;  %v6757_v4 = vmul.f32 -1.442695, %v10033_v24 }
 0x450   : > { %8363 = vpow2.f32 %v6756_v41  ;;  %v6758_v27 = vmul.f32 -1.442695, %v10037_v42 }
 0x451   : > { %v8354_v31 = vpop.eup %8353  ;;  %8365 = vpow2.f32 %v6757_v4 }
 0x452   : > { %v8356_v40 = vpop.eup %8355  ;;  %v5381_v7 = vadd.f32 1.0, %v8354_v31  ;;  %8367 = vpow2.f32 %v6758_v27  ;;  %v5050_v17 = vpop.f32.mrb[72].mxu0 }
 0x453   : > { %v8358_v48 = vpop.eup %8357  ;;  %v5382_v3 = vadd.f32 1.0, %v8356_v40  ;;  %v10042_v16 = vadd.f32 %v5050_v17, %v10003_v52  ;;  %v5052_v12 = vpop.f32.mrb[73].mxu0 }
 0x454   : > { %v8360_v6 = vpop.eup %8359  ;;  %8369 = vrcp.f32 %v5381_v7  ;;  %v5383_v14 = vadd.f32 1.0, %v8358_v48  ;;  %v10045_v47 = vadd.f32 %v5052_v12, %v10007_v34  ;;  %v5054_v46 = vpop.f32.mrb[74].mxu0 }
 0x455   : > { %8371 = vrcp.f32 %v5382_v3  ;;  %v5384_v28 = vadd.f32 1.0, %v8360_v6  ;;  %v6759_v49 = vmul.f32 -1.442695, %v10042_v16  ;;  %v10049_v30 = vadd.f32 %v5054_v46, %v10003_v52  ;;  %v5056_v9 = vpop.f32.mrb[75].mxu0 }
 0x456   : > { %8373 = vrcp.f32 %v5383_v14  ;;  %v6760_v56 = vmul.f32 -1.442695, %v10045_v47  ;;  %v10053_v8 = vadd.f32 %v5056_v9, %v10007_v34 }
 0x457   : > { %8375 = vrcp.f32 %v5384_v28  ;;  %v6761_v50 = vmul.f32 -1.442695, %v10049_v30 }
 0x458   : > { %8377 = vpow2.f32 %v6759_v49  ;;  %v6762_v33 = vmul.f32 -1.442695, %v10053_v8 }
 0x459   : > { %v8362_v15 = vpop.eup %8361  ;;  %8379 = vpow2.f32 %v6760_v56 }
 0x45a   : > { %v8364_v60 = vpop.eup %8363  ;;  %v5385_v32 = vadd.f32 1.0, %v8362_v15  ;;  %8381 = vpow2.f32 %v6761_v50  ;;  %v5060_v29 = vpop.f32.mrb[76].mxu0 }
 0x45b   : > { %v8366_v13 = vpop.eup %8365  ;;  %v5386_v44 = vadd.f32 1.0, %v8364_v60  ;;  %8383 = vpow2.f32 %v6762_v33  ;;  %v10058_v38 = vadd.f32 %v5060_v29, %v10003_v52  ;;  %v5062_v59 = vpop.f32.mrb[77].mxu0 }
 0x45c   : > { %v8368_v62 = vpop.eup %8367  ;;  %8385 = vrcp.f32 %v5385_v32  ;;  %v5387_v51 = vadd.f32 1.0, %v8366_v13  ;;  %v10061_v23 = vadd.f32 %v5062_v59, %v10007_v34  ;;  %v5064_v0 = vpop.f32.mrb[78].mxu0 }
 0x45d   : > { %8387 = vrcp.f32 %v5386_v44  ;;  %v5388_v43 = vadd.f32 1.0, %v8368_v62  ;;  %v6763_v10 = vmul.f32 -1.442695, %v10058_v38  ;;  %v10065_v61 = vadd.f32 %v5064_v0, %v10003_v52  ;;  %v5066_v20 = vpop.f32.mrb[79].mxu0 }
 0x45e   : > { %v8370_v35 = vpop.eup %8369  ;;  %8389 = vrcp.f32 %v5387_v51  ;;  %v6764_v25 = vmul.f32 -1.442695, %v10061_v23  ;;  %v10069_v19 = vadd.f32 %v5066_v20, %v10007_v34 }
 0x45f   : > { %v8372_v63 = vpop.eup %8371  ;;  %8391 = vrcp.f32 %v5388_v43  ;;  %v6765_v36 = vmul.f32 -1.442695, %v10065_v61  ;;  %v5573_v53 = vmul.f32 %v8370_v35, %v10010_v45 }
 0x460   : > { %v8374_v5 = vpop.eup %8373  ;;  %8393 = vpow2.f32 %v6763_v10  ;;  %v6766_v2 = vmul.f32 -1.442695, %v10069_v19  ;;  %v5574_v11 = vmul.f32 %v8372_v63, %v10013_v58 }
 0x461   : > { %v8376_v55 = vpop.eup %8375  ;;  %v5575_v39 = vmul.f32 %v8374_v5, %v10017_v1  ;;  %8395 = vpow2.f32 %v6764_v25 }
 0x462   : > { %v8378_v21 = vpop.eup %8377  ;;  %v5576_v57 = vmul.f32 %v8376_v55, %v10021_v37  ;;  %8397 = vpow2.f32 %v6765_v36  ;;  %v5070_v22 = vpop.f32.mrb[80].mxu0 }
 0x463   : > { %v8380_v26 = vpop.eup %8379  ;;  %v5637_v41 = vpack.c.bf16 %v5575_v39, %v5573_v53  ;;  %v5389_v4 = vadd.f32 1.0, %v8378_v21  ;;  %8399 = vpow2.f32 %v6766_v2  ;;  %v10078_v27 = vadd.f32 %v5070_v22, %v10003_v52  ;;  %v5072_v31 = vpop.f32.mrb[81].mxu0 }
 0x464   : > { %v8382_v40 = vpop.eup %8381  ;;  %v5390_v45 = vadd.f32 1.0, %v8380_v26  ;;  %v10081_v1 = vadd.f32 %v5072_v31, %v10007_v34  ;;  %v5074_v7 = vpop.f32.mrb[82].mxu0  ;;  %v5638_v17 = vpack.c.bf16 %v5576_v57, %v5574_v11 }
 0x465   : > { %v8384_v58 = vpop.eup %8383  ;;  %8401 = vrcp.f32 %v5389_v4  ;;  %v5391_v37 = vadd.f32 1.0, %v8382_v40  ;;  %v6767_v48 = vmul.f32 -1.442695, %v10078_v27  ;;  %v10085_v3 = vadd.f32 %v5074_v7, %v10003_v52  ;;  %v5076_v12 = vpop.f32.mrb[83].mxu0 }
 0x466   : > { %v8386_v6 = vpop.eup %8385  ;;  %8403 = vrcp.f32 %v5390_v45  ;;  %v5392_v14 = vadd.f32 1.0, %v8384_v58  ;;  %v6768_v46 = vmul.f32 -1.442695, %v10081_v1  ;;  %v10089_v28 = vadd.f32 %v5076_v12, %v10007_v34  ;;  %5836 = vmatprep.mubr.bf16.mxu1 %v5638_v17 }
 0x467   : > { %v8388_v49 = vpop.eup %8387  ;;  %8405 = vrcp.f32 %v5391_v37  ;;  %v6769_v9 = vmul.f32 -1.442695, %v10085_v3  ;;  %5837 = vmatmul.mubr.bf16.vlgmr.msra.gmra.mrb[96].mxu1 %v5637_v41  ;;  %v5577_v15 = vmul.f32 %v8386_v6, %v10026_v54 }
 0x468   : > { %v8390_v56 = vpop.eup %8389  ;;  %8407 = vrcp.f32 %v5392_v14  ;;  %v6770_v50 = vmul.f32 -1.442695, %v10089_v28  ;;  %v5578_v29 = vmul.f32 %v8388_v49, %v10029_v18 }
 0x469   : > { %v8392_v33 = vpop.eup %8391  ;;  %v5579_v60 = vmul.f32 %v8390_v56, %v10033_v24  ;;  %8409 = vpow2.f32 %v6767_v48 }
 0x46a   : > { %v8394_v32 = vpop.eup %8393  ;;  %v5580_v13 = vmul.f32 %v8392_v33, %v10037_v42  ;;  %8411 = vpow2.f32 %v6768_v46  ;;  %v5080_v44 = vpop.f32.mrb[84].mxu0 }
 0x46b   : > { %v8396_v59 = vpop.eup %8395  ;;  %v5393_v62 = vadd.f32 1.0, %v8394_v32  ;;  %8413 = vpow2.f32 %v6769_v9  ;;  %v10098_v51 = vadd.f32 %v5080_v44, %v10003_v52  ;;  %v5082_v0 = vpop.f32.mrb[85].mxu0  ;;  %v5639_v43 = vpack.c.bf16 %v5579_v60, %v5577_v15 }
 0x46c   : > { %v8398_v10 = vpop.eup %8397  ;;  %v5394_v54 = vadd.f32 1.0, %v8396_v59  ;;  %8415 = vpow2.f32 %v6770_v50  ;;  %v10101_v24 = vadd.f32 %v5082_v0, %v10007_v34  ;;  %v5084_v20 = vpop.f32.mrb[86].mxu0  ;;  %v5640_v18 = vpack.c.bf16 %v5580_v13, %v5578_v29 }
 0x46d   : > { %v8400_v35 = vpop.eup %8399  ;;  %8417 = vrcp.f32 %v5393_v62  ;;  %v5395_v42 = vadd.f32 1.0, %v8398_v10  ;;  %v6771_v25 = vmul.f32 -1.442695, %v10098_v51  ;;  %v10105_v63 = vadd.f32 %v5084_v20, %v10003_v52  ;;  %v5086_v36 = vpop.f32.mrb[87].mxu0 }
 0x46e   : > { %8419 = vrcp.f32 %v5394_v54  ;;  %v5396_v5 = vadd.f32 1.0, %v8400_v35  ;;  %v6772_v2 = vmul.f32 -1.442695, %v10101_v24  ;;  %v10109_v55 = vadd.f32 %v5086_v36, %v10007_v34  ;;  %5844 = vmatprep.mubr.bf16.mxu1 %v5640_v18 }
 0x46f   : > { %v8402_v53 = vpop.eup %8401  ;;  %8421 = vrcp.f32 %v5395_v42  ;;  %v6773_v39 = vmul.f32 -1.442695, %v10105_v63  ;;  %5845 = vmatmul.mubr.bf16.gmra.mrb[100].mxu1 %v5639_v43 }
 0x470   : > { %v8404_v21 = vpop.eup %8403  ;;  %8423 = vrcp.f32 %v5396_v5  ;;  %v6774_v11 = vmul.f32 -1.442695, %v10109_v55  ;;  %v5581_v26 = vmul.f32 %v8402_v53, %v10042_v16 }
 0x471   : > { %v8406_v57 = vpop.eup %8405  ;;  %8425 = vpow2.f32 %v6771_v25  ;;  %v5582_v40 = vmul.f32 %v8404_v21, %v10045_v47 }
 0x472   : > { %v8408_v22 = vpop.eup %8407  ;;  %v5583_v41 = vmul.f32 %v8406_v57, %v10049_v30  ;;  %8427 = vpow2.f32 %v6772_v2  ;;  %v5090_v4 = vpop.f32.mrb[88].mxu0 }
 0x473   : > { %v8410_v31 = vpop.eup %8409  ;;  %v5584_v45 = vmul.f32 %v8408_v22, %v10053_v8  ;;  %8429 = vpow2.f32 %v6773_v39  ;;  %v10118_v7 = vadd.f32 %v5090_v4, %v10003_v52  ;;  %v5092_v17 = vpop.f32.mrb[89].mxu0 }
 0x474   : > { %v8412_v58 = vpop.eup %8411  ;;  %v5397_v37 = vadd.f32 1.0, %v8410_v31  ;;  %8431 = vpow2.f32 %v6774_v11  ;;  %v10121_v48 = vadd.f32 %v5092_v17, %v10007_v34  ;;  %v5094_v16 = vpop.f32.mrb[90].mxu0  ;;  %v5641_v30 = vpack.c.bf16 %v5583_v41, %v5581_v26 }
 0x475   : > { %v8414_v12 = vpop.eup %8413  ;;  %v5398_v6 = vadd.f32 1.0, %v8412_v58  ;;  %v10124_v14 = vadd.f32 %v5094_v16, %v10003_v52  ;;  %v5096_v47 = vpop.f32.mrb[91].mxu0  ;;  %v5642_v8 = vpack.c.bf16 %v5584_v45, %v5582_v40  ;;  %v6775_v9 = vmul.f32 -1.442695, %v10118_v7 }
 0x476   : > { %v8416_v46 = vpop.eup %8415  ;;  %8433 = vrcp.f32 %v5397_v37  ;;  %v5399_v49 = vadd.f32 1.0, %v8414_v12  ;;  %v10128_v56 = vadd.f32 %v5096_v47, %v10007_v34  ;;  %v6776_v15 = vmul.f32 -1.442695, %v10121_v48 }
 0x477   : > { %v8418_v50 = vpop.eup %8417  ;;  %8435 = vrcp.f32 %v5398_v6  ;;  %v5400_v33 = vadd.f32 1.0, %v8416_v46  ;;  %5852 = vmatprep.mubr.bf16.mxu1 %v5642_v8  ;;  %v6777_v32 = vmul.f32 -1.442695, %v10124_v14 }
 0x478   : > { %v8420_v60 = vpop.eup %8419  ;;  %8437 = vrcp.f32 %v5399_v49  ;;  %5853 = vmatmul.mubr.bf16.gmra.mrb[104].mxu1 %v5641_v30  ;;  %v6778_v13 = vmul.f32 -1.442695, %v10128_v56  ;;  %v5585_v59 = vmul.f32 %v8418_v50, %v10058_v38 }
 0x479   : > { %v8422_v29 = vpop.eup %8421  ;;  %8439 = vrcp.f32 %v5400_v33 }
 0x47a   : > { %v8424_v44 = vpop.eup %8423  ;;  %v5587_v62 = vmul.f32 %v8422_v29, %v10065_v61  ;;  %8441 = vpow2.f32 %v6775_v9  ;;  %v5100_v0 = vpop.f32.mrb[92].mxu0  ;;  %v5586_v61 = vmul.f32 %v8420_v60, %v10061_v23 }
 0x47b   : > { %v8426_v43 = vpop.eup %8425  ;;  %v5588_v10 = vmul.f32 %v8424_v44, %v10069_v19  ;;  %8443 = vpow2.f32 %v6776_v15  ;;  %v10137_v54 = vadd.f32 %v5100_v0, %v10003_v52  ;;  %v5102_v20 = vpop.f32.mrb[93].mxu0 }
 0x47c   : > { %v8428_v18 = vpop.eup %8427  ;;  %v5401_v35 = vadd.f32 1.0, %v8426_v43  ;;  %8445 = vpow2.f32 %v6777_v32  ;;  %v10140_v42 = vadd.f32 %v5102_v20, %v10007_v34  ;;  %v5104_v25 = vpop.f32.mrb[94].mxu0  ;;  %v5643_v38 = vpack.c.bf16 %v5587_v62, %v5585_v59 }
 0x47d   : > { %v8430_v36 = vpop.eup %8429  ;;  %v5402_v5 = vadd.f32 1.0, %v8428_v18  ;;  %8447 = vpow2.f32 %v6778_v13  ;;  %v10144_v19 = vadd.f32 %v5104_v25, %v10003_v52  ;;  %v5106_v2 = vpop.f32.mrb[95].mxu0  ;;  %v6779_v21 = vmul.f32 -1.442695, %v10137_v54 }
 0x47e   : > { %v8432_v53 = vpop.eup %8431  ;;  %8449 = vrcp.f32 %v5401_v35  ;;  %v5403_v39 = vadd.f32 1.0, %v8430_v36  ;;  %v10148_v11 = vadd.f32 %v5106_v2, %v10007_v34  ;;  %v6780_v22 = vmul.f32 -1.442695, %v10140_v42 }
 0x47f   : > { %8451 = vrcp.f32 %v5402_v5  ;;  %v5404_v57 = vadd.f32 1.0, %v8432_v53  ;;  %v5644_v26 = vpack.c.bf16 %v5588_v10, %v5586_v61  ;;  %v6781_v41 = vmul.f32 -1.442695, %v10144_v19 }
 0x480   : > { %v8434_v23 = vpop.eup %8433  ;;  %8453 = vrcp.f32 %v5403_v39  ;;  %v6782_v31 = vmul.f32 -1.442695, %v10148_v11 }
 0x481   : > { %v8436_v4 = vpop.eup %8435  ;;  %8455 = vrcp.f32 %v5404_v57  ;;  %5860 = vmatprep.mubr.bf16.mxu1 %v5644_v26  ;;  %v5589_v49 = vmul.f32 %v8434_v23, %v10078_v27 }
 0x482   : > { %v8438_v40 = vpop.eup %8437  ;;  %8457 = vpow2.f32 %v6779_v21  ;;  %5861 = vmatmul.mubr.bf16.gmra.mrb[108].mxu1 %v5643_v38  ;;  %v5110_v45 = vpop.f32.mrb[96].mxu0  ;;  %v5590_v12 = vmul.f32 %v8436_v4, %v10081_v1 }
 0x483   : > { %v8440_v17 = vpop.eup %8439  ;;  %v5591_v58 = vmul.f32 %v8438_v40, %v10085_v3  ;;  %8459 = vpow2.f32 %v6780_v22  ;;  %v10155_v37 = vadd.f32 %v5110_v45, %v10003_v52  ;;  %v5112_v16 = vpop.f32.mrb[97].mxu0 }
 0x484   : > { %v8442_v30 = vpop.eup %8441  ;;  %v5592_v6 = vmul.f32 %v8440_v17, %v10089_v28  ;;  %8461 = vpow2.f32 %v6781_v41  ;;  %v10160_v47 = vadd.f32 %v5112_v16, %v10007_v34  ;;  %v5114_v8 = vpop.f32.mrb[98].mxu0 }
 0x485   : > { %v8444_v46 = vpop.eup %8443  ;;  %v5405_v9 = vadd.f32 1.0, %v8442_v30  ;;  %8463 = vpow2.f32 %v6782_v31  ;;  %v10164_v3 = vadd.f32 %v5114_v8, %v10003_v52  ;;  %v5116_v50 = vpop.f32.mrb[99].mxu0  ;;  %v6783_v29 = vmul.f32 -1.442695, %v10155_v37 }
 0x486   : > { %v8446_v33 = vpop.eup %8445  ;;  %v5406_v15 = vadd.f32 1.0, %v8444_v46  ;;  %v10167_v1 = vadd.f32 %v5116_v50, %v10007_v34  ;;  %v5646_v28 = vpack.c.bf16 %v5592_v6, %v5590_v12  ;;  %v5645_v13 = vpack.c.bf16 %v5591_v58, %v5589_v49 }
 0x487   : > { %v8448_v60 = vpop.eup %8447  ;;  %8465 = vrcp.f32 %v5405_v9  ;;  %v5407_v32 = vadd.f32 1.0, %v8446_v33  ;;  %v6784_v59 = vmul.f32 -1.442695, %v10160_v47  ;;  %v6785_v0 = vmul.f32 -1.442695, %v10164_v3 }
 0x488   : > { %v8450_v44 = vpop.eup %8449  ;;  %8467 = vrcp.f32 %v5406_v15  ;;  %v5408_v27 = vadd.f32 1.0, %v8448_v60  ;;  %5868 = vmatprep.mubr.bf16.mxu1 %v5646_v28  ;;  %v6786_v10 = vmul.f32 -1.442695, %v10167_v1 }
 0x489   : > { %v8452_v62 = vpop.eup %8451  ;;  %8469 = vrcp.f32 %v5407_v32  ;;  %v5593_v23 = vmul.f32 %v8450_v44, %v10098_v51 }
 0x48a   : > { %v8454_v43 = vpop.eup %8453  ;;  %8471 = vrcp.f32 %v5408_v27  ;;  %5869 = vmatmul.mubr.bf16.gmra.mrb[112].mxu1 %v5645_v13  ;;  %v5120_v20 = vpop.f32.mrb[100].mxu0  ;;  %v5594_v39 = vmul.f32 %v8452_v62, %v10101_v24 }
 0x48b   : > { %v8456_v18 = vpop.eup %8455  ;;  %8473 = vpow2.f32 %v6783_v29  ;;  %v10174_v35 = vadd.f32 %v5120_v20, %v10003_v52  ;;  %v5122_v25 = vpop.f32.mrb[101].mxu0  ;;  %v5595_v36 = vmul.f32 %v8454_v43, %v10105_v63 }
 0x48c   : > { %v8458_v38 = vpop.eup %8457  ;;  %v5596_v61 = vmul.f32 %v8456_v18, %v10109_v55  ;;  %8475 = vpow2.f32 %v6784_v59  ;;  %v10179_v5 = vadd.f32 %v5122_v25, %v10007_v34  ;;  %v5124_v2 = vpop.f32.mrb[102].mxu0 }
 0x48d   : > { %v8460_v53 = vpop.eup %8459  ;;  %v5409_v21 = vadd.f32 1.0, %v8458_v38  ;;  %8477 = vpow2.f32 %v6785_v0  ;;  %v10183_v57 = vadd.f32 %v5124_v2, %v10003_v52  ;;  %v5126_v22 = vpop.f32.mrb[103].mxu0  ;;  %v6787_v31 = vmul.f32 -1.442695, %v10174_v35 }
 0x48e   : > { %v8462_v26 = vpop.eup %8461  ;;  %v5410_v63 = vadd.f32 1.0, %v8460_v53  ;;  %8479 = vpow2.f32 %v6786_v10  ;;  %v10187_v55 = vadd.f32 %v5126_v22, %v10007_v34  ;;  %v5648_v24 = vpack.c.bf16 %v5596_v61, %v5594_v39 }
 0x48f   : > { %v8464_v41 = vpop.eup %8463  ;;  %8481 = vrcp.f32 %v5409_v21  ;;  %v5411_v4 = vadd.f32 1.0, %v8462_v26  ;;  %v6788_v45 = vmul.f32 -1.442695, %v10179_v5  ;;  %v5647_v17 = vpack.c.bf16 %v5595_v36, %v5593_v23 }
 0x490   : > { %8483 = vrcp.f32 %v5410_v63  ;;  %v5412_v40 = vadd.f32 1.0, %v8464_v41  ;;  %v6789_v51 = vmul.f32 -1.442695, %v10183_v57  ;;  %5876 = vmatprep.mubr.bf16.mxu1 %v5648_v24  ;;  %v6790_v30 = vmul.f32 -1.442695, %v10187_v55 }
 0x491   : > { %v8466_v58 = vpop.eup %8465  ;;  %8485 = vrcp.f32 %v5411_v4 }
 0x492   : > { %v8468_v16 = vpop.eup %8467  ;;  %8487 = vrcp.f32 %v5412_v40  ;;  %5877 = vmatmul.mubr.bf16.gmra.mrb[116].mxu1 %v5647_v17  ;;  %v5130_v12 = vpop.f32.mrb[104].mxu0 }
 0x493   : > { %v8470_v6 = vpop.eup %8469  ;;  %8489 = vpow2.f32 %v6787_v31  ;;  %v10194_v8 = vadd.f32 %v5130_v12, %v10003_v52  ;;  %v5132_v46 = vpop.f32.mrb[105].mxu0  ;;  %v5598_v9 = vmul.f32 %v8468_v16, %v10121_v48  ;;  %v5597_v48 = vmul.f32 %v8466_v58, %v10118_v7 }
 0x494   : > { %v8472_v49 = vpop.eup %8471  ;;  %v5599_v50 = vmul.f32 %v8470_v6, %v10124_v14  ;;  %8491 = vpow2.f32 %v6788_v45  ;;  %v10199_v33 = vadd.f32 %v5132_v46, %v10007_v34  ;;  %v5134_v15 = vpop.f32.mrb[106].mxu0 }
 0x495   : > { %v8474_v28 = vpop.eup %8473  ;;  %v5600_v60 = vmul.f32 %v8472_v49, %v10128_v56  ;;  %8493 = vpow2.f32 %v6789_v51  ;;  %v6791_v32 = vmul.f32 -1.442695, %v10194_v8  ;;  %v10204_v29 = vadd.f32 %v5134_v15, %v10003_v52  ;;  %v5136_v13 = vpop.f32.mrb[107].mxu0 }
 0x496   : > { %v8476_v44 = vpop.eup %8475  ;;  %v5413_v27 = vadd.f32 1.0, %v8474_v28  ;;  %8495 = vpow2.f32 %v6790_v30  ;;  %v10208_v14 = vadd.f32 %v5136_v13, %v10007_v34  ;;  %v6792_v10 = vmul.f32 -1.442695, %v10199_v33 }
 0x497   : > { %v8478_v59 = vpop.eup %8477  ;;  %v5414_v62 = vadd.f32 1.0, %v8476_v44  ;;  %8497 = vpow2.f32 %v6791_v32  ;;  %v5650_v0 = vpack.c.bf16 %v5600_v60, %v5598_v9  ;;  %v5649_v20 = vpack.c.bf16 %v5599_v50, %v5597_v48 }
 0x498   : > { %v8480_v56 = vpop.eup %8479  ;;  %8499 = vrcp.f32 %v5413_v27  ;;  %v5415_v43 = vadd.f32 1.0, %v8478_v59  ;;  %v6793_v7 = vmul.f32 -1.442695, %v10204_v29  ;;  %v6794_v36 = vmul.f32 -1.442695, %v10208_v14 }
 0x499   : > { %v8482_v18 = vpop.eup %8481  ;;  %8501 = vrcp.f32 %v5414_v62  ;;  %v5416_v25 = vadd.f32 1.0, %v8480_v56  ;;  %5884 = vmatprep.mubr.bf16.mxu1 %v5650_v0 }
 0x49a   : > { %v8484_v38 = vpop.eup %8483  ;;  %8503 = vrcp.f32 %v5415_v43  ;;  %5885 = vmatmul.mubr.bf16.gmra.mrb[120].mxu1 %v5649_v20  ;;  %v5140_v61 = vpop.f32.mrb[108].mxu0  ;;  %v5601_v45 = vmul.f32 %v8482_v18, %v10137_v54 }
 0x49b   : > { %v8486_v2 = vpop.eup %8485  ;;  %8505 = vrcp.f32 %v5416_v25  ;;  %v10214_v53 = vadd.f32 %v5140_v61, %v10003_v52  ;;  %v5142_v39 = vpop.f32.mrb[109].mxu0  ;;  %v5602_v22 = vmul.f32 %v8484_v38, %v10140_v42 }
 0x49c   : > { %v8488_v21 = vpop.eup %8487  ;;  %v5603_v26 = vmul.f32 %v8486_v2, %v10144_v19  ;;  %8507 = vpow2.f32 %v6792_v10  ;;  %v5144_v23 = vpop.f32.mrb[110].mxu0  ;;  %v10221_v31 = vadd.f32 %v5142_v39, %v10007_v34 }
 0x49d   : > { %v8490_v63 = vpop.eup %8489  ;;  %v5604_v41 = vmul.f32 %v8488_v21, %v10148_v11  ;;  %8509 = vpow2.f32 %v6793_v7  ;;  %v6795_v4 = vmul.f32 -1.442695, %v10214_v53  ;;  %v5146_v24 = vpop.f32.mrb[111].mxu0  ;;  %v10225_v42 = vadd.f32 %v5144_v23, %v10003_v52 }
 0x49e   : > { %v8492_v40 = vpop.eup %8491  ;;  %v5417_v17 = vadd.f32 1.0, %v8490_v63  ;;  %8511 = vpow2.f32 %v6794_v36  ;;  %v10228_v11 = vadd.f32 %v5146_v24, %v10007_v34  ;;  %v5651_v12 = vpack.c.bf16 %v5603_v26, %v5601_v45 }
 0x49f   : > { %v8494_v19 = vpop.eup %8493  ;;  %v5418_v58 = vadd.f32 1.0, %v8492_v40  ;;  %8513 = vpow2.f32 %v6795_v4  ;;  %v5652_v51 = vpack.c.bf16 %v5604_v41, %v5602_v22  ;;  %v6796_v54 = vmul.f32 -1.442695, %v10221_v31 }
 0x4a0   : > { %v8496_v16 = vpop.eup %8495  ;;  %8515 = vrcp.f32 %v5417_v17  ;;  %v5419_v30 = vadd.f32 1.0, %v8494_v19  ;;  %v6797_v50 = vmul.f32 -1.442695, %v10225_v42  ;;  %v6798_v60 = vmul.f32 -1.442695, %v10228_v11 }
 0x4a1   : > { %v8498_v6 = vpop.eup %8497  ;;  %8517 = vrcp.f32 %v5418_v58  ;;  %v5420_v46 = vadd.f32 1.0, %v8496_v16  ;;  %5892 = vmatprep.mubr.bf16.mxu1 %v5652_v51 }
 0x4a2   : > { %v8500_v49 = vpop.eup %8499  ;;  %8519 = vrcp.f32 %v5419_v30  ;;  %v5421_v9 = vadd.f32 1.0, %v8498_v6  ;;  %5893 = vmatmul.mubr.bf16.gmra.mrb[124].mxu1 %v5651_v12  ;;  %v5150_v15 = vpop.f32.mrb[112].mxu0 }
 0x4a3   : > { %v8502_v28 = vpop.eup %8501  ;;  %8521 = vrcp.f32 %v5420_v46  ;;  %v10234_v32 = vadd.f32 %v5150_v15, %v10003_v52  ;;  %v5152_v13 = vpop.f32.mrb[113].mxu0  ;;  %v5605_v48 = vmul.f32 %v8500_v49, %v10155_v37 }
 0x4a4   : > { %v8504_v44 = vpop.eup %8503  ;;  %8523 = vrcp.f32 %v5421_v9  ;;  %v5154_v27 = vpop.f32.mrb[114].mxu0  ;;  %v10240_v56 = vadd.f32 %v5152_v13, %v10007_v34  ;;  %v5606_v20 = vmul.f32 %v8502_v28, %v10160_v47 }
 0x4a5   : > { %v8506_v59 = vpop.eup %8505  ;;  %v5607_v62 = vmul.f32 %v8504_v44, %v10164_v3  ;;  %8525 = vpow2.f32 %v6796_v54  ;;  %v6799_v0 = vmul.f32 -1.442695, %v10234_v32  ;;  %v5156_v43 = vpop.f32.mrb[115].mxu0  ;;  %v10245_v37 = vadd.f32 %v5154_v27, %v10003_v52 }
 0x4a6   : > { %v8508_v10 = vpop.eup %8507  ;;  %v5608_v18 = vmul.f32 %v8506_v59, %v10167_v1  ;;  %8527 = vpow2.f32 %v6797_v50  ;;  %v10248_v3 = vadd.f32 %v5156_v43, %v10007_v34  ;;  %v6800_v1 = vmul.f32 -1.442695, %v10240_v56 }
 0x4a7   : > { %v8510_v25 = vpop.eup %8509  ;;  %v5422_v7 = vadd.f32 1.0, %v8508_v10  ;;  %8529 = vpow2.f32 %v6798_v60  ;;  %v5653_v38 = vpack.c.bf16 %v5607_v62, %v5605_v48  ;;  %v6801_v26 = vmul.f32 -1.442695, %v10245_v37 }
 0x4a8   : > { %v8512_v36 = vpop.eup %8511  ;;  %v5423_v61 = vadd.f32 1.0, %v8510_v25  ;;  %8531 = vpow2.f32 %v6799_v0  ;;  %v5654_v2 = vpack.c.bf16 %v5608_v18, %v5606_v20  ;;  %v6802_v41 = vmul.f32 -1.442695, %v10248_v3 }
 0x4a9   : > { %v8514_v39 = vpop.eup %8513  ;;  %8533 = vrcp.f32 %v5422_v7  ;;  %v5424_v47 = vadd.f32 1.0, %v8512_v36 }
 0x4aa   : > { %v8516_v21 = vpop.eup %8515  ;;  %8535 = vrcp.f32 %v5423_v61  ;;  %v5425_v22 = vadd.f32 1.0, %v8514_v39  ;;  %5900 = vmatprep.mubr.bf16.mxu1 %v5654_v2  ;;  %v5160_v23 = vpop.f32.mrb[116].mxu0 }
 0x4ab   : > { %v8518_v63 = vpop.eup %8517  ;;  %8537 = vrcp.f32 %v5424_v47  ;;  %5901 = vmatmul.mubr.bf16.gmra.mrb[128].mxu1 %v5653_v38  ;;  %v10254_v4 = vadd.f32 %v5160_v23, %v10003_v52  ;;  %v5162_v24 = vpop.f32.mrb[117].mxu0  ;;  %v5609_v45 = vmul.f32 %v8516_v21, %v10174_v35 }
 0x4ac   : > { %v8520_v40 = vpop.eup %8519  ;;  %8539 = vrcp.f32 %v5425_v22  ;;  %v10258_v17 = vadd.f32 %v5162_v24, %v10007_v34  ;;  %v5164_v19 = vpop.f32.mrb[118].mxu0  ;;  %v5610_v51 = vmul.f32 %v8518_v63, %v10179_v5 }
 0x4ad   : > { %v8522_v58 = vpop.eup %8521  ;;  %v5611_v16 = vmul.f32 %v8520_v40, %v10183_v57  ;;  %8541 = vpow2.f32 %v6800_v1  ;;  %v6803_v30 = vmul.f32 -1.442695, %v10254_v4  ;;  %v5166_v12 = vpop.f32.mrb[119].mxu0  ;;  %v10266_v54 = vadd.f32 %v5164_v19, %v10003_v52 }
 0x4ae   : > { %v8524_v6 = vpop.eup %8523  ;;  %v5612_v46 = vmul.f32 %v8522_v58, %v10187_v55  ;;  %8543 = vpow2.f32 %v6801_v26  ;;  %v6804_v35 = vmul.f32 -1.442695, %v10258_v17  ;;  %v10269_v9 = vadd.f32 %v5166_v12, %v10007_v34 }
 0x4af   : > { %v8526_v49 = vpop.eup %8525  ;;  %8545 = vpow2.f32 %v6802_v41  ;;  %v5655_v5 = vpack.c.bf16 %v5611_v16, %v5609_v45  ;;  %v6805_v44 = vmul.f32 -1.442695, %v10266_v54  ;;  %v5613_v7 = vmul.f32 %v8524_v6, %v10194_v8 }
 0x4b0   : > { %v8528_v57 = vpop.eup %8527  ;;  %v5426_v50 = vadd.f32 1.0, %v8526_v49  ;;  %8547 = vpow2.f32 %v6803_v30  ;;  %v5656_v15 = vpack.c.bf16 %v5612_v46, %v5610_v51  ;;  %v6806_v62 = vmul.f32 -1.442695, %v10269_v9 }
 0x4b1   : > { %v8530_v28 = vpop.eup %8529  ;;  %v5427_v60 = vadd.f32 1.0, %v8528_v57  ;;  %8549 = vpow2.f32 %v6804_v35 }
 0x4b2   : > { %v8532_v55 = vpop.eup %8531  ;;  %8551 = vrcp.f32 %v5426_v50  ;;  %v5428_v13 = vadd.f32 1.0, %v8530_v28  ;;  %5908 = vmatprep.mubr.bf16.mxu1 %v5656_v15  ;;  %v5170_v48 = vpop.f32.mrb[120].mxu0 }
 0x4b3   : > { %v8534_v27 = vpop.eup %8533  ;;  %8553 = vrcp.f32 %v5427_v60  ;;  %v5429_v59 = vadd.f32 1.0, %v8532_v55  ;;  %5909 = vmatmul.mubr.bf16.gmra.mrb[132].mxu1 %v5655_v5  ;;  %v10274_v0 = vadd.f32 %v5170_v48, %v10003_v52  ;;  %v5172_v43 = vpop.f32.mrb[121].mxu0 }
 0x4b4   : > { %v8536_v10 = vpop.eup %8535  ;;  %8555 = vrcp.f32 %v5428_v13  ;;  %v10277_v20 = vadd.f32 %v5172_v43, %v10007_v34  ;;  %v5174_v18 = vpop.f32.mrb[122].mxu0  ;;  %v5614_v39 = vmul.f32 %v8534_v27, %v10199_v33 }
 0x4b5   : > { %v8538_v25 = vpop.eup %8537  ;;  %v5615_v38 = vmul.f32 %v8536_v10, %v10204_v29  ;;  %8557 = vrcp.f32 %v5429_v59  ;;  %v6807_v36 = vmul.f32 -1.442695, %v10274_v0  ;;  %v5176_v61 = vpop.f32.mrb[123].mxu0  ;;  %v10286_v22 = vadd.f32 %v5174_v18, %v10003_v52 }
 0x4b6   : > { %v8540_v2 = vpop.eup %8539  ;;  %v5616_v47 = vmul.f32 %v8538_v25, %v10208_v14  ;;  %8559 = vpow2.f32 %v6805_v44  ;;  %v6808_v1 = vmul.f32 -1.442695, %v10277_v20  ;;  %v10289_v23 = vadd.f32 %v5176_v61, %v10007_v34 }
 0x4b7   : > { %v8542_v21 = vpop.eup %8541  ;;  %8561 = vpow2.f32 %v6806_v62  ;;  %v5657_v8 = vpack.c.bf16 %v5615_v38, %v5613_v7  ;;  %v6809_v58 = vmul.f32 -1.442695, %v10286_v22  ;;  %v5617_v15 = vmul.f32 %v8540_v2, %v10214_v53 }
 0x4b8   : > { %v8544_v26 = vpop.eup %8543  ;;  %v5430_v29 = vadd.f32 1.0, %v8542_v21  ;;  %8563 = vpow2.f32 %v6807_v36  ;;  %v5658_v63 = vpack.c.bf16 %v5616_v47, %v5614_v39  ;;  %v6810_v6 = vmul.f32 -1.442695, %v10289_v23 }
 0x4b9   : > { %v8546_v41 = vpop.eup %8545  ;;  %v5431_v33 = vadd.f32 1.0, %v8544_v26  ;;  %8565 = vpow2.f32 %v6808_v1 }
 0x4ba   : > { %v8548_v14 = vpop.eup %8547  ;;  %8567 = vrcp.f32 %v5430_v29  ;;  %v5432_v24 = vadd.f32 1.0, %v8546_v41  ;;  %5916 = vmatprep.mubr.bf16.mxu1 %v5658_v63  ;;  %v5180_v40 = vpop.f32.mrb[124].mxu0 }
 0x4bb   : > { %v8550_v45 = vpop.eup %8549  ;;  %8569 = vrcp.f32 %v5431_v33  ;;  %v5433_v19 = vadd.f32 1.0, %v8548_v14  ;;  %5917 = vmatmul.mubr.bf16.gmra.mrb[136].mxu1 %v5657_v8  ;;  %v10293_v51 = vadd.f32 %v5180_v40, %v10003_v52  ;;  %v5182_v16 = vpop.f32.mrb[125].mxu0 }
 0x4bc   : > { %v8552_v30 = vpop.eup %8551  ;;  %8571 = vrcp.f32 %v5432_v24  ;;  %v5434_v12 = vadd.f32 1.0, %v8550_v45  ;;  %v10297_v46 = vadd.f32 %v5182_v16, %v10007_v34  ;;  %v5184_v35 = vpop.f32.mrb[126].mxu0 }
 0x4bd   : > { %v8554_v49 = vpop.eup %8553  ;;  %8573 = vrcp.f32 %v5433_v19  ;;  %v6811_v5 = vmul.f32 -1.442695, %v10293_v51  ;;  %v5186_v57 = vpop.f32.mrb[127].mxu0  ;;  %v5618_v13 = vmul.f32 %v8552_v30, %v10221_v31  ;;  %v10306_v48 = vadd.f32 %v5184_v35, %v10003_v52 }
 0x4be   : > { %v8556_v50 = vpop.eup %8555  ;;  %v5619_v28 = vmul.f32 %v8554_v49, %v10225_v42  ;;  %8575 = vrcp.f32 %v5434_v12  ;;  %v6812_v60 = vmul.f32 -1.442695, %v10297_v46  ;;  %v10309_v59 = vadd.f32 %v5186_v57, %v10007_v34 }
 0x4bf   : > { %v8558_v55 = vpop.eup %8557  ;;  %v5620_v44 = vmul.f32 %v8556_v50, %v10228_v11  ;;  %8577 = vpow2.f32 %v6809_v58  ;;  %v6813_v11 = vmul.f32 -1.442695, %v10306_v48 }
 0x4c0   : > { %v8560_v27 = vpop.eup %8559  ;;  %8579 = vpow2.f32 %v6810_v6  ;;  %v5659_v53 = vpack.c.bf16 %v5619_v28, %v5617_v15  ;;  %v6814_v25 = vmul.f32 -1.442695, %v10309_v59  ;;  %v5621_v38 = vmul.f32 %v8558_v55, %v10234_v32 }
 0x4c1   : > { %v8562_v62 = vpop.eup %8561  ;;  %v5435_v42 = vadd.f32 1.0, %v8560_v27  ;;  %8581 = vpow2.f32 %v6811_v5  ;;  %v5660_v43 = vpack.c.bf16 %v5620_v44, %v5618_v13 }
 0x4c2   : > { %v8564_v10 = vpop.eup %8563  ;;  %v5436_v18 = vadd.f32 1.0, %v8562_v62  ;;  %8583 = vpow2.f32 %v6812_v60 }
 0x4c3   : > { %v8566_v31 = vpop.eup %8565  ;;  %8585 = vrcp.f32 %v5435_v42  ;;  %5924 = vmatprep.mubr.bf16.mxu1 %v5660_v43  ;;  %v5437_v61 = vadd.f32 1.0, %v8564_v10  ;;  %v10332_v43 = vld [vmem:[%s10562_s6] ss:$0 sm:$0xff] }
 0x4c4   : > { %v8568_v52 = vpop.eup %8567  ;;  %8587 = vrcp.f32 %v5436_v18  ;;  %5925 = vmatmul.mubr.bf16.gmra.mrb[140].mxu1 %v5659_v53  ;;  %v5438_v1 = vadd.f32 1.0, %v8566_v31 }
 0x4c5   : > { %v8570_v34 = vpop.eup %8569  ;;  %v5622_v39 = vmul.f32 %v8568_v52, %v10240_v56  ;;  %8589 = vpow2.f32 %v6813_v11 }
 0x4c6   : > { %v8572_v7 = vpop.eup %8571  ;;  %v5623_v36 = vmul.f32 %v8570_v34, %v10245_v37  ;;  %8591 = vpow2.f32 %v6814_v25 }
 0x4c7   : > { %v8574_v2 = vpop.eup %8573  ;;  %v5624_v47 = vmul.f32 %v8572_v7, %v10248_v3  ;;  %8593 = vrcp.f32 %v5437_v61 }
 0x4c8   : > { %v8576_v21 = vpop.eup %8575  ;;  %v5661_v8 = vpack.c.bf16 %v5623_v36, %v5621_v38  ;;  %8595 = vrcp.f32 %v5438_v1  ;;  %v5625_v14 = vmul.f32 %v8574_v2, %v10254_v4 }
 0x4c9   : > { %v8578_v26 = vpop.eup %8577  ;;  %v5662_v29 = vpack.c.bf16 %v5624_v47, %v5622_v39  ;;  %v5626_v45 = vmul.f32 %v8576_v21, %v10258_v17 }
 0x4ca   : > { %v8580_v63 = vpop.eup %8579  ;;  %v5439_v41 = vadd.f32 1.0, %v8578_v26 }
 0x4cb   : > { %v8582_v33 = vpop.eup %8581  ;;  %v5440_v32 = vadd.f32 1.0, %v8580_v63  ;;  %5932 = vmatprep.mubr.bf16.mxu1 %v5662_v29 }
 0x4cc   : > { %v8584_v37 = vpop.eup %8583  ;;  %8597 = vrcp.f32 %v5439_v41  ;;  %5933 = vmatmul.mubr.bf16.gmra.mrb[144].mxu1 %v5661_v8  ;;  %v5441_v40 = vadd.f32 1.0, %v8582_v33 }
 0x4cd   : > { %v8586_v56 = vpop.eup %8585  ;;  %8599 = vrcp.f32 %v5440_v32  ;;  %v5442_v58 = vadd.f32 1.0, %v8584_v37 }
 0x4ce   : > { %v8588_v3 = vpop.eup %8587  ;;  %v5627_v24 = vmul.f32 %v8586_v56, %v10266_v54  ;;  %8601 = vrcp.f32 %v5441_v40 }
 0x4cf   : > { %v5628_v19 = vmul.f32 %v8588_v3, %v10269_v9  ;;  %v8590_v30 = vpop.eup %8589  ;;  %8603 = vrcp.f32 %v5442_v58 }
 0x4d0   : > { %v5663_v16 = vpack.c.bf16 %v5627_v24, %v5625_v14  ;;  %v8592_v6 = vpop.eup %8591  ;;  %v5443_v35 = vadd.f32 1.0, %v8590_v30 }
 0x4d1   : > { %v5664_v12 = vpack.c.bf16 %v5628_v19, %v5626_v45  ;;  %v5444_v49 = vadd.f32 1.0, %v8592_v6  ;;  %v8594_v5 = vpop.eup %8593 }
 0x4d2   : > { %8605 = vrcp.f32 %v5443_v35  ;;  %v8596_v4 = vpop.eup %8595  ;;  %v5629_v17 = vmul.f32 %v8594_v5, %v10274_v0 }
 0x4d3   : > { %5940 = vmatprep.mubr.bf16.mxu1 %v5664_v12  ;;  %8607 = vrcp.f32 %v5444_v49  ;;  %v5630_v50 = vmul.f32 %v8596_v4, %v10277_v20 }
 0x4d4   : > { %5941 = vmatmul.mubr.bf16.gmra.mrb[148].mxu1 %v5663_v16 }
 0x4d6   : > { %v8598_v54 = vpop.eup %8597 }
 0x4d7   : > { %v8600_v57 = vpop.eup %8599  ;;  %v5631_v9 = vmul.f32 %v8598_v54, %v10286_v22 }
 0x4d8   : > { %v5632_v15 = vmul.f32 %v8600_v57, %v10289_v23  ;;  %v8602_v55 = vpop.eup %8601 }
 0x4d9   : > { %v5665_v28 = vpack.c.bf16 %v5631_v9, %v5629_v17  ;;  %v8604_v13 = vpop.eup %8603  ;;  %v5633_v53 = vmul.f32 %v8602_v55, %v10293_v51 }
 0x4da   : > { %v5666_v60 = vpack.c.bf16 %v5632_v15, %v5630_v50  ;;  %v5634_v0 = vmul.f32 %v8604_v13, %v10297_v46 }
 0x4dc   : > { %5948 = vmatprep.mubr.bf16.mxu1 %v5666_v60  ;;  %v8606_v44 = vpop.eup %8605 }
 0x4dd   : > { %5949 = vmatmul.mubr.bf16.gmra.mrb[152].mxu1 %v5665_v28  ;;  %v8608_v27 = vpop.eup %8607  ;;  %v5635_v62 = vmul.f32 %v8606_v44, %v10306_v48 }
 0x4de   : > { %v5636_v22 = vmul.f32 %v8608_v27, %v10309_v59 }
 0x4df   : > { %v5667_v42 = vpack.c.bf16 %v5635_v62, %v5633_v53 }
 0x4e0   : > { %v5668_v20 = vpack.c.bf16 %v5636_v22, %v5634_v0 }
 0x4e2   : > { %5956 = vmatprep.mubr.bf16.mxu1 %v5668_v20 }
 0x4e5   : > { %5957 = vmatmul.mubr.bf16.gmra.mrb[156].mxu1 %v5667_v42 }
 0x53a   : > { %v6886_v23 = vpop.f32.mrb[96].mxu1 }
 0x53b   : > { %v6887_v10 = vpop.f32.mrb[97].mxu1 }
 0x53c   : > { %v6888_v18 = vadd.f32 %v6887_v10, %v6886_v23  ;;  %v6889_v31 = vpop.f32.mrb[98].mxu1 }
 0x53d   : > { %v6890_v51 = vpop.f32.mrb[99].mxu1 }
 0x53e   : > { %v5839_v48 = vadd.f32 %v6888_v18, %v10332_v43  ;;  %v6891_v11 = vadd.f32 %v6890_v51, %v6889_v31 }
 0x540   : > { %v6832_v46 = vmul.f32 -1.442695, %v5839_v48  ;;  %v5842_v59 = vadd.f32 %v6891_v11, %v10332_v43 }
 0x542   : > { %8609 = vpow2.f32 %v6832_v46  ;;  %v6833_v52 = vmul.f32 -1.442695, %v5842_v59  ;;  %v6892_v25 = vpop.f32.mrb[100].mxu1 }
 0x543   : > { %v6893_v34 = vpop.f32.mrb[101].mxu1 }
 0x544   : > { %8611 = vpow2.f32 %v6833_v52  ;;  %v6894_v7 = vadd.f32 %v6893_v34, %v6892_v25  ;;  %v6895_v38 = vpop.f32.mrb[102].mxu1 }
 0x545   : > { %v6896_v36 = vpop.f32.mrb[103].mxu1 }
 0x546   : > { %v10337_v61 = vadd.f32 %v6894_v7, %v10332_v43  ;;  %v6897_v2 = vadd.f32 %v6896_v36, %v6895_v38 }
 0x548   : > { %v6834_v39 = vmul.f32 -1.442695, %v10337_v61  ;;  %v10341_v47 = vadd.f32 %v6897_v2, %v10332_v43 }
 0x54a   : > { %8613 = vpow2.f32 %v6834_v39  ;;  %v6835_v1 = vmul.f32 -1.442695, %v10341_v47 }
 0x54b   : > { %v6898_v21 = vpop.f32.mrb[104].mxu1 }
 0x54c   : > { %v8610_v8 = vpop.eup %8609  ;;  %8615 = vpow2.f32 %v6835_v1  ;;  %v6899_v26 = vpop.f32.mrb[105].mxu1 }
 0x54d   : > { %v6061_v29 = vadd.f32 1.0, %v8610_v8  ;;  %v6900_v63 = vadd.f32 %v6899_v26, %v6898_v21  ;;  %v6901_v41 = vpop.f32.mrb[106].mxu1 }
 0x54e   : > { %v8612_v33 = vpop.eup %8611  ;;  %v6902_v32 = vpop.f32.mrb[107].mxu1 }
 0x54f   : > { %8617 = vrcp.f32 %v6061_v29  ;;  %v6062_v37 = vadd.f32 1.0, %v8612_v33  ;;  %v10345_v56 = vadd.f32 %v6900_v63, %v10332_v43  ;;  %v6903_v3 = vadd.f32 %v6902_v32, %v6901_v41 }
 0x551   : > { %8619 = vrcp.f32 %v6062_v37  ;;  %v6836_v14 = vmul.f32 -1.442695, %v10345_v56  ;;  %v10349_v24 = vadd.f32 %v6903_v3, %v10332_v43 }
 0x553   : > { %8621 = vpow2.f32 %v6836_v14  ;;  %v6837_v40 = vmul.f32 -1.442695, %v10349_v24 }
 0x554   : > { %v8614_v45 = vpop.eup %8613 }
 0x555   : > { %v6063_v19 = vadd.f32 1.0, %v8614_v45  ;;  %8623 = vpow2.f32 %v6837_v40  ;;  %v6904_v58 = vpop.f32.mrb[108].mxu1 }
 0x556   : > { %v8616_v16 = vpop.eup %8615  ;;  %v6905_v30 = vpop.f32.mrb[109].mxu1 }
 0x557   : > { %8625 = vrcp.f32 %v6063_v19  ;;  %v6064_v12 = vadd.f32 1.0, %v8616_v16  ;;  %v6906_v6 = vadd.f32 %v6905_v30, %v6904_v58  ;;  %v6907_v35 = vpop.f32.mrb[110].mxu1 }
 0x558   : > { %v6908_v49 = vpop.f32.mrb[111].mxu1 }
 0x559   : > { %v8618_v5 = vpop.eup %8617  ;;  %8627 = vrcp.f32 %v6064_v12  ;;  %v10354_v4 = vadd.f32 %v6906_v6, %v10332_v43  ;;  %v6909_v54 = vadd.f32 %v6908_v49, %v6907_v35 }
 0x55a   : > { %v6157_v57 = vmul.f32 %v8618_v5, %v5839_v48 }
 0x55b   : > { %v8620_v17 = vpop.eup %8619  ;;  %v6838_v9 = vmul.f32 -1.442695, %v10354_v4  ;;  %v10358_v50 = vadd.f32 %v6909_v54, %v10332_v43 }
 0x55c   : > { %6189 = vst [vmem:[%s10360_s29] sm:$0xff] %v6157_v57  ;;  %v6158_v15 = vmul.f32 %v8620_v17, %v5842_v59 }
 0x55d   : > { %v8622_v28 = vpop.eup %8621  ;;  %8629 = vpow2.f32 %v6838_v9  ;;  %v6839_v60 = vmul.f32 -1.442695, %v10358_v50  ;;  %v6910_v55 = vpop.f32.mrb[112].mxu1 }
 0x55e   : > { %6190 = vst [vmem:[%s10360_s29 + $0x8] sm:$0xff] %v6158_v15  ;;  %v6065_v13 = vadd.f32 1.0, %v8622_v28  ;;  %v6911_v44 = vpop.f32.mrb[113].mxu1 }
 0x55f   : > { %v8624_v27 = vpop.eup %8623  ;;  %8631 = vpow2.f32 %v6839_v60  ;;  %v6912_v53 = vadd.f32 %v6911_v44, %v6910_v55  ;;  %v6913_v62 = vpop.f32.mrb[114].mxu1 }
 0x560   : > { %8633 = vrcp.f32 %v6065_v13  ;;  %v6066_v0 = vadd.f32 1.0, %v8624_v27  ;;  %v6914_v22 = vpop.f32.mrb[115].mxu1 }
 0x561   : > { %v8626_v42 = vpop.eup %8625  ;;  %v10366_v20 = vadd.f32 %v6912_v53, %v10332_v43  ;;  %v6915_v23 = vadd.f32 %v6914_v22, %v6913_v62 }
 0x562   : > { %v6159_v10 = vmul.f32 %v8626_v42, %v10337_v61  ;;  %8635 = vrcp.f32 %v6066_v0 }
 0x563   : > { %v8628_v18 = vpop.eup %8627  ;;  %v6840_v31 = vmul.f32 -1.442695, %v10366_v20  ;;  %v10371_v51 = vadd.f32 %v6915_v23, %v10332_v43 }
 0x564   : > { %6191 = vst [vmem:[%s10360_s29 + $0x10] sm:$0xff] %v6159_v10  ;;  %v6160_v48 = vmul.f32 %v8628_v18, %v10341_v47 }
 0x565   : > { %8637 = vpow2.f32 %v6840_v31  ;;  %v6841_v11 = vmul.f32 -1.442695, %v10371_v51  ;;  %v6916_v46 = vpop.f32.mrb[116].mxu1 }
 0x566   : > { %6192 = vst [vmem:[%s10360_s29 + $0x18] sm:$0xff] %v6160_v48  ;;  %v6917_v59 = vpop.f32.mrb[117].mxu1 }
 0x567   : > { %v8630_v52 = vpop.eup %8629  ;;  %8639 = vpow2.f32 %v6841_v11  ;;  %v6918_v25 = vadd.f32 %v6917_v59, %v6916_v46  ;;  %v6919_v34 = vpop.f32.mrb[118].mxu1 }
 0x568   : > { %v6067_v7 = vadd.f32 1.0, %v8630_v52  ;;  %v6920_v38 = vpop.f32.mrb[119].mxu1 }
 0x569   : > { %v8632_v36 = vpop.eup %8631  ;;  %v10378_v61 = vadd.f32 %v6918_v25, %v10332_v43  ;;  %v6921_v2 = vadd.f32 %v6920_v38, %v6919_v34 }
 0x56a   : > { %v8634_v39 = vpop.eup %8633  ;;  %8641 = vrcp.f32 %v6067_v7  ;;  %v6068_v47 = vadd.f32 1.0, %v8632_v36 }
 0x56b   : > { %v6161_v1 = vmul.f32 %v8634_v39, %v10345_v56  ;;  %v6842_v21 = vmul.f32 -1.442695, %v10378_v61  ;;  %v10383_v8 = vadd.f32 %v6921_v2, %v10332_v43 }
 0x56c   : > { %v8636_v26 = vpop.eup %8635  ;;  %8643 = vrcp.f32 %v6068_v47 }
 0x56d   : > { %6193 = vst [vmem:[%s10360_s29 + $0x20] sm:$0xff] %v6161_v1  ;;  %v6162_v29 = vmul.f32 %v8636_v26, %v10349_v24  ;;  %8645 = vpow2.f32 %v6842_v21  ;;  %v6843_v63 = vmul.f32 -1.442695, %v10383_v8  ;;  %v6922_v41 = vpop.f32.mrb[120].mxu1 }
 0x56e   : > { %v6923_v33 = vpop.f32.mrb[121].mxu1 }
 0x56f   : > { %v8638_v32 = vpop.eup %8637  ;;  %6194 = vst [vmem:[%s10360_s29 + $0x28] sm:$0xff] %v6162_v29  ;;  %8647 = vpow2.f32 %v6843_v63  ;;  %v6924_v37 = vadd.f32 %v6923_v33, %v6922_v41  ;;  %v6925_v56 = vpop.f32.mrb[122].mxu1 }
 0x570   : > { %v6069_v3 = vadd.f32 1.0, %v8638_v32  ;;  %v6926_v14 = vpop.f32.mrb[123].mxu1 }
 0x571   : > { %v8640_v40 = vpop.eup %8639  ;;  %v10390_v45 = vadd.f32 %v6924_v37, %v10332_v43  ;;  %v6927_v19 = vadd.f32 %v6926_v14, %v6925_v56 }
 0x572   : > { %8649 = vrcp.f32 %v6069_v3  ;;  %v6070_v24 = vadd.f32 1.0, %v8640_v40 }
 0x573   : > { %v6844_v58 = vmul.f32 -1.442695, %v10390_v45  ;;  %v10394_v16 = vadd.f32 %v6927_v19, %v10332_v43 }
 0x574   : > { %v8642_v30 = vpop.eup %8641  ;;  %8651 = vrcp.f32 %v6070_v24 }
 0x575   : > { %v6163_v12 = vmul.f32 %v8642_v30, %v10354_v4  ;;  %8653 = vpow2.f32 %v6844_v58  ;;  %v6845_v6 = vmul.f32 -1.442695, %v10394_v16  ;;  %v6928_v35 = vpop.f32.mrb[124].mxu1 }
 0x576   : > { %v8644_v49 = vpop.eup %8643  ;;  %v6929_v5 = vpop.f32.mrb[125].mxu1 }
 0x577   : > { %v8646_v54 = vpop.eup %8645  ;;  %6195 = vst [vmem:[%s10360_s29 + $0x30] sm:$0xff] %v6163_v12  ;;  %v6164_v57 = vmul.f32 %v8644_v49, %v10358_v50  ;;  %8655 = vpow2.f32 %v6845_v6  ;;  %v6930_v17 = vadd.f32 %v6929_v5, %v6928_v35  ;;  %v6931_v9 = vpop.f32.mrb[126].mxu1 }
 0x578   : > { %v6071_v15 = vadd.f32 1.0, %v8646_v54  ;;  %v6932_v28 = vpop.f32.mrb[127].mxu1 }
 0x579   : > { %v8648_v60 = vpop.eup %8647  ;;  %6196 = vst [vmem:[%s10360_s29 + $0x38] sm:$0xff] %v6164_v57  ;;  %v10402_v4 = vadd.f32 %v6930_v17, %v10332_v43  ;;  %v6933_v55 = vadd.f32 %v6932_v28, %v6931_v9 }
 0x57a   : > { %8657 = vrcp.f32 %v6071_v15  ;;  %v6072_v13 = vadd.f32 1.0, %v8648_v60 }
 0x57b   : > { %v6846_v44 = vmul.f32 -1.442695, %v10402_v4  ;;  %v10406_v27 = vadd.f32 %v6933_v55, %v10332_v43 }
 0x57c   : > { %v8650_v50 = vpop.eup %8649  ;;  %8659 = vrcp.f32 %v6072_v13 }
 0x57d   : > { %v6165_v53 = vmul.f32 %v8650_v50, %v10366_v20  ;;  %8661 = vpow2.f32 %v6846_v44  ;;  %v6847_v62 = vmul.f32 -1.442695, %v10406_v27 }
 0x57e   : > { %v8652_v0 = vpop.eup %8651  ;;  %v6934_v22 = vpop.f32.mrb[128].mxu1 }
 0x57f   : > { %v8654_v42 = vpop.eup %8653  ;;  %6197 = vst [vmem:[%s10360_s29 + $0x40] sm:$0xff] %v6165_v53  ;;  %v6166_v23 = vmul.f32 %v8652_v0, %v10371_v51  ;;  %8663 = vpow2.f32 %v6847_v62  ;;  %v6935_v10 = vpop.f32.mrb[129].mxu1 }
 0x580   : > { %v6073_v18 = vadd.f32 1.0, %v8654_v42  ;;  %v6936_v31 = vadd.f32 %v6935_v10, %v6934_v22  ;;  %v6937_v48 = vpop.f32.mrb[130].mxu1 }
 0x581   : > { %v8656_v11 = vpop.eup %8655  ;;  %6198 = vst [vmem:[%s10360_s29 + $0x48] sm:$0xff] %v6166_v23  ;;  %v6938_v46 = vpop.f32.mrb[131].mxu1 }
 0x582   : > { %8665 = vrcp.f32 %v6073_v18  ;;  %v6074_v20 = vadd.f32 1.0, %v8656_v11  ;;  %v10414_v59 = vadd.f32 %v6936_v31, %v10332_v43  ;;  %v6939_v52 = vadd.f32 %v6938_v46, %v6937_v48 }
 0x584   : > { %v8658_v25 = vpop.eup %8657  ;;  %8667 = vrcp.f32 %v6074_v20  ;;  %v6848_v34 = vmul.f32 -1.442695, %v10414_v59  ;;  %v10418_v51 = vadd.f32 %v6939_v52, %v10332_v43 }
 0x585   : > { %v6167_v7 = vmul.f32 %v8658_v25, %v10378_v61 }
 0x586   : > { %v8660_v38 = vpop.eup %8659  ;;  %8669 = vpow2.f32 %v6848_v34  ;;  %v6849_v36 = vmul.f32 -1.442695, %v10418_v51  ;;  %v6940_v2 = vpop.f32.mrb[132].mxu1 }
 0x587   : > { %v8662_v39 = vpop.eup %8661  ;;  %6199 = vst [vmem:[%s10360_s29 + $0x50] sm:$0xff] %v6167_v7  ;;  %v6168_v47 = vmul.f32 %v8660_v38, %v10383_v8  ;;  %v6941_v1 = vpop.f32.mrb[133].mxu1 }
 0x588   : > { %v6075_v21 = vadd.f32 1.0, %v8662_v39  ;;  %8671 = vpow2.f32 %v6849_v36  ;;  %v6942_v26 = vadd.f32 %v6941_v1, %v6940_v2  ;;  %v6943_v29 = vpop.f32.mrb[134].mxu1 }
 0x589   : > { %v8664_v63 = vpop.eup %8663  ;;  %6200 = vst [vmem:[%s10360_s29 + $0x58] sm:$0xff] %v6168_v47  ;;  %v6944_v41 = vpop.f32.mrb[135].mxu1 }
 0x58a   : > { %8673 = vrcp.f32 %v6075_v21  ;;  %v6076_v61 = vadd.f32 1.0, %v8664_v63  ;;  %v10426_v33 = vadd.f32 %v6942_v26, %v10332_v43  ;;  %v6945_v32 = vadd.f32 %v6944_v41, %v6943_v29 }
 0x58c   : > { %v8666_v37 = vpop.eup %8665  ;;  %8675 = vrcp.f32 %v6076_v61  ;;  %v6850_v8 = vmul.f32 -1.442695, %v10426_v33  ;;  %v10430_v56 = vadd.f32 %v6945_v32, %v10332_v43 }
 0x58d   : > { %v6169_v3 = vmul.f32 %v8666_v37, %v10390_v45 }
 0x58e   : > { %v8668_v14 = vpop.eup %8667  ;;  %8677 = vpow2.f32 %v6850_v8  ;;  %v6851_v40 = vmul.f32 -1.442695, %v10430_v56  ;;  %v6946_v19 = vpop.f32.mrb[136].mxu1 }
 0x58f   : > { %6201 = vst [vmem:[%s10360_s29 + $0x60] sm:$0xff] %v6169_v3  ;;  %v6170_v24 = vmul.f32 %v8668_v14, %v10394_v16  ;;  %v6947_v58 = vpop.f32.mrb[137].mxu1 }
 0x590   : > { %v8670_v30 = vpop.eup %8669  ;;  %8679 = vpow2.f32 %v6851_v40  ;;  %v6948_v12 = vadd.f32 %v6947_v58, %v6946_v19  ;;  %v6949_v6 = vpop.f32.mrb[138].mxu1 }
 0x591   : > { %6202 = vst [vmem:[%s10360_s29 + $0x68] sm:$0xff] %v6170_v24  ;;  %v6077_v35 = vadd.f32 1.0, %v8670_v30  ;;  %v6950_v49 = vpop.f32.mrb[139].mxu1 }
 0x592   : > { %v8672_v5 = vpop.eup %8671  ;;  %v10438_v45 = vadd.f32 %v6948_v12, %v10332_v43  ;;  %v6951_v54 = vadd.f32 %v6950_v49, %v6949_v6 }
 0x593   : > { %8681 = vrcp.f32 %v6077_v35  ;;  %v6078_v57 = vadd.f32 1.0, %v8672_v5 }
 0x594   : > { %v8674_v17 = vpop.eup %8673  ;;  %v6852_v16 = vmul.f32 -1.442695, %v10438_v45  ;;  %v10442_v9 = vadd.f32 %v6951_v54, %v10332_v43 }
 0x595   : > { %v6171_v15 = vmul.f32 %v8674_v17, %v10402_v4  ;;  %8683 = vrcp.f32 %v6078_v57 }
 0x596   : > { %v8676_v28 = vpop.eup %8675  ;;  %8685 = vpow2.f32 %v6852_v16  ;;  %v6853_v60 = vmul.f32 -1.442695, %v10442_v9 }
 0x597   : > { %6203 = vst [vmem:[%s10360_s29 + $0x70] sm:$0xff] %v6171_v15  ;;  %v6172_v55 = vmul.f32 %v8676_v28, %v10406_v27  ;;  %v6952_v13 = vpop.f32.mrb[140].mxu1 }
 0x598   : > { %v8678_v44 = vpop.eup %8677  ;;  %8687 = vpow2.f32 %v6853_v60  ;;  %v6953_v50 = vpop.f32.mrb[141].mxu1 }
 0x599   : > { %6204 = vst [vmem:[%s10360_s29 + $0x78] sm:$0xff] %v6172_v55  ;;  %v6079_v53 = vadd.f32 1.0, %v8678_v44  ;;  %v6954_v62 = vadd.f32 %v6953_v50, %v6952_v13  ;;  %v6955_v0 = vpop.f32.mrb[142].mxu1 }
 0x59a   : > { %v8680_v22 = vpop.eup %8679  ;;  %v6956_v42 = vpop.f32.mrb[143].mxu1 }
 0x59b   : > { %8689 = vrcp.f32 %v6079_v53  ;;  %v6080_v4 = vadd.f32 1.0, %v8680_v22  ;;  %v10450_v23 = vadd.f32 %v6954_v62, %v10332_v43  ;;  %v6957_v10 = vadd.f32 %v6956_v42, %v6955_v0 }
 0x59d   : > { %v8682_v18 = vpop.eup %8681  ;;  %8691 = vrcp.f32 %v6080_v4  ;;  %v6854_v27 = vmul.f32 -1.442695, %v10450_v23  ;;  %v10454_v31 = vadd.f32 %v6957_v10, %v10332_v43 }
 0x59e   : > { %v6173_v48 = vmul.f32 %v8682_v18, %v10414_v59 }
 0x59f   : > { %v8684_v11 = vpop.eup %8683  ;;  %8693 = vpow2.f32 %v6854_v27  ;;  %v6855_v46 = vmul.f32 -1.442695, %v10454_v31  ;;  %v6958_v20 = vpop.f32.mrb[144].mxu1 }
 0x5a0   : > { %v8686_v52 = vpop.eup %8685  ;;  %6205 = vst [vmem:[%s10360_s29 + $0x80] sm:$0xff] %v6173_v48  ;;  %v6174_v25 = vmul.f32 %v8684_v11, %v10418_v51  ;;  %v6959_v34 = vpop.f32.mrb[145].mxu1 }
 0x5a1   : > { %v6081_v7 = vadd.f32 1.0, %v8686_v52  ;;  %8695 = vpow2.f32 %v6855_v46  ;;  %v6960_v38 = vadd.f32 %v6959_v34, %v6958_v20  ;;  %v6961_v36 = vpop.f32.mrb[146].mxu1 }
 0x5a2   : > { %v8688_v2 = vpop.eup %8687  ;;  %6206 = vst [vmem:[%s10360_s29 + $0x88] sm:$0xff] %v6174_v25  ;;  %v6962_v39 = vpop.f32.mrb[147].mxu1 }
 0x5a3   : > { %8697 = vrcp.f32 %v6081_v7  ;;  %v6082_v59 = vadd.f32 1.0, %v8688_v2  ;;  %v10462_v47 = vadd.f32 %v6960_v38, %v10332_v43  ;;  %v6963_v1 = vadd.f32 %v6962_v39, %v6961_v36 }
 0x5a5   : > { %v8690_v21 = vpop.eup %8689  ;;  %8699 = vrcp.f32 %v6082_v59  ;;  %v6856_v51 = vmul.f32 -1.442695, %v10462_v47  ;;  %v10466_v26 = vadd.f32 %v6963_v1, %v10332_v43 }
 0x5a6   : > { %v6175_v29 = vmul.f32 %v8690_v21, %v10426_v33 }
 0x5a7   : > { %v8692_v63 = vpop.eup %8691  ;;  %8701 = vpow2.f32 %v6856_v51  ;;  %v6857_v41 = vmul.f32 -1.442695, %v10466_v26  ;;  %v6964_v61 = vpop.f32.mrb[148].mxu1 }
 0x5a8   : > { %6207 = vst [vmem:[%s10360_s29 + $0x90] sm:$0xff] %v6175_v29  ;;  %v6176_v32 = vmul.f32 %v8692_v63, %v10430_v56  ;;  %v6965_v37 = vpop.f32.mrb[149].mxu1 }
 0x5a9   : > { %v8694_v8 = vpop.eup %8693  ;;  %8703 = vpow2.f32 %v6857_v41  ;;  %v6966_v3 = vadd.f32 %v6965_v37, %v6964_v61  ;;  %v6967_v14 = vpop.f32.mrb[150].mxu1 }
 0x5aa   : > { %6208 = vst [vmem:[%s10360_s29 + $0x98] sm:$0xff] %v6176_v32  ;;  %v6083_v40 = vadd.f32 1.0, %v8694_v8  ;;  %v6968_v19 = vpop.f32.mrb[151].mxu1 }
 0x5ab   : > { %v8696_v24 = vpop.eup %8695  ;;  %v10474_v33 = vadd.f32 %v6966_v3, %v10332_v43  ;;  %v6969_v58 = vadd.f32 %v6968_v19, %v6967_v14 }
 0x5ac   : > { %8705 = vrcp.f32 %v6083_v40  ;;  %v6084_v30 = vadd.f32 1.0, %v8696_v24 }
 0x5ad   : > { %v8698_v12 = vpop.eup %8697  ;;  %v6858_v56 = vmul.f32 -1.442695, %v10474_v33  ;;  %v10478_v6 = vadd.f32 %v6969_v58, %v10332_v43 }
 0x5ae   : > { %v6177_v35 = vmul.f32 %v8698_v12, %v10438_v45  ;;  %8707 = vrcp.f32 %v6084_v30 }
 0x5af   : > { %v8700_v49 = vpop.eup %8699  ;;  %8709 = vpow2.f32 %v6858_v56  ;;  %v6859_v5 = vmul.f32 -1.442695, %v10478_v6 }
 0x5b0   : > { %6209 = vst [vmem:[%s10360_s29 + $0xa0] sm:$0xff] %v6177_v35  ;;  %v6178_v54 = vmul.f32 %v8700_v49, %v10442_v9  ;;  %v6970_v57 = vpop.f32.mrb[152].mxu1 }
 0x5b1   : > { %v8702_v17 = vpop.eup %8701  ;;  %8711 = vpow2.f32 %v6859_v5  ;;  %v6971_v16 = vpop.f32.mrb[153].mxu1 }
 0x5b2   : > { %6210 = vst [vmem:[%s10360_s29 + $0xa8] sm:$0xff] %v6178_v54  ;;  %v6085_v15 = vadd.f32 1.0, %v8702_v17  ;;  %v6972_v28 = vadd.f32 %v6971_v16, %v6970_v57  ;;  %v6973_v60 = vpop.f32.mrb[154].mxu1 }
 0x5b3   : > { %v8704_v55 = vpop.eup %8703  ;;  %v6974_v13 = vpop.f32.mrb[155].mxu1 }
 0x5b4   : > { %8713 = vrcp.f32 %v6085_v15  ;;  %v6086_v45 = vadd.f32 1.0, %v8704_v55  ;;  %v5951_v44 = vadd.f32 %v6972_v28, %v10332_v43  ;;  %v6975_v50 = vadd.f32 %v6974_v13, %v6973_v60 }
 0x5b6   : > { %v8706_v53 = vpop.eup %8705  ;;  %8715 = vrcp.f32 %v6086_v45  ;;  %v6860_v62 = vmul.f32 -1.442695, %v5951_v44  ;;  %v5954_v9 = vadd.f32 %v6975_v50, %v10332_v43 }
 0x5b7   : > { %v6179_v0 = vmul.f32 %v8706_v53, %v10450_v23 }
 0x5b8   : > { %v8708_v22 = vpop.eup %8707  ;;  %8717 = vpow2.f32 %v6860_v62  ;;  %v6861_v42 = vmul.f32 -1.442695, %v5954_v9  ;;  %v6976_v4 = vpop.f32.mrb[156].mxu1 }
 0x5b9   : > { %v8710_v10 = vpop.eup %8709  ;;  %6211 = vst [vmem:[%s10360_s29 + $0xb0] sm:$0xff] %v6179_v0  ;;  %v6180_v18 = vmul.f32 %v8708_v22, %v10454_v31  ;;  %v6977_v27 = vpop.f32.mrb[157].mxu1 }
 0x5ba   : > { %v6087_v48 = vadd.f32 1.0, %v8710_v10  ;;  %8719 = vpow2.f32 %v6861_v42  ;;  %v6978_v11 = vadd.f32 %v6977_v27, %v6976_v4  ;;  %v6979_v46 = vpop.f32.mrb[158].mxu1 }
 0x5bb   : > { %v8712_v20 = vpop.eup %8711  ;;  %6212 = vst [vmem:[%s10360_s29 + $0xb8] sm:$0xff] %v6180_v18  ;;  %v6980_v52 = vpop.f32.mrb[159].mxu1 }
 0x5bc   : > { %8721 = vrcp.f32 %v6087_v48  ;;  %v6088_v23 = vadd.f32 1.0, %v8712_v20  ;;  %v5959_v25 = vadd.f32 %v6978_v11, %v10332_v43  ;;  %v6981_v34 = vadd.f32 %v6980_v52, %v6979_v46 }
 0x5be   : > { %v8714_v7 = vpop.eup %8713  ;;  %8723 = vrcp.f32 %v6088_v23  ;;  %v6862_v38 = vmul.f32 -1.442695, %v5959_v25  ;;  %v5962_v31 = vadd.f32 %v6981_v34, %v10332_v43 }
 0x5bf   : > { %v6181_v36 = vmul.f32 %v8714_v7, %v10462_v47 }
 0x5c0   : > { %v8716_v2 = vpop.eup %8715  ;;  %8725 = vpow2.f32 %v6862_v38  ;;  %v6863_v39 = vmul.f32 -1.442695, %v5962_v31 }
 0x5c1   : > { %6213 = vst [vmem:[%s10360_s29 + $0xc0] sm:$0xff] %v6181_v36  ;;  %v6182_v59 = vmul.f32 %v8716_v2, %v10466_v26 }
 0x5c2   : > { %v8718_v1 = vpop.eup %8717  ;;  %8727 = vpow2.f32 %v6863_v39 }
 0x5c3   : > { %6214 = vst [vmem:[%s10360_s29 + $0xc8] sm:$0xff] %v6182_v59  ;;  %v6089_v21 = vadd.f32 1.0, %v8718_v1 }
 0x5c4   : > { %v8720_v51 = vpop.eup %8719 }
 0x5c5   : > { %8729 = vrcp.f32 %v6089_v21  ;;  %v6090_v29 = vadd.f32 1.0, %v8720_v51 }
 0x5c6   : > { %v8722_v63 = vpop.eup %8721 }
 0x5c7   : > { %v6183_v43 = vmul.f32 %v8722_v63, %v10474_v33  ;;  %8731 = vrcp.f32 %v6090_v29 }
 0x5c8   : > { %v8724_v47 = vpop.eup %8723 }
 0x5c9   : > { %6215 = vst [vmem:[%s10360_s29 + $0xd0] sm:$0xff] %v6183_v43  ;;  %v6184_v41 = vmul.f32 %v8724_v47, %v10478_v6 }
 0x5ca   : > { %v8726_v26 = vpop.eup %8725 }
 0x5cb   : > { %6216 = vst [vmem:[%s10360_s29 + $0xd8] sm:$0xff] %v6184_v41  ;;  %v6091_v61 = vadd.f32 1.0, %v8726_v26 }
 0x5cc   : > { %v8728_v32 = vpop.eup %8727 }
 0x5cd   : > { %8733 = vrcp.f32 %v6091_v61  ;;  %v6092_v37 = vadd.f32 1.0, %v8728_v32 }
 0x5cf   : > { %v8730_v8 = vpop.eup %8729  ;;  %8735 = vrcp.f32 %v6092_v37 }
 0x5d0   : > { %v6185_v3 = vmul.f32 %v8730_v8, %v5951_v44 }
 0x5d1   : > { %v8732_v14 = vpop.eup %8731 }
 0x5d2   : > { %6217 = vst [vmem:[%s10360_s29 + $0xe0] sm:$0xff] %v6185_v3  ;;  %v6186_v40 = vmul.f32 %v8732_v14, %v5954_v9 }
 0x5d4   : > { %6218 = vst [vmem:[%s10360_s29 + $0xe8] sm:$0xff] %v6186_v40 }
 0x5d7   : > { %v8734_v19 = vpop.eup %8733 }
 0x5d8   : > { %v6187_v24 = vmul.f32 %v8734_v19, %v5959_v25 }
 0x5d9   : > { %v8736_v33 = vpop.eup %8735 }
 0x5da   : > { %6219 = vst [vmem:[%s10360_s29 + $0xf0] sm:$0xff] %v6187_v24  ;;  %v6188_v58 = vmul.f32 %v8736_v33, %v5962_v31 }
 0x5dc   : > { %6220 = vst [vmem:[%s10360_s29 + $0xf8] sm:$0xff] %v6188_v58 }
 0x5dd   : > { %8880 = shalt.err (!%p8877_p4)
}
 0x5de   : > { %s8881_s14 = scalar_lea.hbm %s10508_s23, 4096  ;;  %s8885_s17 = scalar_lea.hbm %s10563_s7, 8192 }
 0x5df   : > { %p8882_p9 = scmp.ne.s32.totalorder %s10508_s23, %s8881_s14  ;;  %p8886_p8 = scmp.lt.u32.totalorder %s10508_s23, %s10563_s7 }
 0x5e0   : > { %p8887_p13 = scmp.lt.u32.totalorder %s8885_s17, %s8881_s14  ;;  %p8889_p10 = scmp.lt.u32.totalorder %s8881_s14, %s10508_s23 }
 0x5e1   : > { %p8883_p0 = pnand %p8882_p9, %p9141_p5 }
 0x5e2   : > { %p8888_p6 = por %p8887_p13, %p8886_p8 }
 0x5e3   : > { %p8884_p11 = pneg %p8883_p0 }
 0x5e4   : > { %p8890_p3 = por %p8889_p10, %p8888_p6 }
 0x5e6   : > { %p8891_p7 = pnand %p8890_p3, %p8884_p11 }
 0x5e8   : > { %8894 = shalt.err (!%p8891_p7)
}
 0x5e9   : > { %s8957_s16 = smov 128   ;;  %s8958_s22 = smov 8  }
 0x5ea   : > { %7671 = dma.vmem_to_hbm [thread:$0]  (%p9141_p5), %s10510_s10, 4096, %s10508_s23, %s6222_s12, %s8957_s16, %s8957_s16, %s8958_s22  }
 0x5eb PF: > { %s6250_s30 = sand.u32 1, %s8929_s24   ;;  %p10608_p12 = scmp.ne.s32.totalorder %s10571_s8, 0 }
 0x5ec   : > { %p10609_p2 = scmp.ge.s32.totalorder %s8941_s27, 2  ;;  %s6251_s28 = scalar_lea.sflag [#allocation4], %s6250_s30 }
 0x5ee   : > { %p7688_p1 = pnand %p10609_p2, %p10608_p12 }
 0x5f0   : > { %8924 = dma.done.wait (!%p7688_p1), %s6251_s28, 4096  }
 0x5f1   : > { %8926 = vsyncadd (!%p7688_p1), %s6251_s28, 4294963200  ;;  %p22_p4 = scmp.ge.s32.totalorder %s9127_s13, 4   ;;  %s10610_s24 = smov %s8933_s25 }
 0x5f2   : > { %s10611_s25 = smov %s8937_s26  ;;  %s10612_s26 = smov %s9137_s18 }
 0x5f3   : > { %s10613_s27 = smov %s9127_s13  ;;  %24 = sbr.rel (!%p22_p4) target bundleno = 9 (0x9), region = 105 }
 0x5fa   :  { %6256 = vsyncpa [#allocation3], 1 }
 0x5fb   :  { %6258 = vsyncpa [#allocation3 + $0x1], 1 }
 0x5fc   :  { %6259 = vsyncpa [#allocation6], 1 }
 0x5fd   :  { %6260 = vsyncpa [#allocation9], 1 }
 0x5fe   :  { %6261 = vsyncpa [#allocation4], 1 }
 0x5ff   :  { %6263 = vsyncpa [#allocation4 + $0x1], 1 }

</bundles_post_ra>
